<compile_context>
chip_gen: v7x
topology: tpu7x:2x2x1
jax: 0.10.0
libtpu: 0.0.40
codegen_flags: <defaults>
</compile_context>

<pallas_src>
import jax
import jax.numpy as jnp
from jax import lax
from jax.experimental import pallas as pl
from jax.experimental.pallas import tpu as pltpu

H = W = 32          # LeNet-5 implies 32x32 input (16*5*5 = 400 flat features)
L = H * W           # flattened image length (lane axis)
K = 5               # conv kernel size


# ---------------------------------------------------------------------------
# Fused Pallas kernel: one image per grid step.
# ---------------------------------------------------------------------------
def _lenet5_kernel(x_ref, c1w_ref, c1b_ref, c2w_ref, c2b_ref,
                   f1w_ref, f1b_ref, f2w_ref, f2b_ref, f3w_ref, f3b_ref,
                   o_ref):
    x = x_ref[0]                                        # (3, L)

    def shifter(plane):
        # sh(d)[:, i] == plane[:, i + d] on the valid region (wrap unused).
        doubled = jnp.concatenate([plane, plane], axis=1)   # aligned concat
        def sh(d):
            return plane if d == 0 else doubled[:, d:d + L]
        return sh

    def conv(plane, w_ref, b_ref, step):
        sh = shifter(plane)
        acc = None
        for ki in range(K):
            for kj in range(K):
                wk = w_ref[ki * K + kj]                 # (OC, C) tap
                t = jnp.dot(wk, sh(step * (ki * W + kj)),
                            preferred_element_type=jnp.float32)
                acc = t if acc is None else acc + t
        return jnp.maximum(acc + b_ref[...], 0.0)       # bias + ReLU

    def pool(plane, step):
        sh = shifter(plane)
        return jnp.maximum(jnp.maximum(sh(0), sh(step)),
                           jnp.maximum(sh(step * W), sh(step * W + step)))

    r1 = conv(x, c1w_ref, c1b_ref, step=1)              # (6, L),  valid h,w<28
    p1 = pool(r1, step=1)                               # valid at stride-2 grid
    r2 = conv(p1, c2w_ref, c2b_ref, step=2)             # (16, L), valid stride-2
    p2 = pool(r2, step=2)                               # valid at stride-4 grid

    # Gather the 16x5x5 valid features -> (400, 1); row order = (qh, qw, c),
    # matching the pre-reordered fc1 weight.
    cols = []
    for qh in range(5):
        for qw in range(5):
            pos = 4 * qh * W + 4 * qw
            cols.append(p2[:, pos:pos + 1])             # (16, 1)
    a = jnp.concatenate(cols, axis=0)                   # (400, 1)

    # FC head in column ("transposed") orientation: y = W @ x + b.
    h1 = jnp.maximum(
        jnp.dot(f1w_ref[...], a, preferred_element_type=jnp.float32)
        + f1b_ref[...], 0.0)                            # (120, 1)
    h2 = jnp.maximum(
        jnp.dot(f2w_ref[...], h1, preferred_element_type=jnp.float32)
        + f2b_ref[...], 0.0)                            # (84, 1)
    y = (jnp.dot(f3w_ref[...], h2, preferred_element_type=jnp.float32)
         + f3b_ref[...])                                # (13, 1)

    o_ref[0] = y                                        # block (1, 13, 1)


# ---------------------------------------------------------------------------
# Parameters (PyTorch layout) and one-time kernel-layout prep.
# ---------------------------------------------------------------------------
def init_params(key):
    ks = jax.random.split(key, 10)

    def u(k, shape, fan_in):
        bound = 1.0 / jnp.sqrt(fan_in)
        return jax.random.uniform(k, shape, jnp.float32, -bound, bound)

    return {
        "conv1_w": u(ks[0], (6, 3, K, K), 3 * K * K),
        "conv1_b": u(ks[1], (6,), 3 * K * K),
        "conv2_w": u(ks[2], (16, 6, K, K), 6 * K * K),
        "conv2_b": u(ks[3], (16,), 6 * K * K),
        "fc1_w": u(ks[4], (120, 400), 400),
        "fc1_b": u(ks[5], (120,), 400),
        "fc2_w": u(ks[6], (84, 120), 120),
        "fc2_b": u(ks[7], (84,), 120),
        "fc3_w": u(ks[8], (13, 84), 84),
        "fc3_b": u(ks[9], (13,), 84),
    }


def prepare_params(p):
    """One-time re-layout of PyTorch-style params for the fused kernel."""
    # conv weights -> (k*k, OC, C) so the kernel indexes one (OC, C) tap per
    # (ki, kj); fc1 columns reordered from (c, qh, qw) to (qh, qw, c) to match
    # the in-kernel feature gather; biases as (n, 1) columns.
    f1 = p["fc1_w"].reshape(120, 16, 25)                      # [n, c, q]
    f1 = jnp.transpose(f1, (0, 2, 1)).reshape(120, 400)       # [n, q*16 + c]
    return {
        "c1w": jnp.transpose(p["conv1_w"], (2, 3, 0, 1)).reshape(K * K, 6, 3),
        "c1b": p["conv1_b"].reshape(6, 1),
        "c2w": jnp.transpose(p["conv2_w"], (2, 3, 0, 1)).reshape(K * K, 16, 6),
        "c2b": p["conv2_b"].reshape(16, 1),
        "f1w": f1,
        "f1b": p["fc1_b"].reshape(120, 1),
        "f2w": p["fc2_w"],
        "f2b": p["fc2_b"].reshape(84, 1),
        "f3w": p["fc3_w"],
        "f3b": p["fc3_b"].reshape(13, 1),
    }


# ---------------------------------------------------------------------------
# Forward pass: one pallas_call, grid over batch.
# ---------------------------------------------------------------------------
@jax.jit
def lenet5_forward(prep, x):
    B, C, HH, WW = x.shape
    assert (C, HH, WW) == (3, H, W), "LeNet-5 expects (B, 3, 32, 32) input"
    xr = x.reshape(B, C, L)                              # (B, 3, 1024)

    def full(shape):
        return pl.BlockSpec(shape, lambda b: (0,) * len(shape))

    out = pl.pallas_call(
        _lenet5_kernel,
        out_shape=jax.ShapeDtypeStruct((B, 13, 1), jnp.float32),
        grid=(B,),
        in_specs=[
            pl.BlockSpec((1, 3, L), lambda b: (b, 0, 0)),
            full((K * K, 6, 3)), full((6, 1)),
            full((K * K, 16, 6)), full((16, 1)),
            full((120, 400)), full((120, 1)),
            full((84, 120)), full((84, 1)),
            full((13, 84)), full((13, 1)),
        ],
        out_specs=pl.BlockSpec((1, 13, 1), lambda b: (b, 0, 0)),
        compiler_params=pltpu.CompilerParams(
            dimension_semantics=("parallel",)),
    )(xr, prep["c1w"], prep["c1b"], prep["c2w"], prep["c2b"],
      prep["f1w"], prep["f1b"], prep["f2w"], prep["f2b"],
      prep["f3w"], prep["f3b"])
    return out.reshape(B, 13)


# ---------------------------------------------------------------------------
# Pure-JAX reference (PyTorch semantics) for a runtime correctness check.
# ---------------------------------------------------------------------------
def lenet5_reference(p, x):
    dn = ("NCHW", "OIHW", "NCHW")
    y = lax.conv_general_dilated(x, p["conv1_w"], (1, 1), "VALID",
                                 dimension_numbers=dn)
    y = jax.nn.relu(y + p["conv1_b"][None, :, None, None])
    y = lax.reduce_window(y, -jnp.inf, lax.max, (1, 1, 2, 2), (1, 1, 2, 2),
                          "VALID")
    y = lax.conv_general_dilated(y, p["conv2_w"], (1, 1), "VALID",
                                 dimension_numbers=dn)
    y = jax.nn.relu(y + p["conv2_b"][None, :, None, None])
    y = lax.reduce_window(y, -jnp.inf, lax.max, (1, 1, 2, 2), (1, 1, 2, 2),
                          "VALID")
    y = y.reshape(y.shape[0], -1)
    y = jax.nn.relu(y @ p["fc1_w"].T + p["fc1_b"])
    y = jax.nn.relu(y @ p["fc2_w"].T + p["fc2_b"])
    return y @ p["fc3_w"].T + p["fc3_b"]


if __name__ == "__main__":
    key = jax.random.PRNGKey(0)
    pkey, xkey = jax.random.split(key)
    params = init_params(pkey)
    prep = prepare_params(params)
    x = jax.random.normal(xkey, (2, 3, H, W), jnp.float32)

    out = jax.block_until_ready(lenet5_forward(prep, x))
    assert out.shape == (2, 13)

    ref = lenet5_reference(params, x)
    err = jnp.max(jnp.abs(out - ref))
    assert jnp.allclose(out, ref, rtol=1e-3, atol=1e-3), f"max abs err {err}"
    print("KERNEL_OK")
</pallas_src>

<mosaic_0001>
module attributes {stable_mosaic.version = 11 : i64} {
  func.func @_lenet5_kernel(%arg0: i32, %arg1: memref<1x3x1024xf32, #tpu.memory_space<vmem>>, %arg2: memref<25x6x3xf32, #tpu.memory_space<vmem>>, %arg3: memref<6x1xf32, #tpu.memory_space<vmem>>, %arg4: memref<25x16x6xf32, #tpu.memory_space<vmem>>, %arg5: memref<16x1xf32, #tpu.memory_space<vmem>>, %arg6: memref<120x400xf32, #tpu.memory_space<vmem>>, %arg7: memref<120x1xf32, #tpu.memory_space<vmem>>, %arg8: memref<84x120xf32, #tpu.memory_space<vmem>>, %arg9: memref<84x1xf32, #tpu.memory_space<vmem>>, %arg10: memref<13x84xf32, #tpu.memory_space<vmem>>, %arg11: memref<13x1xf32, #tpu.memory_space<vmem>>, %arg12: memref<1x13x1xf32, #tpu.memory_space<vmem>>) attributes {dimension_semantics = [#tpu.dimension_semantics<parallel>], iteration_bounds = array<i64: 2>, scalar_prefetch = 0 : i64, scratch_operands = 0 : i64, tpu.core_type = #tpu.core_type<tc>, window_params = [{transform_indices = @transform_0, window_bounds = array<i64: 1, 3, 1024>}, {pipeline_mode = #tpu.pipeline_mode<synchronous>, transform_indices = @transform_1, window_bounds = array<i64: 25, 6, 3>}, {pipeline_mode = #tpu.pipeline_mode<synchronous>, transform_indices = @transform_2, window_bounds = array<i64: 6, 1>}, {pipeline_mode = #tpu.pipeline_mode<synchronous>, transform_indices = @transform_3, window_bounds = array<i64: 25, 16, 6>}, {pipeline_mode = #tpu.pipeline_mode<synchronous>, transform_indices = @transform_4, window_bounds = array<i64: 16, 1>}, {pipeline_mode = #tpu.pipeline_mode<synchronous>, transform_indices = @transform_5, window_bounds = array<i64: 120, 400>}, {pipeline_mode = #tpu.pipeline_mode<synchronous>, transform_indices = @transform_6, window_bounds = array<i64: 120, 1>}, {pipeline_mode = #tpu.pipeline_mode<synchronous>, transform_indices = @transform_7, window_bounds = array<i64: 84, 120>}, {pipeline_mode = #tpu.pipeline_mode<synchronous>, transform_indices = @transform_8, window_bounds = array<i64: 84, 1>}, {pipeline_mode = #tpu.pipeline_mode<synchronous>, transform_indices = @transform_9, window_bounds = array<i64: 13, 84>}, {pipeline_mode = #tpu.pipeline_mode<synchronous>, transform_indices = @transform_10, window_bounds = array<i64: 13, 1>}, {transform_indices = @transform_11, window_bounds = array<i64: 1, 13, 1>}]} {
    %c0 = arith.constant 0 : index
    %c0_0 = arith.constant 0 : index
    %c0_1 = arith.constant 0 : index
    %0 = vector.load %arg1[%c0, %c0_0, %c0_1] : memref<1x3x1024xf32, #tpu.memory_space<vmem>>, vector<1x3x1024xf32>
    %1 = vector.shape_cast %0 : vector<1x3x1024xf32> to vector<3x1024xf32>
    %2 = tpu.concatenate %1, %1 in 1 : vector<3x1024xf32>, vector<3x1024xf32> -> vector<3x2048xf32>
    %c0_2 = arith.constant 0 : index
    %c0_3 = arith.constant 0 : index
    %c0_4 = arith.constant 0 : index
    %3 = vector.load %arg2[%c0_2, %c0_3, %c0_4] : memref<25x6x3xf32, #tpu.memory_space<vmem>>, vector<1x6x3xf32>
    %4 = vector.shape_cast %3 : vector<1x6x3xf32> to vector<6x3xf32>
    %cst = arith.constant dense<0.000000e+00> : vector<6x1024xf32>
    %5 = tpu.matmul %4, %1, %cst {dimension_numbers = #tpu.dot_dimension_numbers<[1], [0], [0], [1], [0, 0, 1, 1], [], []>} : vector<6x3xf32>, vector<3x1024xf32>, vector<6x1024xf32> -> vector<6x1024xf32>
    %c1 = arith.constant 1 : index
    %c0_5 = arith.constant 0 : index
    %c0_6 = arith.constant 0 : index
    %6 = vector.load %arg2[%c1, %c0_5, %c0_6] : memref<25x6x3xf32, #tpu.memory_space<vmem>>, vector<1x6x3xf32>
    %7 = vector.shape_cast %6 : vector<1x6x3xf32> to vector<6x3xf32>
    %8 = vector.extract_strided_slice %2 {offsets = [0, 1], sizes = [3, 1024], strides = [1, 1]} : vector<3x2048xf32> to vector<3x1024xf32>
    %cst_7 = arith.constant dense<0.000000e+00> : vector<6x1024xf32>
    %9 = tpu.matmul %7, %8, %cst_7 {dimension_numbers = #tpu.dot_dimension_numbers<[1], [0], [0], [1], [0, 0, 1, 1], [], []>} : vector<6x3xf32>, vector<3x1024xf32>, vector<6x1024xf32> -> vector<6x1024xf32>
    %10 = arith.addf %5, %9 : vector<6x1024xf32>
    %c2 = arith.constant 2 : index
    %c0_8 = arith.constant 0 : index
    %c0_9 = arith.constant 0 : index
    %11 = vector.load %arg2[%c2, %c0_8, %c0_9] : memref<25x6x3xf32, #tpu.memory_space<vmem>>, vector<1x6x3xf32>
    %12 = vector.shape_cast %11 : vector<1x6x3xf32> to vector<6x3xf32>
    %13 = vector.extract_strided_slice %2 {offsets = [0, 2], sizes = [3, 1024], strides = [1, 1]} : vector<3x2048xf32> to vector<3x1024xf32>
    %cst_10 = arith.constant dense<0.000000e+00> : vector<6x1024xf32>
    %14 = tpu.matmul %12, %13, %cst_10 {dimension_numbers = #tpu.dot_dimension_numbers<[1], [0], [0], [1], [0, 0, 1, 1], [], []>} : vector<6x3xf32>, vector<3x1024xf32>, vector<6x1024xf32> -> vector<6x1024xf32>
    %15 = arith.addf %10, %14 : vector<6x1024xf32>
    %c3 = arith.constant 3 : index
    %c0_11 = arith.constant 0 : index
    %c0_12 = arith.constant 0 : index
    %16 = vector.load %arg2[%c3, %c0_11, %c0_12] : memref<25x6x3xf32, #tpu.memory_space<vmem>>, vector<1x6x3xf32>
    %17 = vector.shape_cast %16 : vector<1x6x3xf32> to vector<6x3xf32>
    %18 = vector.extract_strided_slice %2 {offsets = [0, 3], sizes = [3, 1024], strides = [1, 1]} : vector<3x2048xf32> to vector<3x1024xf32>
    %cst_13 = arith.constant dense<0.000000e+00> : vector<6x1024xf32>
    %19 = tpu.matmul %17, %18, %cst_13 {dimension_numbers = #tpu.dot_dimension_numbers<[1], [0], [0], [1], [0, 0, 1, 1], [], []>} : vector<6x3xf32>, vector<3x1024xf32>, vector<6x1024xf32> -> vector<6x1024xf32>
    %20 = arith.addf %15, %19 : vector<6x1024xf32>
    %c4 = arith.constant 4 : index
    %c0_14 = arith.constant 0 : index
    %c0_15 = arith.constant 0 : index
    %21 = vector.load %arg2[%c4, %c0_14, %c0_15] : memref<25x6x3xf32, #tpu.memory_space<vmem>>, vector<1x6x3xf32>
    %22 = vector.shape_cast %21 : vector<1x6x3xf32> to vector<6x3xf32>
    %23 = vector.extract_strided_slice %2 {offsets = [0, 4], sizes = [3, 1024], strides = [1, 1]} : vector<3x2048xf32> to vector<3x1024xf32>
    %cst_16 = arith.constant dense<0.000000e+00> : vector<6x1024xf32>
    %24 = tpu.matmul %22, %23, %cst_16 {dimension_numbers = #tpu.dot_dimension_numbers<[1], [0], [0], [1], [0, 0, 1, 1], [], []>} : vector<6x3xf32>, vector<3x1024xf32>, vector<6x1024xf32> -> vector<6x1024xf32>
    %25 = arith.addf %20, %24 : vector<6x1024xf32>
    %c5 = arith.constant 5 : index
    %c0_17 = arith.constant 0 : index
    %c0_18 = arith.constant 0 : index
    %26 = vector.load %arg2[%c5, %c0_17, %c0_18] : memref<25x6x3xf32, #tpu.memory_space<vmem>>, vector<1x6x3xf32>
    %27 = vector.shape_cast %26 : vector<1x6x3xf32> to vector<6x3xf32>
    %28 = vector.extract_strided_slice %2 {offsets = [0, 32], sizes = [3, 1024], strides = [1, 1]} : vector<3x2048xf32> to vector<3x1024xf32>
    %cst_19 = arith.constant dense<0.000000e+00> : vector<6x1024xf32>
    %29 = tpu.matmul %27, %28, %cst_19 {dimension_numbers = #tpu.dot_dimension_numbers<[1], [0], [0], [1], [0, 0, 1, 1], [], []>} : vector<6x3xf32>, vector<3x1024xf32>, vector<6x1024xf32> -> vector<6x1024xf32>
    %30 = arith.addf %25, %29 : vector<6x1024xf32>
    %c6 = arith.constant 6 : index
    %c0_20 = arith.constant 0 : index
    %c0_21 = arith.constant 0 : index
    %31 = vector.load %arg2[%c6, %c0_20, %c0_21] : memref<25x6x3xf32, #tpu.memory_space<vmem>>, vector<1x6x3xf32>
    %32 = vector.shape_cast %31 : vector<1x6x3xf32> to vector<6x3xf32>
    %33 = vector.extract_strided_slice %2 {offsets = [0, 33], sizes = [3, 1024], strides = [1, 1]} : vector<3x2048xf32> to vector<3x1024xf32>
    %cst_22 = arith.constant dense<0.000000e+00> : vector<6x1024xf32>
    %34 = tpu.matmul %32, %33, %cst_22 {dimension_numbers = #tpu.dot_dimension_numbers<[1], [0], [0], [1], [0, 0, 1, 1], [], []>} : vector<6x3xf32>, vector<3x1024xf32>, vector<6x1024xf32> -> vector<6x1024xf32>
    %35 = arith.addf %30, %34 : vector<6x1024xf32>
    %c7 = arith.constant 7 : index
    %c0_23 = arith.constant 0 : index
    %c0_24 = arith.constant 0 : index
    %36 = vector.load %arg2[%c7, %c0_23, %c0_24] : memref<25x6x3xf32, #tpu.memory_space<vmem>>, vector<1x6x3xf32>
    %37 = vector.shape_cast %36 : vector<1x6x3xf32> to vector<6x3xf32>
    %38 = vector.extract_strided_slice %2 {offsets = [0, 34], sizes = [3, 1024], strides = [1, 1]} : vector<3x2048xf32> to vector<3x1024xf32>
    %cst_25 = arith.constant dense<0.000000e+00> : vector<6x1024xf32>
    %39 = tpu.matmul %37, %38, %cst_25 {dimension_numbers = #tpu.dot_dimension_numbers<[1], [0], [0], [1], [0, 0, 1, 1], [], []>} : vector<6x3xf32>, vector<3x1024xf32>, vector<6x1024xf32> -> vector<6x1024xf32>
    %40 = arith.addf %35, %39 : vector<6x1024xf32>
    %c8 = arith.constant 8 : index
    %c0_26 = arith.constant 0 : index
    %c0_27 = arith.constant 0 : index
    %41 = vector.load %arg2[%c8, %c0_26, %c0_27] : memref<25x6x3xf32, #tpu.memory_space<vmem>>, vector<1x6x3xf32>
    %42 = vector.shape_cast %41 : vector<1x6x3xf32> to vector<6x3xf32>
    %43 = vector.extract_strided_slice %2 {offsets = [0, 35], sizes = [3, 1024], strides = [1, 1]} : vector<3x2048xf32> to vector<3x1024xf32>
    %cst_28 = arith.constant dense<0.000000e+00> : vector<6x1024xf32>
    %44 = tpu.matmul %42, %43, %cst_28 {dimension_numbers = #tpu.dot_dimension_numbers<[1], [0], [0], [1], [0, 0, 1, 1], [], []>} : vector<6x3xf32>, vector<3x1024xf32>, vector<6x1024xf32> -> vector<6x1024xf32>
    %45 = arith.addf %40, %44 : vector<6x1024xf32>
    %c9 = arith.constant 9 : index
    %c0_29 = arith.constant 0 : index
    %c0_30 = arith.constant 0 : index
    %46 = vector.load %arg2[%c9, %c0_29, %c0_30] : memref<25x6x3xf32, #tpu.memory_space<vmem>>, vector<1x6x3xf32>
    %47 = vector.shape_cast %46 : vector<1x6x3xf32> to vector<6x3xf32>
    %48 = vector.extract_strided_slice %2 {offsets = [0, 36], sizes = [3, 1024], strides = [1, 1]} : vector<3x2048xf32> to vector<3x1024xf32>
    %cst_31 = arith.constant dense<0.000000e+00> : vector<6x1024xf32>
    %49 = tpu.matmul %47, %48, %cst_31 {dimension_numbers = #tpu.dot_dimension_numbers<[1], [0], [0], [1], [0, 0, 1, 1], [], []>} : vector<6x3xf32>, vector<3x1024xf32>, vector<6x1024xf32> -> vector<6x1024xf32>
    %50 = arith.addf %45, %49 : vector<6x1024xf32>
    %c10 = arith.constant 10 : index
    %c0_32 = arith.constant 0 : index
    %c0_33 = arith.constant 0 : index
    %51 = vector.load %arg2[%c10, %c0_32, %c0_33] : memref<25x6x3xf32, #tpu.memory_space<vmem>>, vector<1x6x3xf32>
    %52 = vector.shape_cast %51 : vector<1x6x3xf32> to vector<6x3xf32>
    %53 = vector.extract_strided_slice %2 {offsets = [0, 64], sizes = [3, 1024], strides = [1, 1]} : vector<3x2048xf32> to vector<3x1024xf32>
    %cst_34 = arith.constant dense<0.000000e+00> : vector<6x1024xf32>
    %54 = tpu.matmul %52, %53, %cst_34 {dimension_numbers = #tpu.dot_dimension_numbers<[1], [0], [0], [1], [0, 0, 1, 1], [], []>} : vector<6x3xf32>, vector<3x1024xf32>, vector<6x1024xf32> -> vector<6x1024xf32>
    %55 = arith.addf %50, %54 : vector<6x1024xf32>
    %c11 = arith.constant 11 : index
    %c0_35 = arith.constant 0 : index
    %c0_36 = arith.constant 0 : index
    %56 = vector.load %arg2[%c11, %c0_35, %c0_36] : memref<25x6x3xf32, #tpu.memory_space<vmem>>, vector<1x6x3xf32>
    %57 = vector.shape_cast %56 : vector<1x6x3xf32> to vector<6x3xf32>
    %58 = vector.extract_strided_slice %2 {offsets = [0, 65], sizes = [3, 1024], strides = [1, 1]} : vector<3x2048xf32> to vector<3x1024xf32>
    %cst_37 = arith.constant dense<0.000000e+00> : vector<6x1024xf32>
    %59 = tpu.matmul %57, %58, %cst_37 {dimension_numbers = #tpu.dot_dimension_numbers<[1], [0], [0], [1], [0, 0, 1, 1], [], []>} : vector<6x3xf32>, vector<3x1024xf32>, vector<6x1024xf32> -> vector<6x1024xf32>
    %60 = arith.addf %55, %59 : vector<6x1024xf32>
    %c12 = arith.constant 12 : index
    %c0_38 = arith.constant 0 : index
    %c0_39 = arith.constant 0 : index
    %61 = vector.load %arg2[%c12, %c0_38, %c0_39] : memref<25x6x3xf32, #tpu.memory_space<vmem>>, vector<1x6x3xf32>
    %62 = vector.shape_cast %61 : vector<1x6x3xf32> to vector<6x3xf32>
    %63 = vector.extract_strided_slice %2 {offsets = [0, 66], sizes = [3, 1024], strides = [1, 1]} : vector<3x2048xf32> to vector<3x1024xf32>
    %cst_40 = arith.constant dense<0.000000e+00> : vector<6x1024xf32>
    %64 = tpu.matmul %62, %63, %cst_40 {dimension_numbers = #tpu.dot_dimension_numbers<[1], [0], [0], [1], [0, 0, 1, 1], [], []>} : vector<6x3xf32>, vector<3x1024xf32>, vector<6x1024xf32> -> vector<6x1024xf32>
    %65 = arith.addf %60, %64 : vector<6x1024xf32>
    %c13 = arith.constant 13 : index
    %c0_41 = arith.constant 0 : index
    %c0_42 = arith.constant 0 : index
    %66 = vector.load %arg2[%c13, %c0_41, %c0_42] : memref<25x6x3xf32, #tpu.memory_space<vmem>>, vector<1x6x3xf32>
    %67 = vector.shape_cast %66 : vector<1x6x3xf32> to vector<6x3xf32>
    %68 = vector.extract_strided_slice %2 {offsets = [0, 67], sizes = [3, 1024], strides = [1, 1]} : vector<3x2048xf32> to vector<3x1024xf32>
    %cst_43 = arith.constant dense<0.000000e+00> : vector<6x1024xf32>
    %69 = tpu.matmul %67, %68, %cst_43 {dimension_numbers = #tpu.dot_dimension_numbers<[1], [0], [0], [1], [0, 0, 1, 1], [], []>} : vector<6x3xf32>, vector<3x1024xf32>, vector<6x1024xf32> -> vector<6x1024xf32>
    %70 = arith.addf %65, %69 : vector<6x1024xf32>
    %c14 = arith.constant 14 : index
    %c0_44 = arith.constant 0 : index
    %c0_45 = arith.constant 0 : index
    %71 = vector.load %arg2[%c14, %c0_44, %c0_45] : memref<25x6x3xf32, #tpu.memory_space<vmem>>, vector<1x6x3xf32>
    %72 = vector.shape_cast %71 : vector<1x6x3xf32> to vector<6x3xf32>
    %73 = vector.extract_strided_slice %2 {offsets = [0, 68], sizes = [3, 1024], strides = [1, 1]} : vector<3x2048xf32> to vector<3x1024xf32>
    %cst_46 = arith.constant dense<0.000000e+00> : vector<6x1024xf32>
    %74 = tpu.matmul %72, %73, %cst_46 {dimension_numbers = #tpu.dot_dimension_numbers<[1], [0], [0], [1], [0, 0, 1, 1], [], []>} : vector<6x3xf32>, vector<3x1024xf32>, vector<6x1024xf32> -> vector<6x1024xf32>
    %75 = arith.addf %70, %74 : vector<6x1024xf32>
    %c15 = arith.constant 15 : index
    %c0_47 = arith.constant 0 : index
    %c0_48 = arith.constant 0 : index
    %76 = vector.load %arg2[%c15, %c0_47, %c0_48] : memref<25x6x3xf32, #tpu.memory_space<vmem>>, vector<1x6x3xf32>
    %77 = vector.shape_cast %76 : vector<1x6x3xf32> to vector<6x3xf32>
    %78 = vector.extract_strided_slice %2 {offsets = [0, 96], sizes = [3, 1024], strides = [1, 1]} : vector<3x2048xf32> to vector<3x1024xf32>
    %cst_49 = arith.constant dense<0.000000e+00> : vector<6x1024xf32>
    %79 = tpu.matmul %77, %78, %cst_49 {dimension_numbers = #tpu.dot_dimension_numbers<[1], [0], [0], [1], [0, 0, 1, 1], [], []>} : vector<6x3xf32>, vector<3x1024xf32>, vector<6x1024xf32> -> vector<6x1024xf32>
    %80 = arith.addf %75, %79 : vector<6x1024xf32>
    %c16 = arith.constant 16 : index
    %c0_50 = arith.constant 0 : index
    %c0_51 = arith.constant 0 : index
    %81 = vector.load %arg2[%c16, %c0_50, %c0_51] : memref<25x6x3xf32, #tpu.memory_space<vmem>>, vector<1x6x3xf32>
    %82 = vector.shape_cast %81 : vector<1x6x3xf32> to vector<6x3xf32>
    %83 = vector.extract_strided_slice %2 {offsets = [0, 97], sizes = [3, 1024], strides = [1, 1]} : vector<3x2048xf32> to vector<3x1024xf32>
    %cst_52 = arith.constant dense<0.000000e+00> : vector<6x1024xf32>
    %84 = tpu.matmul %82, %83, %cst_52 {dimension_numbers = #tpu.dot_dimension_numbers<[1], [0], [0], [1], [0, 0, 1, 1], [], []>} : vector<6x3xf32>, vector<3x1024xf32>, vector<6x1024xf32> -> vector<6x1024xf32>
    %85 = arith.addf %80, %84 : vector<6x1024xf32>
    %c17 = arith.constant 17 : index
    %c0_53 = arith.constant 0 : index
    %c0_54 = arith.constant 0 : index
    %86 = vector.load %arg2[%c17, %c0_53, %c0_54] : memref<25x6x3xf32, #tpu.memory_space<vmem>>, vector<1x6x3xf32>
    %87 = vector.shape_cast %86 : vector<1x6x3xf32> to vector<6x3xf32>
    %88 = vector.extract_strided_slice %2 {offsets = [0, 98], sizes = [3, 1024], strides = [1, 1]} : vector<3x2048xf32> to vector<3x1024xf32>
    %cst_55 = arith.constant dense<0.000000e+00> : vector<6x1024xf32>
    %89 = tpu.matmul %87, %88, %cst_55 {dimension_numbers = #tpu.dot_dimension_numbers<[1], [0], [0], [1], [0, 0, 1, 1], [], []>} : vector<6x3xf32>, vector<3x1024xf32>, vector<6x1024xf32> -> vector<6x1024xf32>
    %90 = arith.addf %85, %89 : vector<6x1024xf32>
    %c18 = arith.constant 18 : index
    %c0_56 = arith.constant 0 : index
    %c0_57 = arith.constant 0 : index
    %91 = vector.load %arg2[%c18, %c0_56, %c0_57] : memref<25x6x3xf32, #tpu.memory_space<vmem>>, vector<1x6x3xf32>
    %92 = vector.shape_cast %91 : vector<1x6x3xf32> to vector<6x3xf32>
    %93 = vector.extract_strided_slice %2 {offsets = [0, 99], sizes = [3, 1024], strides = [1, 1]} : vector<3x2048xf32> to vector<3x1024xf32>
    %cst_58 = arith.constant dense<0.000000e+00> : vector<6x1024xf32>
    %94 = tpu.matmul %92, %93, %cst_58 {dimension_numbers = #tpu.dot_dimension_numbers<[1], [0], [0], [1], [0, 0, 1, 1], [], []>} : vector<6x3xf32>, vector<3x1024xf32>, vector<6x1024xf32> -> vector<6x1024xf32>
    %95 = arith.addf %90, %94 : vector<6x1024xf32>
    %c19 = arith.constant 19 : index
    %c0_59 = arith.constant 0 : index
    %c0_60 = arith.constant 0 : index
    %96 = vector.load %arg2[%c19, %c0_59, %c0_60] : memref<25x6x3xf32, #tpu.memory_space<vmem>>, vector<1x6x3xf32>
    %97 = vector.shape_cast %96 : vector<1x6x3xf32> to vector<6x3xf32>
    %98 = vector.extract_strided_slice %2 {offsets = [0, 100], sizes = [3, 1024], strides = [1, 1]} : vector<3x2048xf32> to vector<3x1024xf32>
    %cst_61 = arith.constant dense<0.000000e+00> : vector<6x1024xf32>
    %99 = tpu.matmul %97, %98, %cst_61 {dimension_numbers = #tpu.dot_dimension_numbers<[1], [0], [0], [1], [0, 0, 1, 1], [], []>} : vector<6x3xf32>, vector<3x1024xf32>, vector<6x1024xf32> -> vector<6x1024xf32>
    %100 = arith.addf %95, %99 : vector<6x1024xf32>
    %c20 = arith.constant 20 : index
    %c0_62 = arith.constant 0 : index
    %c0_63 = arith.constant 0 : index
    %101 = vector.load %arg2[%c20, %c0_62, %c0_63] : memref<25x6x3xf32, #tpu.memory_space<vmem>>, vector<1x6x3xf32>
    %102 = vector.shape_cast %101 : vector<1x6x3xf32> to vector<6x3xf32>
    %103 = vector.extract_strided_slice %2 {offsets = [0, 128], sizes = [3, 1024], strides = [1, 1]} : vector<3x2048xf32> to vector<3x1024xf32>
    %cst_64 = arith.constant dense<0.000000e+00> : vector<6x1024xf32>
    %104 = tpu.matmul %102, %103, %cst_64 {dimension_numbers = #tpu.dot_dimension_numbers<[1], [0], [0], [1], [0, 0, 1, 1], [], []>} : vector<6x3xf32>, vector<3x1024xf32>, vector<6x1024xf32> -> vector<6x1024xf32>
    %105 = arith.addf %100, %104 : vector<6x1024xf32>
    %c21 = arith.constant 21 : index
    %c0_65 = arith.constant 0 : index
    %c0_66 = arith.constant 0 : index
    %106 = vector.load %arg2[%c21, %c0_65, %c0_66] : memref<25x6x3xf32, #tpu.memory_space<vmem>>, vector<1x6x3xf32>
    %107 = vector.shape_cast %106 : vector<1x6x3xf32> to vector<6x3xf32>
    %108 = vector.extract_strided_slice %2 {offsets = [0, 129], sizes = [3, 1024], strides = [1, 1]} : vector<3x2048xf32> to vector<3x1024xf32>
    %cst_67 = arith.constant dense<0.000000e+00> : vector<6x1024xf32>
    %109 = tpu.matmul %107, %108, %cst_67 {dimension_numbers = #tpu.dot_dimension_numbers<[1], [0], [0], [1], [0, 0, 1, 1], [], []>} : vector<6x3xf32>, vector<3x1024xf32>, vector<6x1024xf32> -> vector<6x1024xf32>
    %110 = arith.addf %105, %109 : vector<6x1024xf32>
    %c22 = arith.constant 22 : index
    %c0_68 = arith.constant 0 : index
    %c0_69 = arith.constant 0 : index
    %111 = vector.load %arg2[%c22, %c0_68, %c0_69] : memref<25x6x3xf32, #tpu.memory_space<vmem>>, vector<1x6x3xf32>
    %112 = vector.shape_cast %111 : vector<1x6x3xf32> to vector<6x3xf32>
    %113 = vector.extract_strided_slice %2 {offsets = [0, 130], sizes = [3, 1024], strides = [1, 1]} : vector<3x2048xf32> to vector<3x1024xf32>
    %cst_70 = arith.constant dense<0.000000e+00> : vector<6x1024xf32>
    %114 = tpu.matmul %112, %113, %cst_70 {dimension_numbers = #tpu.dot_dimension_numbers<[1], [0], [0], [1], [0, 0, 1, 1], [], []>} : vector<6x3xf32>, vector<3x1024xf32>, vector<6x1024xf32> -> vector<6x1024xf32>
    %115 = arith.addf %110, %114 : vector<6x1024xf32>
    %c23 = arith.constant 23 : index
    %c0_71 = arith.constant 0 : index
    %c0_72 = arith.constant 0 : index
    %116 = vector.load %arg2[%c23, %c0_71, %c0_72] : memref<25x6x3xf32, #tpu.memory_space<vmem>>, vector<1x6x3xf32>
    %117 = vector.shape_cast %116 : vector<1x6x3xf32> to vector<6x3xf32>
    %118 = vector.extract_strided_slice %2 {offsets = [0, 131], sizes = [3, 1024], strides = [1, 1]} : vector<3x2048xf32> to vector<3x1024xf32>
    %cst_73 = arith.constant dense<0.000000e+00> : vector<6x1024xf32>
    %119 = tpu.matmul %117, %118, %cst_73 {dimension_numbers = #tpu.dot_dimension_numbers<[1], [0], [0], [1], [0, 0, 1, 1], [], []>} : vector<6x3xf32>, vector<3x1024xf32>, vector<6x1024xf32> -> vector<6x1024xf32>
    %120 = arith.addf %115, %119 : vector<6x1024xf32>
    %c24 = arith.constant 24 : index
    %c0_74 = arith.constant 0 : index
    %c0_75 = arith.constant 0 : index
    %121 = vector.load %arg2[%c24, %c0_74, %c0_75] : memref<25x6x3xf32, #tpu.memory_space<vmem>>, vector<1x6x3xf32>
    %122 = vector.shape_cast %121 : vector<1x6x3xf32> to vector<6x3xf32>
    %123 = vector.extract_strided_slice %2 {offsets = [0, 132], sizes = [3, 1024], strides = [1, 1]} : vector<3x2048xf32> to vector<3x1024xf32>
    %cst_76 = arith.constant dense<0.000000e+00> : vector<6x1024xf32>
    %124 = tpu.matmul %122, %123, %cst_76 {dimension_numbers = #tpu.dot_dimension_numbers<[1], [0], [0], [1], [0, 0, 1, 1], [], []>} : vector<6x3xf32>, vector<3x1024xf32>, vector<6x1024xf32> -> vector<6x1024xf32>
    %125 = arith.addf %120, %124 : vector<6x1024xf32>
    %c0_77 = arith.constant 0 : index
    %c0_78 = arith.constant 0 : index
    %126 = vector.load %arg3[%c0_77, %c0_78] : memref<6x1xf32, #tpu.memory_space<vmem>>, vector<6x1xf32>
    %127 = vector.broadcast %126 : vector<6x1xf32> to vector<6x1024xf32>
    %128 = arith.addf %125, %127 : vector<6x1024xf32>
    %cst_79 = arith.constant 0.000000e+00 : f32
    %129 = vector.broadcast %cst_79 : f32 to vector<6x1024xf32>
    %130 = arith.maximumf %128, %129 : vector<6x1024xf32>
    %131 = tpu.concatenate %130, %130 in 1 : vector<6x1024xf32>, vector<6x1024xf32> -> vector<6x2048xf32>
    %132 = vector.extract_strided_slice %131 {offsets = [0, 1], sizes = [6, 1024], strides = [1, 1]} : vector<6x2048xf32> to vector<6x1024xf32>
    %133 = arith.maximumf %130, %132 : vector<6x1024xf32>
    %134 = vector.extract_strided_slice %131 {offsets = [0, 32], sizes = [6, 1024], strides = [1, 1]} : vector<6x2048xf32> to vector<6x1024xf32>
    %135 = vector.extract_strided_slice %131 {offsets = [0, 33], sizes = [6, 1024], strides = [1, 1]} : vector<6x2048xf32> to vector<6x1024xf32>
    %136 = arith.maximumf %134, %135 : vector<6x1024xf32>
    %137 = arith.maximumf %133, %136 : vector<6x1024xf32>
    %138 = tpu.concatenate %137, %137 in 1 : vector<6x1024xf32>, vector<6x1024xf32> -> vector<6x2048xf32>
    %c0_80 = arith.constant 0 : index
    %c0_81 = arith.constant 0 : index
    %c0_82 = arith.constant 0 : index
    %139 = vector.load %arg4[%c0_80, %c0_81, %c0_82] : memref<25x16x6xf32, #tpu.memory_space<vmem>>, vector<1x16x6xf32>
    %140 = vector.shape_cast %139 : vector<1x16x6xf32> to vector<16x6xf32>
    %cst_83 = arith.constant dense<0.000000e+00> : vector<16x1024xf32>
    %141 = tpu.matmul %140, %137, %cst_83 {dimension_numbers = #tpu.dot_dimension_numbers<[1], [0], [0], [1], [0, 0, 1, 1], [], []>} : vector<16x6xf32>, vector<6x1024xf32>, vector<16x1024xf32> -> vector<16x1024xf32>
    %c1_84 = arith.constant 1 : index
    %c0_85 = arith.constant 0 : index
    %c0_86 = arith.constant 0 : index
    %142 = vector.load %arg4[%c1_84, %c0_85, %c0_86] : memref<25x16x6xf32, #tpu.memory_space<vmem>>, vector<1x16x6xf32>
    %143 = vector.shape_cast %142 : vector<1x16x6xf32> to vector<16x6xf32>
    %144 = vector.extract_strided_slice %138 {offsets = [0, 2], sizes = [6, 1024], strides = [1, 1]} : vector<6x2048xf32> to vector<6x1024xf32>
    %cst_87 = arith.constant dense<0.000000e+00> : vector<16x1024xf32>
    %145 = tpu.matmul %143, %144, %cst_87 {dimension_numbers = #tpu.dot_dimension_numbers<[1], [0], [0], [1], [0, 0, 1, 1], [], []>} : vector<16x6xf32>, vector<6x1024xf32>, vector<16x1024xf32> -> vector<16x1024xf32>
    %146 = arith.addf %141, %145 : vector<16x1024xf32>
    %c2_88 = arith.constant 2 : index
    %c0_89 = arith.constant 0 : index
    %c0_90 = arith.constant 0 : index
    %147 = vector.load %arg4[%c2_88, %c0_89, %c0_90] : memref<25x16x6xf32, #tpu.memory_space<vmem>>, vector<1x16x6xf32>
    %148 = vector.shape_cast %147 : vector<1x16x6xf32> to vector<16x6xf32>
    %149 = vector.extract_strided_slice %138 {offsets = [0, 4], sizes = [6, 1024], strides = [1, 1]} : vector<6x2048xf32> to vector<6x1024xf32>
    %cst_91 = arith.constant dense<0.000000e+00> : vector<16x1024xf32>
    %150 = tpu.matmul %148, %149, %cst_91 {dimension_numbers = #tpu.dot_dimension_numbers<[1], [0], [0], [1], [0, 0, 1, 1], [], []>} : vector<16x6xf32>, vector<6x1024xf32>, vector<16x1024xf32> -> vector<16x1024xf32>
    %151 = arith.addf %146, %150 : vector<16x1024xf32>
    %c3_92 = arith.constant 3 : index
    %c0_93 = arith.constant 0 : index
    %c0_94 = arith.constant 0 : index
    %152 = vector.load %arg4[%c3_92, %c0_93, %c0_94] : memref<25x16x6xf32, #tpu.memory_space<vmem>>, vector<1x16x6xf32>
    %153 = vector.shape_cast %152 : vector<1x16x6xf32> to vector<16x6xf32>
    %154 = vector.extract_strided_slice %138 {offsets = [0, 6], sizes = [6, 1024], strides = [1, 1]} : vector<6x2048xf32> to vector<6x1024xf32>
    %cst_95 = arith.constant dense<0.000000e+00> : vector<16x1024xf32>
    %155 = tpu.matmul %153, %154, %cst_95 {dimension_numbers = #tpu.dot_dimension_numbers<[1], [0], [0], [1], [0, 0, 1, 1], [], []>} : vector<16x6xf32>, vector<6x1024xf32>, vector<16x1024xf32> -> vector<16x1024xf32>
    %156 = arith.addf %151, %155 : vector<16x1024xf32>
    %c4_96 = arith.constant 4 : index
    %c0_97 = arith.constant 0 : index
    %c0_98 = arith.constant 0 : index
    %157 = vector.load %arg4[%c4_96, %c0_97, %c0_98] : memref<25x16x6xf32, #tpu.memory_space<vmem>>, vector<1x16x6xf32>
    %158 = vector.shape_cast %157 : vector<1x16x6xf32> to vector<16x6xf32>
    %159 = vector.extract_strided_slice %138 {offsets = [0, 8], sizes = [6, 1024], strides = [1, 1]} : vector<6x2048xf32> to vector<6x1024xf32>
    %cst_99 = arith.constant dense<0.000000e+00> : vector<16x1024xf32>
    %160 = tpu.matmul %158, %159, %cst_99 {dimension_numbers = #tpu.dot_dimension_numbers<[1], [0], [0], [1], [0, 0, 1, 1], [], []>} : vector<16x6xf32>, vector<6x1024xf32>, vector<16x1024xf32> -> vector<16x1024xf32>
    %161 = arith.addf %156, %160 : vector<16x1024xf32>
    %c5_100 = arith.constant 5 : index
    %c0_101 = arith.constant 0 : index
    %c0_102 = arith.constant 0 : index
    %162 = vector.load %arg4[%c5_100, %c0_101, %c0_102] : memref<25x16x6xf32, #tpu.memory_space<vmem>>, vector<1x16x6xf32>
    %163 = vector.shape_cast %162 : vector<1x16x6xf32> to vector<16x6xf32>
    %164 = vector.extract_strided_slice %138 {offsets = [0, 64], sizes = [6, 1024], strides = [1, 1]} : vector<6x2048xf32> to vector<6x1024xf32>
    %cst_103 = arith.constant dense<0.000000e+00> : vector<16x1024xf32>
    %165 = tpu.matmul %163, %164, %cst_103 {dimension_numbers = #tpu.dot_dimension_numbers<[1], [0], [0], [1], [0, 0, 1, 1], [], []>} : vector<16x6xf32>, vector<6x1024xf32>, vector<16x1024xf32> -> vector<16x1024xf32>
    %166 = arith.addf %161, %165 : vector<16x1024xf32>
    %c6_104 = arith.constant 6 : index
    %c0_105 = arith.constant 0 : index
    %c0_106 = arith.constant 0 : index
    %167 = vector.load %arg4[%c6_104, %c0_105, %c0_106] : memref<25x16x6xf32, #tpu.memory_space<vmem>>, vector<1x16x6xf32>
    %168 = vector.shape_cast %167 : vector<1x16x6xf32> to vector<16x6xf32>
    %169 = vector.extract_strided_slice %138 {offsets = [0, 66], sizes = [6, 1024], strides = [1, 1]} : vector<6x2048xf32> to vector<6x1024xf32>
    %cst_107 = arith.constant dense<0.000000e+00> : vector<16x1024xf32>
    %170 = tpu.matmul %168, %169, %cst_107 {dimension_numbers = #tpu.dot_dimension_numbers<[1], [0], [0], [1], [0, 0, 1, 1], [], []>} : vector<16x6xf32>, vector<6x1024xf32>, vector<16x1024xf32> -> vector<16x1024xf32>
    %171 = arith.addf %166, %170 : vector<16x1024xf32>
    %c7_108 = arith.constant 7 : index
    %c0_109 = arith.constant 0 : index
    %c0_110 = arith.constant 0 : index
    %172 = vector.load %arg4[%c7_108, %c0_109, %c0_110] : memref<25x16x6xf32, #tpu.memory_space<vmem>>, vector<1x16x6xf32>
    %173 = vector.shape_cast %172 : vector<1x16x6xf32> to vector<16x6xf32>
    %174 = vector.extract_strided_slice %138 {offsets = [0, 68], sizes = [6, 1024], strides = [1, 1]} : vector<6x2048xf32> to vector<6x1024xf32>
    %cst_111 = arith.constant dense<0.000000e+00> : vector<16x1024xf32>
    %175 = tpu.matmul %173, %174, %cst_111 {dimension_numbers = #tpu.dot_dimension_numbers<[1], [0], [0], [1], [0, 0, 1, 1], [], []>} : vector<16x6xf32>, vector<6x1024xf32>, vector<16x1024xf32> -> vector<16x1024xf32>
    %176 = arith.addf %171, %175 : vector<16x1024xf32>
    %c8_112 = arith.constant 8 : index
    %c0_113 = arith.constant 0 : index
    %c0_114 = arith.constant 0 : index
    %177 = vector.load %arg4[%c8_112, %c0_113, %c0_114] : memref<25x16x6xf32, #tpu.memory_space<vmem>>, vector<1x16x6xf32>
    %178 = vector.shape_cast %177 : vector<1x16x6xf32> to vector<16x6xf32>
    %179 = vector.extract_strided_slice %138 {offsets = [0, 70], sizes = [6, 1024], strides = [1, 1]} : vector<6x2048xf32> to vector<6x1024xf32>
    %cst_115 = arith.constant dense<0.000000e+00> : vector<16x1024xf32>
    %180 = tpu.matmul %178, %179, %cst_115 {dimension_numbers = #tpu.dot_dimension_numbers<[1], [0], [0], [1], [0, 0, 1, 1], [], []>} : vector<16x6xf32>, vector<6x1024xf32>, vector<16x1024xf32> -> vector<16x1024xf32>
    %181 = arith.addf %176, %180 : vector<16x1024xf32>
    %c9_116 = arith.constant 9 : index
    %c0_117 = arith.constant 0 : index
    %c0_118 = arith.constant 0 : index
    %182 = vector.load %arg4[%c9_116, %c0_117, %c0_118] : memref<25x16x6xf32, #tpu.memory_space<vmem>>, vector<1x16x6xf32>
    %183 = vector.shape_cast %182 : vector<1x16x6xf32> to vector<16x6xf32>
    %184 = vector.extract_strided_slice %138 {offsets = [0, 72], sizes = [6, 1024], strides = [1, 1]} : vector<6x2048xf32> to vector<6x1024xf32>
    %cst_119 = arith.constant dense<0.000000e+00> : vector<16x1024xf32>
    %185 = tpu.matmul %183, %184, %cst_119 {dimension_numbers = #tpu.dot_dimension_numbers<[1], [0], [0], [1], [0, 0, 1, 1], [], []>} : vector<16x6xf32>, vector<6x1024xf32>, vector<16x1024xf32> -> vector<16x1024xf32>
    %186 = arith.addf %181, %185 : vector<16x1024xf32>
    %c10_120 = arith.constant 10 : index
    %c0_121 = arith.constant 0 : index
    %c0_122 = arith.constant 0 : index
    %187 = vector.load %arg4[%c10_120, %c0_121, %c0_122] : memref<25x16x6xf32, #tpu.memory_space<vmem>>, vector<1x16x6xf32>
    %188 = vector.shape_cast %187 : vector<1x16x6xf32> to vector<16x6xf32>
    %189 = vector.extract_strided_slice %138 {offsets = [0, 128], sizes = [6, 1024], strides = [1, 1]} : vector<6x2048xf32> to vector<6x1024xf32>
    %cst_123 = arith.constant dense<0.000000e+00> : vector<16x1024xf32>
    %190 = tpu.matmul %188, %189, %cst_123 {dimension_numbers = #tpu.dot_dimension_numbers<[1], [0], [0], [1], [0, 0, 1, 1], [], []>} : vector<16x6xf32>, vector<6x1024xf32>, vector<16x1024xf32> -> vector<16x1024xf32>
    %191 = arith.addf %186, %190 : vector<16x1024xf32>
    %c11_124 = arith.constant 11 : index
    %c0_125 = arith.constant 0 : index
    %c0_126 = arith.constant 0 : index
    %192 = vector.load %arg4[%c11_124, %c0_125, %c0_126] : memref<25x16x6xf32, #tpu.memory_space<vmem>>, vector<1x16x6xf32>
    %193 = vector.shape_cast %192 : vector<1x16x6xf32> to vector<16x6xf32>
    %194 = vector.extract_strided_slice %138 {offsets = [0, 130], sizes = [6, 1024], strides = [1, 1]} : vector<6x2048xf32> to vector<6x1024xf32>
    %cst_127 = arith.constant dense<0.000000e+00> : vector<16x1024xf32>
    %195 = tpu.matmul %193, %194, %cst_127 {dimension_numbers = #tpu.dot_dimension_numbers<[1], [0], [0], [1], [0, 0, 1, 1], [], []>} : vector<16x6xf32>, vector<6x1024xf32>, vector<16x1024xf32> -> vector<16x1024xf32>
    %196 = arith.addf %191, %195 : vector<16x1024xf32>
    %c12_128 = arith.constant 12 : index
    %c0_129 = arith.constant 0 : index
    %c0_130 = arith.constant 0 : index
    %197 = vector.load %arg4[%c12_128, %c0_129, %c0_130] : memref<25x16x6xf32, #tpu.memory_space<vmem>>, vector<1x16x6xf32>
    %198 = vector.shape_cast %197 : vector<1x16x6xf32> to vector<16x6xf32>
    %199 = vector.extract_strided_slice %138 {offsets = [0, 132], sizes = [6, 1024], strides = [1, 1]} : vector<6x2048xf32> to vector<6x1024xf32>
    %cst_131 = arith.constant dense<0.000000e+00> : vector<16x1024xf32>
    %200 = tpu.matmul %198, %199, %cst_131 {dimension_numbers = #tpu.dot_dimension_numbers<[1], [0], [0], [1], [0, 0, 1, 1], [], []>} : vector<16x6xf32>, vector<6x1024xf32>, vector<16x1024xf32> -> vector<16x1024xf32>
    %201 = arith.addf %196, %200 : vector<16x1024xf32>
    %c13_132 = arith.constant 13 : index
    %c0_133 = arith.constant 0 : index
    %c0_134 = arith.constant 0 : index
    %202 = vector.load %arg4[%c13_132, %c0_133, %c0_134] : memref<25x16x6xf32, #tpu.memory_space<vmem>>, vector<1x16x6xf32>
    %203 = vector.shape_cast %202 : vector<1x16x6xf32> to vector<16x6xf32>
    %204 = vector.extract_strided_slice %138 {offsets = [0, 134], sizes = [6, 1024], strides = [1, 1]} : vector<6x2048xf32> to vector<6x1024xf32>
    %cst_135 = arith.constant dense<0.000000e+00> : vector<16x1024xf32>
    %205 = tpu.matmul %203, %204, %cst_135 {dimension_numbers = #tpu.dot_dimension_numbers<[1], [0], [0], [1], [0, 0, 1, 1], [], []>} : vector<16x6xf32>, vector<6x1024xf32>, vector<16x1024xf32> -> vector<16x1024xf32>
    %206 = arith.addf %201, %205 : vector<16x1024xf32>
    %c14_136 = arith.constant 14 : index
    %c0_137 = arith.constant 0 : index
    %c0_138 = arith.constant 0 : index
    %207 = vector.load %arg4[%c14_136, %c0_137, %c0_138] : memref<25x16x6xf32, #tpu.memory_space<vmem>>, vector<1x16x6xf32>
    %208 = vector.shape_cast %207 : vector<1x16x6xf32> to vector<16x6xf32>
    %209 = vector.extract_strided_slice %138 {offsets = [0, 136], sizes = [6, 1024], strides = [1, 1]} : vector<6x2048xf32> to vector<6x1024xf32>
    %cst_139 = arith.constant dense<0.000000e+00> : vector<16x1024xf32>
    %210 = tpu.matmul %208, %209, %cst_139 {dimension_numbers = #tpu.dot_dimension_numbers<[1], [0], [0], [1], [0, 0, 1, 1], [], []>} : vector<16x6xf32>, vector<6x1024xf32>, vector<16x1024xf32> -> vector<16x1024xf32>
    %211 = arith.addf %206, %210 : vector<16x1024xf32>
    %c15_140 = arith.constant 15 : index
    %c0_141 = arith.constant 0 : index
    %c0_142 = arith.constant 0 : index
    %212 = vector.load %arg4[%c15_140, %c0_141, %c0_142] : memref<25x16x6xf32, #tpu.memory_space<vmem>>, vector<1x16x6xf32>
    %213 = vector.shape_cast %212 : vector<1x16x6xf32> to vector<16x6xf32>
    %214 = vector.extract_strided_slice %138 {offsets = [0, 192], sizes = [6, 1024], strides = [1, 1]} : vector<6x2048xf32> to vector<6x1024xf32>
    %cst_143 = arith.constant dense<0.000000e+00> : vector<16x1024xf32>
    %215 = tpu.matmul %213, %214, %cst_143 {dimension_numbers = #tpu.dot_dimension_numbers<[1], [0], [0], [1], [0, 0, 1, 1], [], []>} : vector<16x6xf32>, vector<6x1024xf32>, vector<16x1024xf32> -> vector<16x1024xf32>
    %216 = arith.addf %211, %215 : vector<16x1024xf32>
    %c16_144 = arith.constant 16 : index
    %c0_145 = arith.constant 0 : index
    %c0_146 = arith.constant 0 : index
    %217 = vector.load %arg4[%c16_144, %c0_145, %c0_146] : memref<25x16x6xf32, #tpu.memory_space<vmem>>, vector<1x16x6xf32>
    %218 = vector.shape_cast %217 : vector<1x16x6xf32> to vector<16x6xf32>
    %219 = vector.extract_strided_slice %138 {offsets = [0, 194], sizes = [6, 1024], strides = [1, 1]} : vector<6x2048xf32> to vector<6x1024xf32>
    %cst_147 = arith.constant dense<0.000000e+00> : vector<16x1024xf32>
    %220 = tpu.matmul %218, %219, %cst_147 {dimension_numbers = #tpu.dot_dimension_numbers<[1], [0], [0], [1], [0, 0, 1, 1], [], []>} : vector<16x6xf32>, vector<6x1024xf32>, vector<16x1024xf32> -> vector<16x1024xf32>
    %221 = arith.addf %216, %220 : vector<16x1024xf32>
    %c17_148 = arith.constant 17 : index
    %c0_149 = arith.constant 0 : index
    %c0_150 = arith.constant 0 : index
    %222 = vector.load %arg4[%c17_148, %c0_149, %c0_150] : memref<25x16x6xf32, #tpu.memory_space<vmem>>, vector<1x16x6xf32>
    %223 = vector.shape_cast %222 : vector<1x16x6xf32> to vector<16x6xf32>
    %224 = vector.extract_strided_slice %138 {offsets = [0, 196], sizes = [6, 1024], strides = [1, 1]} : vector<6x2048xf32> to vector<6x1024xf32>
    %cst_151 = arith.constant dense<0.000000e+00> : vector<16x1024xf32>
    %225 = tpu.matmul %223, %224, %cst_151 {dimension_numbers = #tpu.dot_dimension_numbers<[1], [0], [0], [1], [0, 0, 1, 1], [], []>} : vector<16x6xf32>, vector<6x1024xf32>, vector<16x1024xf32> -> vector<16x1024xf32>
    %226 = arith.addf %221, %225 : vector<16x1024xf32>
    %c18_152 = arith.constant 18 : index
    %c0_153 = arith.constant 0 : index
    %c0_154 = arith.constant 0 : index
    %227 = vector.load %arg4[%c18_152, %c0_153, %c0_154] : memref<25x16x6xf32, #tpu.memory_space<vmem>>, vector<1x16x6xf32>
    %228 = vector.shape_cast %227 : vector<1x16x6xf32> to vector<16x6xf32>
    %229 = vector.extract_strided_slice %138 {offsets = [0, 198], sizes = [6, 1024], strides = [1, 1]} : vector<6x2048xf32> to vector<6x1024xf32>
    %cst_155 = arith.constant dense<0.000000e+00> : vector<16x1024xf32>
    %230 = tpu.matmul %228, %229, %cst_155 {dimension_numbers = #tpu.dot_dimension_numbers<[1], [0], [0], [1], [0, 0, 1, 1], [], []>} : vector<16x6xf32>, vector<6x1024xf32>, vector<16x1024xf32> -> vector<16x1024xf32>
    %231 = arith.addf %226, %230 : vector<16x1024xf32>
    %c19_156 = arith.constant 19 : index
    %c0_157 = arith.constant 0 : index
    %c0_158 = arith.constant 0 : index
    %232 = vector.load %arg4[%c19_156, %c0_157, %c0_158] : memref<25x16x6xf32, #tpu.memory_space<vmem>>, vector<1x16x6xf32>
    %233 = vector.shape_cast %232 : vector<1x16x6xf32> to vector<16x6xf32>
    %234 = vector.extract_strided_slice %138 {offsets = [0, 200], sizes = [6, 1024], strides = [1, 1]} : vector<6x2048xf32> to vector<6x1024xf32>
    %cst_159 = arith.constant dense<0.000000e+00> : vector<16x1024xf32>
    %235 = tpu.matmul %233, %234, %cst_159 {dimension_numbers = #tpu.dot_dimension_numbers<[1], [0], [0], [1], [0, 0, 1, 1], [], []>} : vector<16x6xf32>, vector<6x1024xf32>, vector<16x1024xf32> -> vector<16x1024xf32>
    %236 = arith.addf %231, %235 : vector<16x1024xf32>
    %c20_160 = arith.constant 20 : index
    %c0_161 = arith.constant 0 : index
    %c0_162 = arith.constant 0 : index
    %237 = vector.load %arg4[%c20_160, %c0_161, %c0_162] : memref<25x16x6xf32, #tpu.memory_space<vmem>>, vector<1x16x6xf32>
    %238 = vector.shape_cast %237 : vector<1x16x6xf32> to vector<16x6xf32>
    %239 = vector.extract_strided_slice %138 {offsets = [0, 256], sizes = [6, 1024], strides = [1, 1]} : vector<6x2048xf32> to vector<6x1024xf32>
    %cst_163 = arith.constant dense<0.000000e+00> : vector<16x1024xf32>
    %240 = tpu.matmul %238, %239, %cst_163 {dimension_numbers = #tpu.dot_dimension_numbers<[1], [0], [0], [1], [0, 0, 1, 1], [], []>} : vector<16x6xf32>, vector<6x1024xf32>, vector<16x1024xf32> -> vector<16x1024xf32>
    %241 = arith.addf %236, %240 : vector<16x1024xf32>
    %c21_164 = arith.constant 21 : index
    %c0_165 = arith.constant 0 : index
    %c0_166 = arith.constant 0 : index
    %242 = vector.load %arg4[%c21_164, %c0_165, %c0_166] : memref<25x16x6xf32, #tpu.memory_space<vmem>>, vector<1x16x6xf32>
    %243 = vector.shape_cast %242 : vector<1x16x6xf32> to vector<16x6xf32>
    %244 = vector.extract_strided_slice %138 {offsets = [0, 258], sizes = [6, 1024], strides = [1, 1]} : vector<6x2048xf32> to vector<6x1024xf32>
    %cst_167 = arith.constant dense<0.000000e+00> : vector<16x1024xf32>
    %245 = tpu.matmul %243, %244, %cst_167 {dimension_numbers = #tpu.dot_dimension_numbers<[1], [0], [0], [1], [0, 0, 1, 1], [], []>} : vector<16x6xf32>, vector<6x1024xf32>, vector<16x1024xf32> -> vector<16x1024xf32>
    %246 = arith.addf %241, %245 : vector<16x1024xf32>
    %c22_168 = arith.constant 22 : index
    %c0_169 = arith.constant 0 : index
    %c0_170 = arith.constant 0 : index
    %247 = vector.load %arg4[%c22_168, %c0_169, %c0_170] : memref<25x16x6xf32, #tpu.memory_space<vmem>>, vector<1x16x6xf32>
    %248 = vector.shape_cast %247 : vector<1x16x6xf32> to vector<16x6xf32>
    %249 = vector.extract_strided_slice %138 {offsets = [0, 260], sizes = [6, 1024], strides = [1, 1]} : vector<6x2048xf32> to vector<6x1024xf32>
    %cst_171 = arith.constant dense<0.000000e+00> : vector<16x1024xf32>
    %250 = tpu.matmul %248, %249, %cst_171 {dimension_numbers = #tpu.dot_dimension_numbers<[1], [0], [0], [1], [0, 0, 1, 1], [], []>} : vector<16x6xf32>, vector<6x1024xf32>, vector<16x1024xf32> -> vector<16x1024xf32>
    %251 = arith.addf %246, %250 : vector<16x1024xf32>
    %c23_172 = arith.constant 23 : index
    %c0_173 = arith.constant 0 : index
    %c0_174 = arith.constant 0 : index
    %252 = vector.load %arg4[%c23_172, %c0_173, %c0_174] : memref<25x16x6xf32, #tpu.memory_space<vmem>>, vector<1x16x6xf32>
    %253 = vector.shape_cast %252 : vector<1x16x6xf32> to vector<16x6xf32>
    %254 = vector.extract_strided_slice %138 {offsets = [0, 262], sizes = [6, 1024], strides = [1, 1]} : vector<6x2048xf32> to vector<6x1024xf32>
    %cst_175 = arith.constant dense<0.000000e+00> : vector<16x1024xf32>
    %255 = tpu.matmul %253, %254, %cst_175 {dimension_numbers = #tpu.dot_dimension_numbers<[1], [0], [0], [1], [0, 0, 1, 1], [], []>} : vector<16x6xf32>, vector<6x1024xf32>, vector<16x1024xf32> -> vector<16x1024xf32>
    %256 = arith.addf %251, %255 : vector<16x1024xf32>
    %c24_176 = arith.constant 24 : index
    %c0_177 = arith.constant 0 : index
    %c0_178 = arith.constant 0 : index
    %257 = vector.load %arg4[%c24_176, %c0_177, %c0_178] : memref<25x16x6xf32, #tpu.memory_space<vmem>>, vector<1x16x6xf32>
    %258 = vector.shape_cast %257 : vector<1x16x6xf32> to vector<16x6xf32>
    %259 = vector.extract_strided_slice %138 {offsets = [0, 264], sizes = [6, 1024], strides = [1, 1]} : vector<6x2048xf32> to vector<6x1024xf32>
    %cst_179 = arith.constant dense<0.000000e+00> : vector<16x1024xf32>
    %260 = tpu.matmul %258, %259, %cst_179 {dimension_numbers = #tpu.dot_dimension_numbers<[1], [0], [0], [1], [0, 0, 1, 1], [], []>} : vector<16x6xf32>, vector<6x1024xf32>, vector<16x1024xf32> -> vector<16x1024xf32>
    %261 = arith.addf %256, %260 : vector<16x1024xf32>
    %c0_180 = arith.constant 0 : index
    %c0_181 = arith.constant 0 : index
    %262 = vector.load %arg5[%c0_180, %c0_181] : memref<16x1xf32, #tpu.memory_space<vmem>>, vector<16x1xf32>
    %263 = vector.broadcast %262 : vector<16x1xf32> to vector<16x1024xf32>
    %264 = arith.addf %261, %263 : vector<16x1024xf32>
    %cst_182 = arith.constant 0.000000e+00 : f32
    %265 = vector.broadcast %cst_182 : f32 to vector<16x1024xf32>
    %266 = arith.maximumf %264, %265 : vector<16x1024xf32>
    %267 = tpu.concatenate %266, %266 in 1 : vector<16x1024xf32>, vector<16x1024xf32> -> vector<16x2048xf32>
    %268 = vector.extract_strided_slice %267 {offsets = [0, 2], sizes = [16, 1024], strides = [1, 1]} : vector<16x2048xf32> to vector<16x1024xf32>
    %269 = arith.maximumf %266, %268 : vector<16x1024xf32>
    %270 = vector.extract_strided_slice %267 {offsets = [0, 64], sizes = [16, 1024], strides = [1, 1]} : vector<16x2048xf32> to vector<16x1024xf32>
    %271 = vector.extract_strided_slice %267 {offsets = [0, 66], sizes = [16, 1024], strides = [1, 1]} : vector<16x2048xf32> to vector<16x1024xf32>
    %272 = arith.maximumf %270, %271 : vector<16x1024xf32>
    %273 = arith.maximumf %269, %272 : vector<16x1024xf32>
    %274 = vector.extract_strided_slice %273 {offsets = [0, 0], sizes = [16, 1], strides = [1, 1]} : vector<16x1024xf32> to vector<16x1xf32>
    %275 = vector.extract_strided_slice %273 {offsets = [0, 4], sizes = [16, 1], strides = [1, 1]} : vector<16x1024xf32> to vector<16x1xf32>
    %276 = vector.extract_strided_slice %273 {offsets = [0, 8], sizes = [16, 1], strides = [1, 1]} : vector<16x1024xf32> to vector<16x1xf32>
    %277 = vector.extract_strided_slice %273 {offsets = [0, 12], sizes = [16, 1], strides = [1, 1]} : vector<16x1024xf32> to vector<16x1xf32>
    %278 = vector.extract_strided_slice %273 {offsets = [0, 16], sizes = [16, 1], strides = [1, 1]} : vector<16x1024xf32> to vector<16x1xf32>
    %279 = vector.extract_strided_slice %273 {offsets = [0, 128], sizes = [16, 1], strides = [1, 1]} : vector<16x1024xf32> to vector<16x1xf32>
    %280 = vector.extract_strided_slice %273 {offsets = [0, 132], sizes = [16, 1], strides = [1, 1]} : vector<16x1024xf32> to vector<16x1xf32>
    %281 = vector.extract_strided_slice %273 {offsets = [0, 136], sizes = [16, 1], strides = [1, 1]} : vector<16x1024xf32> to vector<16x1xf32>
    %282 = vector.extract_strided_slice %273 {offsets = [0, 140], sizes = [16, 1], strides = [1, 1]} : vector<16x1024xf32> to vector<16x1xf32>
    %283 = vector.extract_strided_slice %273 {offsets = [0, 144], sizes = [16, 1], strides = [1, 1]} : vector<16x1024xf32> to vector<16x1xf32>
    %284 = vector.extract_strided_slice %273 {offsets = [0, 256], sizes = [16, 1], strides = [1, 1]} : vector<16x1024xf32> to vector<16x1xf32>
    %285 = vector.extract_strided_slice %273 {offsets = [0, 260], sizes = [16, 1], strides = [1, 1]} : vector<16x1024xf32> to vector<16x1xf32>
    %286 = vector.extract_strided_slice %273 {offsets = [0, 264], sizes = [16, 1], strides = [1, 1]} : vector<16x1024xf32> to vector<16x1xf32>
    %287 = vector.extract_strided_slice %273 {offsets = [0, 268], sizes = [16, 1], strides = [1, 1]} : vector<16x1024xf32> to vector<16x1xf32>
    %288 = vector.extract_strided_slice %273 {offsets = [0, 272], sizes = [16, 1], strides = [1, 1]} : vector<16x1024xf32> to vector<16x1xf32>
    %289 = vector.extract_strided_slice %273 {offsets = [0, 384], sizes = [16, 1], strides = [1, 1]} : vector<16x1024xf32> to vector<16x1xf32>
    %290 = vector.extract_strided_slice %273 {offsets = [0, 388], sizes = [16, 1], strides = [1, 1]} : vector<16x1024xf32> to vector<16x1xf32>
    %291 = vector.extract_strided_slice %273 {offsets = [0, 392], sizes = [16, 1], strides = [1, 1]} : vector<16x1024xf32> to vector<16x1xf32>
    %292 = vector.extract_strided_slice %273 {offsets = [0, 396], sizes = [16, 1], strides = [1, 1]} : vector<16x1024xf32> to vector<16x1xf32>
    %293 = vector.extract_strided_slice %273 {offsets = [0, 400], sizes = [16, 1], strides = [1, 1]} : vector<16x1024xf32> to vector<16x1xf32>
    %294 = vector.extract_strided_slice %273 {offsets = [0, 512], sizes = [16, 1], strides = [1, 1]} : vector<16x1024xf32> to vector<16x1xf32>
    %295 = vector.extract_strided_slice %273 {offsets = [0, 516], sizes = [16, 1], strides = [1, 1]} : vector<16x1024xf32> to vector<16x1xf32>
    %296 = vector.extract_strided_slice %273 {offsets = [0, 520], sizes = [16, 1], strides = [1, 1]} : vector<16x1024xf32> to vector<16x1xf32>
    %297 = vector.extract_strided_slice %273 {offsets = [0, 524], sizes = [16, 1], strides = [1, 1]} : vector<16x1024xf32> to vector<16x1xf32>
    %298 = vector.extract_strided_slice %273 {offsets = [0, 528], sizes = [16, 1], strides = [1, 1]} : vector<16x1024xf32> to vector<16x1xf32>
    %299 = tpu.concatenate %274, %275, %276, %277, %278, %279, %280, %281, %282, %283, %284, %285, %286, %287, %288, %289 in 0 : vector<16x1xf32>, vector<16x1xf32>, vector<16x1xf32>, vector<16x1xf32>, vector<16x1xf32>, vector<16x1xf32>, vector<16x1xf32>, vector<16x1xf32>, vector<16x1xf32>, vector<16x1xf32>, vector<16x1xf32>, vector<16x1xf32>, vector<16x1xf32>, vector<16x1xf32>, vector<16x1xf32>, vector<16x1xf32> -> vector<256x1xf32>
    %300 = tpu.concatenate %290, %291, %292, %293, %294, %295, %296, %297, %298 in 0 : vector<16x1xf32>, vector<16x1xf32>, vector<16x1xf32>, vector<16x1xf32>, vector<16x1xf32>, vector<16x1xf32>, vector<16x1xf32>, vector<16x1xf32>, vector<16x1xf32> -> vector<144x1xf32>
    %301 = tpu.concatenate %299, %300 in 0 : vector<256x1xf32>, vector<144x1xf32> -> vector<400x1xf32>
    %c0_183 = arith.constant 0 : index
    %c0_184 = arith.constant 0 : index
    %302 = vector.load %arg6[%c0_183, %c0_184] : memref<120x400xf32, #tpu.memory_space<vmem>>, vector<120x400xf32>
    %cst_185 = arith.constant dense<0.000000e+00> : vector<120x1xf32>
    %303 = tpu.matmul %302, %301, %cst_185 {dimension_numbers = #tpu.dot_dimension_numbers<[1], [0], [0], [1], [0, 0, 1, 1], [], []>} : vector<120x400xf32>, vector<400x1xf32>, vector<120x1xf32> -> vector<120x1xf32>
    %c0_186 = arith.constant 0 : index
    %c0_187 = arith.constant 0 : index
    %304 = vector.load %arg7[%c0_186, %c0_187] : memref<120x1xf32, #tpu.memory_space<vmem>>, vector<120x1xf32>
    %305 = arith.addf %303, %304 : vector<120x1xf32>
    %cst_188 = arith.constant 0.000000e+00 : f32
    %306 = vector.broadcast %cst_188 : f32 to vector<120x1xf32>
    %307 = arith.maximumf %305, %306 : vector<120x1xf32>
    %c0_189 = arith.constant 0 : index
    %c0_190 = arith.constant 0 : index
    %308 = vector.load %arg8[%c0_189, %c0_190] : memref<84x120xf32, #tpu.memory_space<vmem>>, vector<84x120xf32>
    %cst_191 = arith.constant dense<0.000000e+00> : vector<84x1xf32>
    %309 = tpu.matmul %308, %307, %cst_191 {dimension_numbers = #tpu.dot_dimension_numbers<[1], [0], [0], [1], [0, 0, 1, 1], [], []>} : vector<84x120xf32>, vector<120x1xf32>, vector<84x1xf32> -> vector<84x1xf32>
    %c0_192 = arith.constant 0 : index
    %c0_193 = arith.constant 0 : index
    %310 = vector.load %arg9[%c0_192, %c0_193] : memref<84x1xf32, #tpu.memory_space<vmem>>, vector<84x1xf32>
    %311 = arith.addf %309, %310 : vector<84x1xf32>
    %cst_194 = arith.constant 0.000000e+00 : f32
    %312 = vector.broadcast %cst_194 : f32 to vector<84x1xf32>
    %313 = arith.maximumf %311, %312 : vector<84x1xf32>
    %c0_195 = arith.constant 0 : index
    %c0_196 = arith.constant 0 : index
    %314 = vector.load %arg10[%c0_195, %c0_196] : memref<13x84xf32, #tpu.memory_space<vmem>>, vector<13x84xf32>
    %cst_197 = arith.constant dense<0.000000e+00> : vector<13x1xf32>
    %315 = tpu.matmul %314, %313, %cst_197 {dimension_numbers = #tpu.dot_dimension_numbers<[1], [0], [0], [1], [0, 0, 1, 1], [], []>} : vector<13x84xf32>, vector<84x1xf32>, vector<13x1xf32> -> vector<13x1xf32>
    %c0_198 = arith.constant 0 : index
    %c0_199 = arith.constant 0 : index
    %316 = vector.load %arg11[%c0_198, %c0_199] : memref<13x1xf32, #tpu.memory_space<vmem>>, vector<13x1xf32>
    %317 = arith.addf %315, %316 : vector<13x1xf32>
    %c0_200 = arith.constant 0 : index
    %c0_201 = arith.constant 0 : index
    %c0_202 = arith.constant 0 : index
    %318 = vector.load %arg12[%c0_200, %c0_201, %c0_202] : memref<1x13x1xf32, #tpu.memory_space<vmem>>, vector<1x13x1xf32>
    %319 = vector.shape_cast %318 : vector<1x13x1xf32> to vector<13x1xf32>
    %320 = vector.shape_cast %317 : vector<13x1xf32> to vector<1x13x1xf32>
    tpu.vector_store %arg12[%c0_200, %c0_201, %c0_202], %320 {strides = array<i32>} : memref<1x13x1xf32, #tpu.memory_space<vmem>>, vector<1x13x1xf32>,
    return
  }
  func.func @transform_0(%arg0: i32) -> (i32, i32, i32) {
    %c0_i32 = arith.constant 0 : i32
    %c0_i32_0 = arith.constant 0 : i32
    %c0_i32_1 = arith.constant 0 : i32
    return %arg0, %c0_i32, %c0_i32_0 : i32, i32, i32
  }
  func.func @transform_1(%arg0: i32) -> (i32, i32, i32) {
    %c0_i32 = arith.constant 0 : i32
    %c0_i32_0 = arith.constant 0 : i32
    %c0_i32_1 = arith.constant 0 : i32
    %c0_i32_2 = arith.constant 0 : i32
    return %c0_i32, %c0_i32_0, %c0_i32_1 : i32, i32, i32
  }
  func.func @transform_2(%arg0: i32) -> (i32, i32) {
    %c0_i32 = arith.constant 0 : i32
    %c0_i32_0 = arith.constant 0 : i32
    %c0_i32_1 = arith.constant 0 : i32
    return %c0_i32, %c0_i32_0 : i32, i32
  }
  func.func @transform_3(%arg0: i32) -> (i32, i32, i32) {
    %c0_i32 = arith.constant 0 : i32
    %c0_i32_0 = arith.constant 0 : i32
    %c0_i32_1 = arith.constant 0 : i32
    %c0_i32_2 = arith.constant 0 : i32
    return %c0_i32, %c0_i32_0, %c0_i32_1 : i32, i32, i32
  }
  func.func @transform_4(%arg0: i32) -> (i32, i32) {
    %c0_i32 = arith.constant 0 : i32
    %c0_i32_0 = arith.constant 0 : i32
    %c0_i32_1 = arith.constant 0 : i32
    return %c0_i32, %c0_i32_0 : i32, i32
  }
  func.func @transform_5(%arg0: i32) -> (i32, i32) {
    %c0_i32 = arith.constant 0 : i32
    %c0_i32_0 = arith.constant 0 : i32
    %c0_i32_1 = arith.constant 0 : i32
    return %c0_i32, %c0_i32_0 : i32, i32
  }
  func.func @transform_6(%arg0: i32) -> (i32, i32) {
    %c0_i32 = arith.constant 0 : i32
    %c0_i32_0 = arith.constant 0 : i32
    %c0_i32_1 = arith.constant 0 : i32
    return %c0_i32, %c0_i32_0 : i32, i32
  }
  func.func @transform_7(%arg0: i32) -> (i32, i32) {
    %c0_i32 = arith.constant 0 : i32
    %c0_i32_0 = arith.constant 0 : i32
    %c0_i32_1 = arith.constant 0 : i32
    return %c0_i32, %c0_i32_0 : i32, i32
  }
  func.func @transform_8(%arg0: i32) -> (i32, i32) {
    %c0_i32 = arith.constant 0 : i32
    %c0_i32_0 = arith.constant 0 : i32
    %c0_i32_1 = arith.constant 0 : i32
    return %c0_i32, %c0_i32_0 : i32, i32
  }
  func.func @transform_9(%arg0: i32) -> (i32, i32) {
    %c0_i32 = arith.constant 0 : i32
    %c0_i32_0 = arith.constant 0 : i32
    %c0_i32_1 = arith.constant 0 : i32
    return %c0_i32, %c0_i32_0 : i32, i32
  }
  func.func @transform_10(%arg0: i32) -> (i32, i32) {
    %c0_i32 = arith.constant 0 : i32
    %c0_i32_0 = arith.constant 0 : i32
    %c0_i32_1 = arith.constant 0 : i32
    return %c0_i32, %c0_i32_0 : i32, i32
  }
  func.func @transform_11(%arg0: i32) -> (i32, i32, i32) {
    %c0_i32 = arith.constant 0 : i32
    %c0_i32_0 = arith.constant 0 : i32
    %c0_i32_1 = arith.constant 0 : i32
    return %arg0, %c0_i32, %c0_i32_0 : i32, i32, i32
  }
}

</mosaic_0001>

<bundles_post_ra>
// kernel: lenet5_forward.1
= control target key start
LH: loop header
LB: loop body
LE: loop exit
PB: predicated region body
PF: predicated region fallthrough
CT: control target
= control target key end

     0   :  { %s20343_s17 = smov 0   ;;  %s23706_s0 = inlined_call_operand.vmem [shape: f32[2,3,1024], index: 0, kind: input, shape index: {}]   ;;  %s23707_s1 = inlined_call_operand.vmem [shape: f32[25,6,3], index: 1, kind: input, shape index: {}]   ;;  %s23708_s2 = inlined_call_operand.vmem [shape: f32[6,1], index: 2, kind: input, shape index: {}]   ;;  %s23709_s3 = inlined_call_operand.vmem [shape: f32[25,16,6], index: 3, kind: input, shape index: {}]   ;;  %s23710_s4 = inlined_call_operand.vmem [shape: f32[16,1], index: 4, kind: input, shape index: {}]   ;;  %s23711_s5 = inlined_call_operand.vmem [shape: f32[120,400], index: 5, kind: input, shape index: {}]   ;;  %s23712_s6 = inlined_call_operand.vmem [shape: f32[120,1], index: 6, kind: input, shape index: {}]   ;;  %s23713_s7 = inlined_call_operand.vmem [shape: f32[84,120], index: 7, kind: input, shape index: {}]   ;;  %s23714_s8 = inlined_call_operand.vmem [shape: f32[84,1], index: 8, kind: input, shape index: {}]   ;;  %s23715_s9 = inlined_call_operand.vmem [shape: f32[13,84], index: 9, kind: input, shape index: {}]   ;;  %s23716_s10 = inlined_call_operand.vmem [shape: f32[13,1], index: 10, kind: input, shape index: {}]   ;;  %s23717_s11 = inlined_call_operand.vmem [shape: f32[2,13,1], index: 11, kind: output, shape index: {}]  }
   0x1 LB: > { %s18404_s18 = sadd.s32 4294967295, %s20251_s17   ;;  %p18408_p0 = scmp.ge.s32.totalorder %s20251_s17, 1  ;;  %s20251_s17 = sphi %s20343_s17, %s21_s17  }
   0x2   : > { %p337_p1 = scmp.lt.s32.totalorder %s20251_s17, 3 }
   0x4   : > { %p338_p2 = pnand %p18408_p0, %p337_p1 }
   0x6   : > { %341 = sbr.rel (%p338_p2) target bundleno = 2938 (0xb7a), region = 64 }
   0xd   : > { %p377_p3 = scmp.lt.s32.totalorder %s18404_s18, 1  ;;  %v23719_v0 = vmov 0.0   ;;  %s20254_s23 = smov 127   ;;  %vm418_vm0 = vcmask 1039360   ;;  %vm431_vm1 = vcmask 1042432   ;;  %vm427_vm2 = vcmask 23552  }
   0xe   : > { %512 = vmatprep.mubr.f32.mxu0 %v23719_v0  ;;  %583 = vmatprep.mubr.f32.mxu1 %v23719_v0  ;;  %s20255_s24 = smov 126   ;;  %s20256_s25 = smov 125   ;;  %v18413_v15 = vld [vmem:[%s23707_s1 + $0x8] sm:$0x3f]  ;;  %v399_v28 = vld [vmem:[%s23707_s1] sm:$0x3f] }
   0xf   : > { %s23823_s18 = smov (!%p377_p3, %s18404_s18), 1  ;;  %s20257_s26 = smov 124   ;;  %vm1053_vm3 = vcmask 1031168   ;;  %v18438_v41 = vld [vmem:[%s23707_s1 + $0x10] sm:$0x3f]  ;;  %vm1391_vm4 = vcmask 1022976  }
  0x10   : > { %s19216_s19 = sshll.u32 %s23823_s18, 5  ;;  %s20258_s27 = smov 96   ;;  %v18451_v50 = vld [vmem:[%s23707_s1 + $0x18] sm:$0x3f]  ;;  %vm1729_vm5 = vcmask 1014784   ;;  %vm2067_vm6 = vcmask 785408  }
  0x11   : > { %s20357_s22 = scalar_lea.vmem %s23706_s0, %s19216_s19  ;;  %s20259_s28 = smov 95   ;;  %vm2405_vm7 = vcmask 777216   ;;  %vm2743_vm8 = vcmask 769024   ;;  %vm3081_vm9 = vcmask 760832   ;;  %vm3419_vm10 = vcmask 752640  }
  0x12   : > { %v20362_v1 = vld [vmem:[%s20357_s22 + $0x8] sm:$0x77]  ;;  %v20365_v2 = vld [vmem:[%s20357_s22] sm:$0x77]  ;;  %v20376_v4 = vld [vmem:[%s20357_s22 + $0x10] sm:$0x77] }
  0x13   : > { %406 = vrot.lane.b32.xlu0 %v20362_v1, %s20254_s23  ;;  %402 = vrot.lane.b32.xlu1 %v20365_v2, %s20254_s23  ;;  %v20373_v3 = vcombine.high %v20362_v1, %v20362_v1  ;;  %v20384_v5 = vcombine.high %v20376_v4, %v20376_v4  ;;  %v20388_v6 = vcombine.high %v20365_v2, %v20365_v2  ;;  %v20391_v7 = vld [vmem:[%s20357_s22 + $0x18] sm:$0x77]  ;;  %s20260_s29 = smov 94   ;;  %s20261_s30 = smov 93   ;;  %vm3757_vm11 = vcmask 523264  }
  0x14   : > { %v20399_v8 = vcombine.high %v20391_v7, %v20391_v7  ;;  %s20262_s14 = smov 92   ;;  %s20263_s21 = smov 64   ;;  %vm4095_vm12 = vcmask 515072   ;;  %vm4433_vm13 = vcmask 506880   ;;  %vm4771_vm14 = vcmask 498688  }
  0x15   : > { %s20265_s13 = smov 62   ;;  %s20266_s16 = smov 61   ;;  %vm5109_vm15 = vcmask 490496  }
  0x16   : > { %s20269_s15 = smov 31   ;;  %s20270_s20 = smov 30  }
  0x17   : > { %410 = vrot.lane.b32.xlu0 %v20376_v4, %s20254_s23  ;;  %408 = vrot.lane.b32.xlu1 %v20373_v3, %s20254_s23  ;;  %s20276_s19 = smov 58  }
  0x1b   : > { %412 = vrot.lane.b32.xlu1 %v20384_v5, %s20254_s23  ;;  %404 = vrot.lane.b32.xlu0 %v20388_v6, %s20254_s23 }
  0x1f   : > { %416 = vrot.lane.b32.xlu1 %v20399_v8, %s20254_s23  ;;  %414 = vrot.lane.b32.xlu0 %v20391_v7, %s20254_s23 }
  0x23   : > { %1041 = vrot.lane.b32.xlu1 %v20362_v1, %s20255_s24  ;;  %1039 = vrot.lane.b32.xlu0 %v20388_v6, %s20255_s24 }
  0x27   : > { %1043 = vrot.lane.b32.xlu1 %v20373_v3, %s20255_s24  ;;  %1037 = vrot.lane.b32.xlu0 %v20365_v2, %s20255_s24 }
  0x2b   : > { %1047 = vrot.lane.b32.xlu1 %v20384_v5, %s20255_s24  ;;  %1045 = vrot.lane.b32.xlu0 %v20376_v4, %s20255_s24 }
  0x2f   : > { %1051 = vrot.lane.b32.xlu1 %v20399_v8, %s20255_s24  ;;  %1049 = vrot.lane.b32.xlu0 %v20391_v7, %s20255_s24 }
  0x33   : > { %1379 = vrot.lane.b32.xlu1 %v20362_v1, %s20256_s25  ;;  %1377 = vrot.lane.b32.xlu0 %v20388_v6, %s20256_s25 }
  0x37   : > { %1381 = vrot.lane.b32.xlu1 %v20373_v3, %s20256_s25  ;;  %1375 = vrot.lane.b32.xlu0 %v20365_v2, %s20256_s25 }
  0x3b   : > { %1385 = vrot.lane.b32.xlu1 %v20384_v5, %s20256_s25  ;;  %1383 = vrot.lane.b32.xlu0 %v20376_v4, %s20256_s25 }
  0x3f   : > { %1389 = vrot.lane.b32.xlu1 %v20399_v8, %s20256_s25  ;;  %1387 = vrot.lane.b32.xlu0 %v20391_v7, %s20256_s25  ;;  %s20267_s25 = smov 60  }
  0x43   : > { %1717 = vrot.lane.b32.xlu1 %v20362_v1, %s20257_s26  ;;  %1715 = vrot.lane.b32.xlu0 %v20388_v6, %s20257_s26 }
  0x47   : > { %1719 = vrot.lane.b32.xlu1 %v20373_v3, %s20257_s26  ;;  %1713 = vrot.lane.b32.xlu0 %v20365_v2, %s20257_s26 }
  0x4b   : > { %1723 = vrot.lane.b32.xlu1 %v20384_v5, %s20257_s26  ;;  %1721 = vrot.lane.b32.xlu0 %v20376_v4, %s20257_s26 }
  0x4f   : > { %1727 = vrot.lane.b32.xlu1 %v20399_v8, %s20257_s26  ;;  %1725 = vrot.lane.b32.xlu0 %v20391_v7, %s20257_s26 }
  0x53   : > { %2055 = vrot.lane.b32.xlu1 %v20362_v1, %s20258_s27  ;;  %2053 = vrot.lane.b32.xlu0 %v20388_v6, %s20258_s27 }
  0x57   : > { %2057 = vrot.lane.b32.xlu1 %v20373_v3, %s20258_s27  ;;  %2051 = vrot.lane.b32.xlu0 %v20365_v2, %s20258_s27 }
  0x5b   : > { %2061 = vrot.lane.b32.xlu1 %v20384_v5, %s20258_s27  ;;  %2059 = vrot.lane.b32.xlu0 %v20376_v4, %s20258_s27 }
  0x5f   : > { %2065 = vrot.lane.b32.xlu1 %v20399_v8, %s20258_s27  ;;  %2063 = vrot.lane.b32.xlu0 %v20391_v7, %s20258_s27 }
  0x63   : > { %2393 = vrot.lane.b32.xlu1 %v20362_v1, %s20259_s28  ;;  %2391 = vrot.lane.b32.xlu0 %v20388_v6, %s20259_s28 }
  0x67   : > { %2395 = vrot.lane.b32.xlu1 %v20373_v3, %s20259_s28  ;;  %2389 = vrot.lane.b32.xlu0 %v20365_v2, %s20259_s28 }
  0x6b   : > { %2399 = vrot.lane.b32.xlu1 %v20384_v5, %s20259_s28  ;;  %2397 = vrot.lane.b32.xlu0 %v20376_v4, %s20259_s28 }
  0x6f   : > { %2403 = vrot.lane.b32.xlu1 %v20399_v8, %s20259_s28  ;;  %2401 = vrot.lane.b32.xlu0 %v20391_v7, %s20259_s28 }
  0x73   : > { %2731 = vrot.lane.b32.xlu1 %v20362_v1, %s20260_s29  ;;  %2729 = vrot.lane.b32.xlu0 %v20388_v6, %s20260_s29 }
  0x77   : > { %2733 = vrot.lane.b32.xlu1 %v20373_v3, %s20260_s29  ;;  %2727 = vrot.lane.b32.xlu0 %v20365_v2, %s20260_s29 }
  0x7b   : > { %2737 = vrot.lane.b32.xlu1 %v20384_v5, %s20260_s29  ;;  %2735 = vrot.lane.b32.xlu0 %v20376_v4, %s20260_s29 }
  0x7f   : > { %2741 = vrot.lane.b32.xlu1 %v20399_v8, %s20260_s29  ;;  %2739 = vrot.lane.b32.xlu0 %v20391_v7, %s20260_s29  ;;  %s20264_s29 = smov 63  }
  0x83   : > { %3069 = vrot.lane.b32.xlu1 %v20362_v1, %s20261_s30  ;;  %3067 = vrot.lane.b32.xlu0 %v20388_v6, %s20261_s30 }
  0x85   : > { %v407_v9 = vpop.permute.xlu0 %406  ;;  %v403_v10 = vpop.permute.xlu1 %402 }
  0x87   : > { %3071 = vrot.lane.b32.xlu1 %v20373_v3, %s20261_s30  ;;  %3065 = vrot.lane.b32.xlu0 %v20365_v2, %s20261_s30 }
  0x89   : > { %v411_v11 = vpop.permute.xlu0 %410  ;;  %v409_v12 = vpop.permute.xlu1 %408 }
  0x8a   : > { %v20482_v13 = vsel %vm418_vm0, %v409_v12, %v411_v11  ;;  %v20485_v14 = vsel %vm418_vm0, %v407_v9, %v409_v12 }
  0x8b   : > { %3075 = vrot.lane.b32.xlu1 %v20384_v5, %s20261_s30  ;;  %18417 = vmatprep.subr.msk.mxu1 %vm431_vm1, %v20482_v13 }
  0x8c   : > { %3073 = vrot.lane.b32.xlu0 %v20376_v4, %s20261_s30  ;;  %18418 = vmatpush1.msk.msra.mxu1 %vm431_vm1, %v20485_v14 }
  0x8d   : > { %v413_v16 = vpop.permute.xlu1 %412  ;;  %v405_v17 = vpop.permute.xlu0 %404  ;;  %18419 = vmatmul.mubr.msk.f32.vlgmr.msra.gmra.mrb[0].mxu1 %vm427_vm2, %v18413_v15 }
  0x8e   : > { %v20498_v18 = vsel %vm418_vm0, %v405_v17, %v407_v9  ;;  %v20501_v19 = vsel %vm418_vm0, %v403_v10, %v405_v17  ;;  %725 = vmatprep.mubr.f32.mxu1 %v23719_v0  ;;  %v20526_v25 = vsel %vm418_vm0, %v411_v11, %v413_v16  ;;  %v18464_v11 = vld [vmem:[%s23707_s1 + $0x20] sm:$0x3f] }
  0x8f   : > { %3079 = vrot.lane.b32.xlu1 %v20399_v8, %s20261_s30  ;;  %18414 = vmatprep.subr.msk.mxu0 %vm431_vm1, %v20498_v18 }
  0x90   : > { %3077 = vrot.lane.b32.xlu0 %v20391_v7, %s20261_s30  ;;  %18415 = vmatpush1.msk.msra.mxu0 %vm431_vm1, %v20501_v19  ;;  %s20268_s30 = smov 32  }
  0x91   : > { %v417_v20 = vpop.permute.xlu1 %416  ;;  %18416 = vmatmul.mubr.msk.f32.vlgmr.msra.gmra.mrb[0].mxu0 %vm427_vm2, %v18413_v15  ;;  %v415_v21 = vpop.permute.xlu0 %414 }
  0x92   : > { %v20512_v22 = vsel %vm418_vm0, %v415_v21, %v417_v20  ;;  %v20515_v23 = vsel %vm418_vm0, %v417_v20, %v403_v10  ;;  %v20518_v24 = vsel %vm418_vm0, %v413_v16, %v415_v21  ;;  %654 = vmatprep.mubr.f32.mxu0 %v23719_v0 }
  0x93   : > { %3407 = vrot.lane.b32.xlu1 %v20362_v1, %s20262_s14  ;;  %18423 = vmatprep.subr.msk.mxu1 %vm431_vm1, %v20515_v23 }
  0x94   : > { %3405 = vrot.lane.b32.xlu0 %v20388_v6, %s20262_s14  ;;  %18420 = vmatprep.subr.msk.mxu0 %vm431_vm1, %v20518_v24 }
  0x95   : > { %18421 = vmatpush1.msk.msra.mxu0 %vm431_vm1, %v20526_v25  ;;  %18424 = vmatpush1.msk.msra.mxu1 %vm431_vm1, %v20512_v22  ;;  %v1042_v26 = vpop.permute.xlu1 %1041  ;;  %v1040_v27 = vpop.permute.xlu0 %1039 }
  0x96   : > { %18422 = vmatmul.mubr.msk.f32.vlgmr.msra.gmra.mrb[2].mxu0 %vm427_vm2, %v18413_v15  ;;  %18426 = vmatprep.subr.msk.mxu0 %vm431_vm1, %v20388_v6  ;;  %v20558_v31 = vsel %vm1053_vm3, %v1040_v27, %v1042_v26 }
  0x97   : > { %3409 = vrot.lane.b32.xlu1 %v20373_v3, %s20262_s14  ;;  %18427 = vmatpush1.msk.msra.mxu0 %vm431_vm1, %v20365_v2 }
  0x98   : > { %3403 = vrot.lane.b32.xlu0 %v20365_v2, %s20262_s14  ;;  %18425 = vmatmul.mubr.msk.f32.vlgmr.msra.gmra.mrb[2].mxu1 %vm427_vm2, %v18413_v15 }
  0x99   : > { %815 = vmatprep.mubr.f32.mxu0 %v23719_v0  ;;  %18432 = vmatprep.subr.msk.mxu0 %vm431_vm1, %v20384_v5  ;;  %v1044_v29 = vpop.permute.xlu1 %1043  ;;  %v1038_v30 = vpop.permute.xlu0 %1037 }
  0x9a   : > { %18428 = vmatmul.mubr.msk.f32.vlgmr.msra.gmra.mrb[0].mxu0 %vm427_vm2, %v399_v28  ;;  %18429 = vmatprep.subr.msk.mxu1 %vm431_vm1, %v20373_v3  ;;  %v20572_v34 = vsel %vm1053_vm3, %v1038_v30, %v1040_v27  ;;  %v20592_v38 = vsel %vm1053_vm3, %v1042_v26, %v1044_v29 }
  0x9b   : > { %18433 = vmatpush1.msk.msra.mxu0 %vm431_vm1, %v20376_v4  ;;  %3413 = vrot.lane.b32.xlu1 %v20384_v5, %s20262_s14 }
  0x9c   : > { %18439 = vmatprep.subr.msk.mxu0 %vm431_vm1, %v20558_v31  ;;  %3411 = vrot.lane.b32.xlu0 %v20376_v4, %s20262_s14 }
  0x9d   : > { %18430 = vmatpush1.msk.msra.mxu1 %vm431_vm1, %v20362_v1  ;;  %886 = vmatprep.mubr.f32.mxu1 %v23719_v0  ;;  %v1048_v32 = vpop.permute.xlu1 %1047  ;;  %v1046_v33 = vpop.permute.xlu0 %1045 }
  0x9e   : > { %18431 = vmatmul.mubr.msk.f32.vlgmr.msra.gmra.mrb[0].mxu1 %vm427_vm2, %v399_v28  ;;  %957 = vmatprep.mubr.f32.mxu0 %v23719_v0  ;;  %v20578_v35 = vsel %vm1053_vm3, %v1044_v29, %v1046_v33  ;;  %v20620_v45 = vsel %vm1053_vm3, %v1046_v33, %v1048_v32 }
  0x9f   : > { %18434 = vmatmul.mubr.msk.f32.vlgmr.msra.gmra.mrb[2].mxu0 %vm427_vm2, %v399_v28  ;;  %18435 = vmatprep.subr.msk.mxu1 %vm431_vm1, %v20399_v8 }
  0xa0   : > { %18440 = vmatpush1.msk.msra.mxu0 %vm431_vm1, %v20572_v34  ;;  %18436 = vmatpush1.msk.msra.mxu1 %vm431_vm1, %v20391_v7 }
  0xa1   : > { %3417 = vrot.lane.b32.xlu1 %v20399_v8, %s20262_s14  ;;  %3415 = vrot.lane.b32.xlu0 %v20391_v7, %s20262_s14  ;;  %v1052_v36 = vpop.permute.xlu1 %1051  ;;  %v1050_v37 = vpop.permute.xlu0 %1049 }
  0xa2   : > { %1028 = vmatprep.mubr.f32.mxu1 %v23719_v0  ;;  %18442 = vmatprep.subr.msk.mxu1 %vm431_vm1, %v20578_v35  ;;  %v20597_v39 = vsel %vm1053_vm3, %v1048_v32, %v1050_v37  ;;  %v20600_v40 = vsel %vm1053_vm3, %v1052_v36, %v1038_v30  ;;  %v20609_v42 = vsel %vm1053_vm3, %v1050_v37, %v1052_v36 }
  0xa3   : > { %18437 = vmatmul.mubr.msk.f32.vlgmr.msra.gmra.mrb[2].mxu1 %vm427_vm2, %v399_v28  ;;  %1145 = vmatprep.mubr.f32.mxu0 %v23719_v0 }
  0xa4   : > { %18443 = vmatpush1.msk.msra.mxu1 %vm431_vm1, %v20592_v38  ;;  %1216 = vmatprep.mubr.f32.mxu1 %v23719_v0 }
  0xa5   : > { %3745 = vrot.lane.b32.xlu1 %v20362_v1, %s20263_s21  ;;  %3743 = vrot.lane.b32.xlu0 %v20388_v6, %s20263_s21  ;;  %v1380_v43 = vpop.permute.xlu1 %1379  ;;  %v1378_v44 = vpop.permute.xlu0 %1377 }
  0xa6   : > { %18445 = vmatprep.subr.msk.mxu0 %vm431_vm1, %v20597_v39  ;;  %18448 = vmatprep.subr.msk.mxu1 %vm431_vm1, %v20600_v40  ;;  %v20625_v46 = vsel %vm1391_vm4, %v1378_v44, %v1380_v43 }
  0xa7   : > { %18441 = vmatmul.mubr.msk.f32.vlgmr.msra.gmra.mrb[0].mxu0 %vm427_vm2, %v18438_v41  ;;  %18444 = vmatmul.mubr.msk.f32.vlgmr.msra.gmra.mrb[0].mxu1 %vm427_vm2, %v18438_v41 }
  0xa8   : > { %18446 = vmatpush1.msk.msra.mxu0 %vm431_vm1, %v20620_v45  ;;  %18449 = vmatpush1.msk.msra.mxu1 %vm431_vm1, %v20609_v42 }
  0xa9   : > { %3747 = vrot.lane.b32.xlu1 %v20373_v3, %s20263_s21  ;;  %3741 = vrot.lane.b32.xlu0 %v20365_v2, %s20263_s21  ;;  %v1382_v47 = vpop.permute.xlu1 %1381  ;;  %v1376_v48 = vpop.permute.xlu0 %1375 }
  0xaa   : > { %18452 = vmatprep.subr.msk.mxu0 %vm431_vm1, %v20625_v46  ;;  %v20638_v49 = vsel %vm1391_vm4, %v1376_v48, %v1378_v44  ;;  %1287 = vmatprep.mubr.f32.mxu0 %v23719_v0  ;;  %v20659_v54 = vsel %vm1391_vm4, %v1380_v43, %v1382_v47  ;;  %v18477_v43 = vld [vmem:[%s23707_s1 + $0x28] sm:$0x3f] }
  0xab   : > { %18447 = vmatmul.mubr.msk.f32.vlgmr.msra.gmra.mrb[2].mxu0 %vm427_vm2, %v18438_v41  ;;  %1358 = vmatprep.mubr.f32.mxu1 %v23719_v0 }
  0xac   : > { %18453 = vmatpush1.msk.msra.mxu0 %vm431_vm1, %v20638_v49  ;;  %18450 = vmatmul.mubr.msk.f32.vlgmr.msra.gmra.mrb[2].mxu1 %vm427_vm2, %v18438_v41 }
  0xad   : > { %3751 = vrot.lane.b32.xlu1 %v20384_v5, %s20263_s21  ;;  %3749 = vrot.lane.b32.xlu0 %v20376_v4, %s20263_s21  ;;  %v1386_v51 = vpop.permute.xlu1 %1385  ;;  %v1384_v52 = vpop.permute.xlu0 %1383 }
  0xae   : > { %v20654_v53 = vsel %vm1391_vm4, %v1382_v47, %v1384_v52  ;;  %1483 = vmatprep.mubr.f32.mxu0 %v23719_v0  ;;  %1554 = vmatprep.mubr.f32.mxu1 %v23719_v0  ;;  %v20682_v60 = vsel %vm1391_vm4, %v1384_v52, %v1386_v51 }
  0xaf   : > { %18455 = vmatprep.subr.msk.mxu1 %vm431_vm1, %v20654_v53  ;;  %18454 = vmatmul.mubr.msk.f32.vlgmr.msra.gmra.mrb[0].mxu0 %vm427_vm2, %v18451_v50 }
  0xb0   : > { %18456 = vmatpush1.msk.msra.mxu1 %vm431_vm1, %v20659_v54  ;;  %1625 = vmatprep.mubr.f32.mxu0 %v23719_v0 }
  0xb1   : > { %3755 = vrot.lane.b32.xlu1 %v20399_v8, %s20263_s21  ;;  %3753 = vrot.lane.b32.xlu0 %v20391_v7, %s20263_s21  ;;  %v1390_v55 = vpop.permute.xlu1 %1389  ;;  %v1388_v56 = vpop.permute.xlu0 %1387 }
  0xb2   : > { %v20672_v57 = vsel %vm1391_vm4, %v1388_v56, %v1390_v55  ;;  %v20675_v58 = vsel %vm1391_vm4, %v1386_v51, %v1388_v56  ;;  %v20678_v59 = vsel %vm1391_vm4, %v1390_v55, %v1376_v48  ;;  %18457 = vmatmul.mubr.msk.f32.vlgmr.msra.gmra.mrb[0].mxu1 %vm427_vm2, %v18451_v50  ;;  %vm5447_vm4 = vcmask 261120  }
  0xb3   : > { %18458 = vmatprep.subr.msk.mxu0 %vm431_vm1, %v20675_v58  ;;  %18461 = vmatprep.subr.msk.mxu1 %vm431_vm1, %v20678_v59 }
  0xb4   : > { %18459 = vmatpush1.msk.msra.mxu0 %vm431_vm1, %v20682_v60  ;;  %18462 = vmatpush1.msk.msra.mxu1 %vm431_vm1, %v20672_v57 }
  0xb5   : > { %4083 = vrot.lane.b32.xlu1 %v20362_v1, %s20264_s29  ;;  %4081 = vrot.lane.b32.xlu0 %v20388_v6, %s20264_s29  ;;  %v1718_v61 = vpop.permute.xlu1 %1717  ;;  %v1716_v62 = vpop.permute.xlu0 %1715 }
  0xb6   : > { %v20695_v63 = vsel %vm1729_vm5, %v1716_v62, %v1718_v61  ;;  %18460 = vmatmul.mubr.msk.f32.vlgmr.msra.gmra.mrb[2].mxu0 %vm427_vm2, %v18451_v50  ;;  %1696 = vmatprep.mubr.f32.mxu1 %v23719_v0 }
  0xb7   : > { %18465 = vmatprep.subr.msk.mxu0 %vm431_vm1, %v20695_v63  ;;  %18463 = vmatmul.mubr.msk.f32.vlgmr.msra.gmra.mrb[2].mxu1 %vm427_vm2, %v18451_v50 }
  0xb8   : > { %1821 = vmatprep.mubr.f32.mxu0 %v23719_v0  ;;  %1892 = vmatprep.mubr.f32.mxu1 %v23719_v0 }
  0xb9   : > { %4085 = vrot.lane.b32.xlu1 %v20373_v3, %s20264_s29  ;;  %4079 = vrot.lane.b32.xlu0 %v20365_v2, %s20264_s29  ;;  %v1720_v9 = vpop.permute.xlu1 %1719  ;;  %v1714_v10 = vpop.permute.xlu0 %1713 }
  0xba   : > { %v20710_v12 = vsel %vm1729_vm5, %v1714_v10, %v1716_v62  ;;  %v20722_v20 = vsel %vm1729_vm5, %v1718_v61, %v1720_v9 }
  0xbb   : > { %18466 = vmatpush1.msk.msra.mxu0 %vm431_vm1, %v20710_v12 }
  0xbc   : > { %18467 = vmatmul.mubr.msk.f32.vlgmr.msra.gmra.mrb[0].mxu0 %vm427_vm2, %v18464_v11 }
  0xbd   : > { %4089 = vrot.lane.b32.xlu1 %v20384_v5, %s20264_s29  ;;  %4087 = vrot.lane.b32.xlu0 %v20376_v4, %s20264_s29  ;;  %v1724_v15 = vpop.permute.xlu1 %1723  ;;  %v1722_v16 = vpop.permute.xlu0 %1721 }
  0xbe   : > { %v20718_v17 = vsel %vm1729_vm5, %v1720_v9, %v1722_v16  ;;  %1963 = vmatprep.mubr.f32.mxu0 %v23719_v0  ;;  %v20741_v30 = vsel %vm1729_vm5, %v1722_v16, %v1724_v15 }
  0xbf   : > { %18468 = vmatprep.subr.msk.mxu1 %vm431_vm1, %v20718_v17 }
  0xc0   : > { %18469 = vmatpush1.msk.msra.mxu1 %vm431_vm1, %v20722_v20 }
  0xc1   : > { %4093 = vrot.lane.b32.xlu1 %v20399_v8, %s20264_s29  ;;  %4091 = vrot.lane.b32.xlu0 %v20391_v7, %s20264_s29  ;;  %v1728_v21 = vpop.permute.xlu1 %1727  ;;  %v1726_v26 = vpop.permute.xlu0 %1725  ;;  %s20277_s29 = smov 56  }
  0xc2   : > { %v20731_v27 = vsel %vm1729_vm5, %v1726_v26, %v1728_v21  ;;  %v20734_v28 = vsel %vm1729_vm5, %v1724_v15, %v1726_v26  ;;  %v20737_v29 = vsel %vm1729_vm5, %v1728_v21, %v1714_v10  ;;  %18470 = vmatmul.mubr.msk.f32.vlgmr.msra.gmra.mrb[0].mxu1 %vm427_vm2, %v18464_v11  ;;  %v18490_v26 = vld [vmem:[%s23707_s1 + $0x30] sm:$0x3f] }
  0xc3   : > { %18471 = vmatprep.subr.msk.mxu0 %vm431_vm1, %v20734_v28  ;;  %18474 = vmatprep.subr.msk.mxu1 %vm431_vm1, %v20737_v29 }
  0xc4   : > { %18472 = vmatpush1.msk.msra.mxu0 %vm431_vm1, %v20741_v30  ;;  %18475 = vmatpush1.msk.msra.mxu1 %vm431_vm1, %v20731_v27 }
  0xc5   : > { %4421 = vrot.lane.b32.xlu1 %v20362_v1, %s20265_s13  ;;  %4419 = vrot.lane.b32.xlu0 %v20388_v6, %s20265_s13  ;;  %v2056_v32 = vpop.permute.xlu1 %2055  ;;  %v2054_v33 = vpop.permute.xlu0 %2053 }
  0xc6   : > { %v2069_v36 = vsel %vm2067_vm6, %v2054_v33, %v2056_v32  ;;  %18473 = vmatmul.mubr.msk.f32.vlgmr.msra.gmra.mrb[2].mxu0 %vm427_vm2, %v18464_v11  ;;  %2034 = vmatprep.mubr.f32.mxu1 %v23719_v0 }
  0xc7   : > { %18478 = vmatprep.subr.msk.mxu0 %vm431_vm1, %v2069_v36  ;;  %18476 = vmatmul.mubr.msk.f32.vlgmr.msra.gmra.mrb[2].mxu1 %vm427_vm2, %v18464_v11 }
  0xc8   : > { %2159 = vmatprep.mubr.f32.mxu0 %v23719_v0  ;;  %2230 = vmatprep.mubr.f32.mxu1 %v23719_v0 }
  0xc9   : > { %4423 = vrot.lane.b32.xlu1 %v20373_v3, %s20265_s13  ;;  %4417 = vrot.lane.b32.xlu0 %v20365_v2, %s20265_s13  ;;  %v2058_v37 = vpop.permute.xlu1 %2057  ;;  %v2052_v41 = vpop.permute.xlu0 %2051 }
  0xca   : > { %v2068_v44 = vsel %vm2067_vm6, %v2052_v41, %v2054_v33  ;;  %v2070_v51 = vsel %vm2067_vm6, %v2056_v32, %v2058_v37 }
  0xcb   : > { %18479 = vmatpush1.msk.msra.mxu0 %vm431_vm1, %v2068_v44 }
  0xcc   : > { %18480 = vmatmul.mubr.msk.f32.vlgmr.msra.gmra.mrb[0].mxu0 %vm427_vm2, %v18477_v43 }
  0xcd   : > { %4427 = vrot.lane.b32.xlu1 %v20384_v5, %s20265_s13  ;;  %4425 = vrot.lane.b32.xlu0 %v20376_v4, %s20265_s13  ;;  %v2062_v47 = vpop.permute.xlu1 %2061  ;;  %v2060_v48 = vpop.permute.xlu0 %2059 }
  0xce   : > { %v2071_v50 = vsel %vm2067_vm6, %v2058_v37, %v2060_v48  ;;  %2301 = vmatprep.mubr.f32.mxu0 %v23719_v0  ;;  %v2072_v9 = vsel %vm2067_vm6, %v2060_v48, %v2062_v47 }
  0xcf   : > { %18481 = vmatprep.subr.msk.mxu1 %vm431_vm1, %v2071_v50 }
  0xd0   : > { %18482 = vmatpush1.msk.msra.mxu1 %vm431_vm1, %v2070_v51 }
  0xd1   : > { %4431 = vrot.lane.b32.xlu1 %v20399_v8, %s20265_s13  ;;  %4429 = vrot.lane.b32.xlu0 %v20391_v7, %s20265_s13  ;;  %v2066_v52 = vpop.permute.xlu1 %2065  ;;  %v2064_v55 = vpop.permute.xlu0 %2063 }
  0xd2   : > { %v2074_v56 = vsel %vm2067_vm6, %v2064_v55, %v2066_v52  ;;  %v2073_v61 = vsel %vm2067_vm6, %v2062_v47, %v2064_v55  ;;  %v2075_v62 = vsel %vm2067_vm6, %v2066_v52, %v2052_v41  ;;  %18483 = vmatmul.mubr.msk.f32.vlgmr.msra.gmra.mrb[0].mxu1 %vm427_vm2, %v18477_v43 }
  0xd3   : > { %18484 = vmatprep.subr.msk.mxu0 %vm431_vm1, %v2073_v61  ;;  %18487 = vmatprep.subr.msk.mxu1 %vm431_vm1, %v2075_v62 }
  0xd4   : > { %18485 = vmatpush1.msk.msra.mxu0 %vm431_vm1, %v2072_v9  ;;  %18488 = vmatpush1.msk.msra.mxu1 %vm431_vm1, %v2074_v56  ;;  %v18503_v9 = vld [vmem:[%s23707_s1 + $0x38] sm:$0x3f] }
  0xd5   : > { %4759 = vrot.lane.b32.xlu1 %v20362_v1, %s20266_s16  ;;  %4757 = vrot.lane.b32.xlu0 %v20388_v6, %s20266_s16  ;;  %v2394_v10 = vpop.permute.xlu1 %2393  ;;  %v2392_v11 = vpop.permute.xlu0 %2391 }
  0xd6   : > { %v2407_v15 = vsel %vm2405_vm7, %v2392_v11, %v2394_v10  ;;  %18486 = vmatmul.mubr.msk.f32.vlgmr.msra.gmra.mrb[2].mxu0 %vm427_vm2, %v18477_v43  ;;  %2372 = vmatprep.mubr.f32.mxu1 %v23719_v0 }
  0xd7   : > { %18491 = vmatprep.subr.msk.mxu0 %vm431_vm1, %v2407_v15  ;;  %18489 = vmatmul.mubr.msk.f32.vlgmr.msra.gmra.mrb[2].mxu1 %vm427_vm2, %v18477_v43 }
  0xd8   : > { %2497 = vmatprep.mubr.f32.mxu0 %v23719_v0  ;;  %2568 = vmatprep.mubr.f32.mxu1 %v23719_v0 }
  0xd9   : > { %4761 = vrot.lane.b32.xlu1 %v20373_v3, %s20266_s16  ;;  %4755 = vrot.lane.b32.xlu0 %v20365_v2, %s20266_s16  ;;  %v2396_v16 = vpop.permute.xlu1 %2395  ;;  %v2390_v21 = vpop.permute.xlu0 %2389 }
  0xda   : > { %v2406_v32 = vsel %vm2405_vm7, %v2390_v21, %v2392_v11  ;;  %v2408_v41 = vsel %vm2405_vm7, %v2394_v10, %v2396_v16 }
  0xdb   : > { %18492 = vmatpush1.msk.msra.mxu0 %vm431_vm1, %v2406_v32 }
  0xdc   : > { %18493 = vmatmul.mubr.msk.f32.vlgmr.msra.gmra.mrb[0].mxu0 %vm427_vm2, %v18490_v26 }
  0xdd   : > { %4765 = vrot.lane.b32.xlu1 %v20384_v5, %s20266_s16  ;;  %4763 = vrot.lane.b32.xlu0 %v20376_v4, %s20266_s16  ;;  %v2400_v33 = vpop.permute.xlu1 %2399  ;;  %v2398_v36 = vpop.permute.xlu0 %2397 }
  0xde   : > { %v2409_v37 = vsel %vm2405_vm7, %v2396_v16, %v2398_v36  ;;  %2639 = vmatprep.mubr.f32.mxu0 %v23719_v0  ;;  %v2410_v51 = vsel %vm2405_vm7, %v2398_v36, %v2400_v33 }
  0xdf   : > { %18494 = vmatprep.subr.msk.mxu1 %vm431_vm1, %v2409_v37 }
  0xe0   : > { %18495 = vmatpush1.msk.msra.mxu1 %vm431_vm1, %v2408_v41 }
  0xe1   : > { %4769 = vrot.lane.b32.xlu1 %v20399_v8, %s20266_s16  ;;  %4767 = vrot.lane.b32.xlu0 %v20391_v7, %s20266_s16  ;;  %v2404_v43 = vpop.permute.xlu1 %2403  ;;  %v2402_v44 = vpop.permute.xlu0 %2401  ;;  %s20275_s16 = smov 120  }
  0xe2   : > { %v2412_v47 = vsel %vm2405_vm7, %v2402_v44, %v2404_v43  ;;  %v2411_v48 = vsel %vm2405_vm7, %v2400_v33, %v2402_v44  ;;  %v2413_v50 = vsel %vm2405_vm7, %v2404_v43, %v2390_v21  ;;  %18496 = vmatmul.mubr.msk.f32.vlgmr.msra.gmra.mrb[0].mxu1 %vm427_vm2, %v18490_v26  ;;  %vm5785_vm7 = vcmask 252928  }
  0xe3   : > { %18497 = vmatprep.subr.msk.mxu0 %vm431_vm1, %v2411_v48  ;;  %18500 = vmatprep.subr.msk.mxu1 %vm431_vm1, %v2413_v50 }
  0xe4   : > { %18498 = vmatpush1.msk.msra.mxu0 %vm431_vm1, %v2410_v51  ;;  %18501 = vmatpush1.msk.msra.mxu1 %vm431_vm1, %v2412_v47  ;;  %v18516_v51 = vld [vmem:[%s23707_s1 + $0x40] sm:$0x3f] }
  0xe5   : > { %5097 = vrot.lane.b32.xlu1 %v20362_v1, %s20267_s25  ;;  %5095 = vrot.lane.b32.xlu0 %v20388_v6, %s20267_s25  ;;  %v2732_v52 = vpop.permute.xlu1 %2731  ;;  %v2730_v55 = vpop.permute.xlu0 %2729 }
  0xe6   : > { %v2745_v56 = vsel %vm2743_vm8, %v2730_v55, %v2732_v52  ;;  %18499 = vmatmul.mubr.msk.f32.vlgmr.msra.gmra.mrb[2].mxu0 %vm427_vm2, %v18490_v26  ;;  %2710 = vmatprep.mubr.f32.mxu1 %v23719_v0 }
  0xe7   : > { %18504 = vmatprep.subr.msk.mxu0 %vm431_vm1, %v2745_v56  ;;  %18502 = vmatmul.mubr.msk.f32.vlgmr.msra.gmra.mrb[2].mxu1 %vm427_vm2, %v18490_v26 }
  0xe8   : > { %2835 = vmatprep.mubr.f32.mxu0 %v23719_v0  ;;  %2906 = vmatprep.mubr.f32.mxu1 %v23719_v0 }
  0xe9   : > { %5099 = vrot.lane.b32.xlu1 %v20373_v3, %s20267_s25  ;;  %5093 = vrot.lane.b32.xlu0 %v20365_v2, %s20267_s25  ;;  %v2734_v61 = vpop.permute.xlu1 %2733  ;;  %v2728_v62 = vpop.permute.xlu0 %2727 }
  0xea   : > { %v2744_v10 = vsel %vm2743_vm8, %v2728_v62, %v2730_v55  ;;  %v2746_v21 = vsel %vm2743_vm8, %v2732_v52, %v2734_v61 }
  0xeb   : > { %18505 = vmatpush1.msk.msra.mxu0 %vm431_vm1, %v2744_v10 }
  0xec   : > { %18506 = vmatmul.mubr.msk.f32.vlgmr.msra.gmra.mrb[0].mxu0 %vm427_vm2, %v18503_v9 }
  0xed   : > { %5103 = vrot.lane.b32.xlu1 %v20384_v5, %s20267_s25  ;;  %5101 = vrot.lane.b32.xlu0 %v20376_v4, %s20267_s25  ;;  %v2738_v11 = vpop.permute.xlu1 %2737  ;;  %v2736_v15 = vpop.permute.xlu0 %2735 }
  0xee   : > { %v2747_v16 = vsel %vm2743_vm8, %v2734_v61, %v2736_v15  ;;  %2977 = vmatprep.mubr.f32.mxu0 %v23719_v0  ;;  %v2748_v41 = vsel %vm2743_vm8, %v2736_v15, %v2738_v11 }
  0xef   : > { %18507 = vmatprep.subr.msk.mxu1 %vm431_vm1, %v2747_v16 }
  0xf0   : > { %18508 = vmatpush1.msk.msra.mxu1 %vm431_vm1, %v2746_v21 }
  0xf1   : > { %5107 = vrot.lane.b32.xlu1 %v20399_v8, %s20267_s25  ;;  %5105 = vrot.lane.b32.xlu0 %v20391_v7, %s20267_s25  ;;  %v2742_v26 = vpop.permute.xlu1 %2741  ;;  %v2740_v32 = vpop.permute.xlu0 %2739 }
  0xf2   : > { %v2750_v33 = vsel %vm2743_vm8, %v2740_v32, %v2742_v26  ;;  %v2749_v36 = vsel %vm2743_vm8, %v2738_v11, %v2740_v32  ;;  %v2751_v37 = vsel %vm2743_vm8, %v2742_v26, %v2728_v62  ;;  %18509 = vmatmul.mubr.msk.f32.vlgmr.msra.gmra.mrb[0].mxu1 %vm427_vm2, %v18503_v9  ;;  %vm6123_vm8 = vcmask 244736  }
  0xf3   : > { %18510 = vmatprep.subr.msk.mxu0 %vm431_vm1, %v2749_v36  ;;  %18513 = vmatprep.subr.msk.mxu1 %vm431_vm1, %v2751_v37 }
  0xf4   : > { %18511 = vmatpush1.msk.msra.mxu0 %vm431_vm1, %v2748_v41  ;;  %18514 = vmatpush1.msk.msra.mxu1 %vm431_vm1, %v2750_v33 }
  0xf5   : > { %5435 = vrot.lane.b32.xlu1 %v20362_v1, %s20268_s30  ;;  %5433 = vrot.lane.b32.xlu0 %v20388_v6, %s20268_s30  ;;  %v3070_v43 = vpop.permute.xlu1 %3069  ;;  %v3068_v44 = vpop.permute.xlu0 %3067 }
  0xf6   : > { %v3083_v47 = vsel %vm3081_vm9, %v3068_v44, %v3070_v43  ;;  %18512 = vmatmul.mubr.msk.f32.vlgmr.msra.gmra.mrb[2].mxu0 %vm427_vm2, %v18503_v9  ;;  %3048 = vmatprep.mubr.f32.mxu1 %v23719_v0 }
  0xf7   : > { %18517 = vmatprep.subr.msk.mxu0 %vm431_vm1, %v3083_v47  ;;  %18515 = vmatmul.mubr.msk.f32.vlgmr.msra.gmra.mrb[2].mxu1 %vm427_vm2, %v18503_v9 }
  0xf8   : > { %3173 = vmatprep.mubr.f32.mxu0 %v23719_v0  ;;  %3244 = vmatprep.mubr.f32.mxu1 %v23719_v0 }
  0xf9   : > { %5437 = vrot.lane.b32.xlu1 %v20373_v3, %s20268_s30  ;;  %5431 = vrot.lane.b32.xlu0 %v20365_v2, %s20268_s30  ;;  %v3072_v48 = vpop.permute.xlu1 %3071  ;;  %v3066_v50 = vpop.permute.xlu0 %3065 }
  0xfa   : > { %v3082_v52 = vsel %vm3081_vm9, %v3066_v50, %v3068_v44  ;;  %v3084_v62 = vsel %vm3081_vm9, %v3070_v43, %v3072_v48  ;;  %v18529_v43 = vld [vmem:[%s23707_s1 + $0x48] sm:$0x3f] }
  0xfb   : > { %18518 = vmatpush1.msk.msra.mxu0 %vm431_vm1, %v3082_v52 }
  0xfc   : > { %18519 = vmatmul.mubr.msk.f32.vlgmr.msra.gmra.mrb[0].mxu0 %vm427_vm2, %v18516_v51 }
  0xfd   : > { %5441 = vrot.lane.b32.xlu1 %v20384_v5, %s20268_s30  ;;  %5439 = vrot.lane.b32.xlu0 %v20376_v4, %s20268_s30  ;;  %v3076_v55 = vpop.permute.xlu1 %3075 }
  0xfe   : > { %v3074_v56 = vpop.permute.xlu0 %3073  ;;  %3315 = vmatprep.mubr.f32.mxu0 %v23719_v0 }
  0xff   : > { %v3085_v61 = vsel %vm3081_vm9, %v3072_v48, %v3074_v56  ;;  %v3086_v21 = vsel %vm3081_vm9, %v3074_v56, %v3076_v55 }
 0x100   : > { %18520 = vmatprep.subr.msk.mxu1 %vm431_vm1, %v3085_v61 }
 0x101   : > { %5445 = vrot.lane.b32.xlu1 %v20399_v8, %s20268_s30  ;;  %5443 = vrot.lane.b32.xlu0 %v20391_v7, %s20268_s30  ;;  %v3080_v9 = vpop.permute.xlu1 %3079  ;;  %s20271_s30 = smov 29  }
 0x102   : > { %18521 = vmatpush1.msk.msra.mxu1 %vm431_vm1, %v3084_v62  ;;  %v3078_v10 = vpop.permute.xlu0 %3077  ;;  %v3089_v11 = vsel %vm3081_vm9, %v3080_v9, %v3066_v50 }
 0x103   : > { %v3088_v15 = vsel %vm3081_vm9, %v3078_v10, %v3080_v9  ;;  %v3087_v16 = vsel %vm3081_vm9, %v3076_v55, %v3078_v10  ;;  %18526 = vmatprep.subr.msk.mxu1 %vm431_vm1, %v3089_v11  ;;  %18522 = vmatmul.mubr.msk.f32.vlgmr.msra.gmra.mrb[0].mxu1 %vm427_vm2, %v18516_v51  ;;  %vm6461_vm9 = vcmask 236544  }
 0x104   : > { %18523 = vmatprep.subr.msk.mxu0 %vm431_vm1, %v3087_v16  ;;  %18527 = vmatpush1.msk.msra.mxu1 %vm431_vm1, %v3088_v15 }
 0x105   : > { %5773 = vrot.lane.b32.xlu1 %v20362_v1, %s20269_s15  ;;  %5771 = vrot.lane.b32.xlu0 %v20388_v6, %s20269_s15  ;;  %v3408_v26 = vpop.permute.xlu1 %3407 }
 0x106   : > { %18524 = vmatpush1.msk.msra.mxu0 %vm431_vm1, %v3086_v21  ;;  %v3406_v32 = vpop.permute.xlu0 %3405  ;;  %3386 = vmatprep.mubr.f32.mxu1 %v23719_v0 }
 0x107   : > { %v3421_v33 = vsel %vm3419_vm10, %v3406_v32, %v3408_v26  ;;  %18525 = vmatmul.mubr.msk.f32.vlgmr.msra.gmra.mrb[2].mxu0 %vm427_vm2, %v18516_v51  ;;  %18528 = vmatmul.mubr.msk.f32.vlgmr.msra.gmra.mrb[2].mxu1 %vm427_vm2, %v18516_v51 }
 0x108   : > { %18530 = vmatprep.subr.msk.mxu0 %vm431_vm1, %v3421_v33  ;;  %3511 = vmatprep.mubr.f32.mxu0 %v23719_v0 }
 0x109   : > { %5775 = vrot.lane.b32.xlu1 %v20373_v3, %s20269_s15  ;;  %5769 = vrot.lane.b32.xlu0 %v20365_v2, %s20269_s15  ;;  %v3410_v36 = vpop.permute.xlu1 %3409 }
 0x10a   : > { %v3404_v37 = vpop.permute.xlu0 %3403  ;;  %3582 = vmatprep.mubr.f32.mxu1 %v23719_v0  ;;  %v3422_v50 = vsel %vm3419_vm10, %v3408_v26, %v3410_v36  ;;  %v18542_v26 = vld [vmem:[%s23707_s1 + $0x50] sm:$0x3f] }
 0x10b   : > { %v3420_v41 = vsel %vm3419_vm10, %v3404_v37, %v3406_v32 }
 0x10c   : > { %18531 = vmatpush1.msk.msra.mxu0 %vm431_vm1, %v3420_v41 }
 0x10d   : > { %5779 = vrot.lane.b32.xlu1 %v20384_v5, %s20269_s15  ;;  %5777 = vrot.lane.b32.xlu0 %v20376_v4, %s20269_s15  ;;  %v3414_v44 = vpop.permute.xlu1 %3413 }
 0x10e   : > { %v3412_v47 = vpop.permute.xlu0 %3411  ;;  %18532 = vmatmul.mubr.msk.f32.vlgmr.msra.gmra.mrb[0].mxu0 %vm427_vm2, %v18529_v43 }
 0x10f   : > { %v3423_v48 = vsel %vm3419_vm10, %v3410_v36, %v3412_v47  ;;  %3653 = vmatprep.mubr.f32.mxu0 %v23719_v0  ;;  %v3424_v62 = vsel %vm3419_vm10, %v3412_v47, %v3414_v44 }
 0x110   : > { %18533 = vmatprep.subr.msk.mxu1 %vm431_vm1, %v3423_v48 }
 0x111   : > { %5783 = vrot.lane.b32.xlu1 %v20399_v8, %s20269_s15  ;;  %5781 = vrot.lane.b32.xlu0 %v20391_v7, %s20269_s15  ;;  %s20272_s15 = smov 28  }
 0x112   : > { %18534 = vmatpush1.msk.msra.mxu1 %vm431_vm1, %v3422_v50 }
 0x113   : > { %v3418_v51 = vpop.permute.xlu1 %3417  ;;  %v3416_v52 = vpop.permute.xlu0 %3415  ;;  %18535 = vmatmul.mubr.msk.f32.vlgmr.msra.gmra.mrb[0].mxu1 %vm427_vm2, %v18529_v43 }
 0x114   : > { %v3426_v55 = vsel %vm3419_vm10, %v3416_v52, %v3418_v51  ;;  %v3425_v56 = vsel %vm3419_vm10, %v3414_v44, %v3416_v52  ;;  %v3427_v61 = vsel %vm3419_vm10, %v3418_v51, %v3404_v37  ;;  %3724 = vmatprep.mubr.f32.mxu1 %v23719_v0  ;;  %vm6799_vm10 = vcmask 228352  }
 0x115   : > { %6111 = vrot.lane.b32.xlu1 %v20362_v1, %s20270_s20  ;;  %6109 = vrot.lane.b32.xlu0 %v20388_v6, %s20270_s20 }
 0x116   : > { %18536 = vmatprep.subr.msk.mxu0 %vm431_vm1, %v3425_v56  ;;  %18539 = vmatprep.subr.msk.mxu1 %vm431_vm1, %v3427_v61  ;;  %v18555_v56 = vld [vmem:[%s23707_s1 + $0x58] sm:$0x3f]  ;;  %v21010_v61 = vld [vmem:[%s20357_s22 + $0x10] sm:$0x77] }
 0x117   : > { %18537 = vmatpush1.msk.msra.mxu0 %vm431_vm1, %v3424_v62  ;;  %18540 = vmatpush1.msk.msra.mxu1 %vm431_vm1, %v3426_v55  ;;  %v3746_v9 = vpop.permute.xlu1 %3745  ;;  %v3744_v10 = vpop.permute.xlu0 %3743 }
 0x118   : > { %v3759_v11 = vsel %vm3757_vm11, %v3744_v10, %v3746_v9  ;;  %18538 = vmatmul.mubr.msk.f32.vlgmr.msra.gmra.mrb[2].mxu0 %vm427_vm2, %v18529_v43  ;;  %18541 = vmatmul.mubr.msk.f32.vlgmr.msra.gmra.mrb[2].mxu1 %vm427_vm2, %v18529_v43 }
 0x119   : > { %6113 = vrot.lane.b32.xlu1 %v20373_v3, %s20270_s20  ;;  %6107 = vrot.lane.b32.xlu0 %v20365_v2, %s20270_s20 }
 0x11a   : > { %18543 = vmatprep.subr.msk.mxu0 %vm431_vm1, %v3759_v11  ;;  %3849 = vmatprep.mubr.f32.mxu0 %v23719_v0  ;;  %v21021_v11 = vld [vmem:[%s20357_s22 + $0x18] sm:$0x77] }
 0x11b   : > { %v3748_v15 = vpop.permute.xlu1 %3747  ;;  %v3742_v16 = vpop.permute.xlu0 %3741  ;;  %3920 = vmatprep.mubr.f32.mxu1 %v23719_v0 }
 0x11c   : > { %v3758_v21 = vsel %vm3757_vm11, %v3742_v16, %v3744_v10  ;;  %v3760_v36 = vsel %vm3757_vm11, %v3746_v9, %v3748_v15 }
 0x11d   : > { %6117 = vrot.lane.b32.xlu1 %v20384_v5, %s20270_s20  ;;  %6115 = vrot.lane.b32.xlu0 %v20376_v4, %s20270_s20 }
 0x11e   : > { %18544 = vmatpush1.msk.msra.mxu0 %vm431_vm1, %v3758_v21 }
 0x11f   : > { %v3752_v2 = vpop.permute.xlu1 %3751  ;;  %v3750_v32 = vpop.permute.xlu0 %3749  ;;  %18545 = vmatmul.mubr.msk.f32.vlgmr.msra.gmra.mrb[0].mxu0 %vm427_vm2, %v18542_v26 }
 0x120   : > { %v3761_v33 = vsel %vm3757_vm11, %v3748_v15, %v3750_v32  ;;  %3991 = vmatprep.mubr.f32.mxu0 %v23719_v0 }
 0x121   : > { %6121 = vrot.lane.b32.xlu1 %v20399_v8, %s20270_s20  ;;  %6119 = vrot.lane.b32.xlu0 %v20391_v7, %s20270_s20  ;;  %v3762_v7 = vsel %vm3757_vm11, %v3750_v32, %v3752_v2 }
 0x122   : > { %18546 = vmatprep.subr.msk.mxu1 %vm431_vm1, %v3761_v33  ;;  %v21033_v33 = vld [vmem:[%s20357_s22 + $0x8] sm:$0x77] }
 0x123   : > { %18547 = vmatpush1.msk.msra.mxu1 %vm431_vm1, %v3760_v36  ;;  %v3756_v4 = vpop.permute.xlu1 %3755  ;;  %v3754_v37 = vpop.permute.xlu0 %3753 }
 0x124   : > { %v3764_v41 = vsel %vm3757_vm11, %v3754_v37, %v3756_v4  ;;  %v3763_v43 = vsel %vm3757_vm11, %v3752_v2, %v3754_v37  ;;  %v3765_v44 = vsel %vm3757_vm11, %v3756_v4, %v3742_v16  ;;  %18548 = vmatmul.mubr.msk.f32.vlgmr.msra.gmra.mrb[0].mxu1 %vm427_vm2, %v18542_v26 }
 0x125   : > { %6449 = vrot.lane.b32.xlu1 %v20362_v1, %s20271_s30  ;;  %6447 = vrot.lane.b32.xlu0 %v20388_v6, %s20271_s30  ;;  %v20995_v1 = vld [vmem:[%s20357_s22] sm:$0x77]  ;;  %s20274_s22 = smov 122  }
 0x126   : > { %18549 = vmatprep.subr.msk.mxu0 %vm431_vm1, %v3763_v43  ;;  %18552 = vmatprep.subr.msk.mxu1 %vm431_vm1, %v3765_v44 }
 0x127   : > { %18550 = vmatpush1.msk.msra.mxu0 %vm431_vm1, %v3762_v7  ;;  %18553 = vmatpush1.msk.msra.mxu1 %vm431_vm1, %v3764_v41  ;;  %v4084_v47 = vpop.permute.xlu1 %4083  ;;  %v4082_v48 = vpop.permute.xlu0 %4081 }
 0x128   : > { %v4097_v50 = vsel %vm4095_vm12, %v4082_v48, %v4084_v47  ;;  %18551 = vmatmul.mubr.msk.f32.vlgmr.msra.gmra.mrb[2].mxu0 %vm427_vm2, %v18542_v26  ;;  %4062 = vmatprep.mubr.f32.mxu1 %v23719_v0 }
 0x129   : > { %6451 = vrot.lane.b32.xlu1 %v20373_v3, %s20271_s30  ;;  %6445 = vrot.lane.b32.xlu0 %v20995_v1, %s20271_s30 }
 0x12a   : > { %18556 = vmatprep.subr.msk.mxu0 %vm431_vm1, %v4097_v50  ;;  %18554 = vmatmul.mubr.msk.f32.vlgmr.msra.gmra.mrb[2].mxu1 %vm427_vm2, %v18542_v26 }
 0x12b   : > { %v4086_v51 = vpop.permute.xlu1 %4085  ;;  %v4080_v52 = vpop.permute.xlu0 %4079  ;;  %4187 = vmatprep.mubr.f32.mxu0 %v23719_v0  ;;  %4258 = vmatprep.mubr.f32.mxu1 %v23719_v0 }
 0x12c   : > { %v4096_v55 = vsel %vm4095_vm12, %v4080_v52, %v4082_v48  ;;  %v4098_v15 = vsel %vm4095_vm12, %v4084_v47, %v4086_v51  ;;  %v18568_v47 = vld [vmem:[%s23707_s1 + $0x60] sm:$0x3f] }
 0x12d   : > { %6455 = vrot.lane.b32.xlu1 %v20384_v5, %s20271_s30  ;;  %6453 = vrot.lane.b32.xlu0 %v21010_v61, %s20271_s30 }
 0x12e   : > { %18557 = vmatpush1.msk.msra.mxu0 %vm431_vm1, %v4096_v55 }
 0x12f   : > { %v4090_v62 = vpop.permute.xlu1 %4089  ;;  %v4088_v9 = vpop.permute.xlu0 %4087  ;;  %18558 = vmatmul.mubr.msk.f32.vlgmr.msra.gmra.mrb[0].mxu0 %vm427_vm2, %v18555_v56 }
 0x130   : > { %v4099_v10 = vsel %vm4095_vm12, %v4086_v51, %v4088_v9  ;;  %4329 = vmatprep.mubr.f32.mxu0 %v23719_v0  ;;  %v4100_v36 = vsel %vm4095_vm12, %v4088_v9, %v4090_v62 }
 0x131   : > { %6459 = vrot.lane.b32.xlu1 %v20399_v8, %s20271_s30  ;;  %6457 = vrot.lane.b32.xlu0 %v21021_v11, %s20271_s30 }
 0x132   : > { %18559 = vmatprep.subr.msk.mxu1 %vm431_vm1, %v4099_v10 }
 0x133   : > { %18560 = vmatpush1.msk.msra.mxu1 %vm431_vm1, %v4098_v15  ;;  %v4094_v16 = vpop.permute.xlu1 %4093  ;;  %v4092_v21 = vpop.permute.xlu0 %4091 }
 0x134   : > { %v4102_v26 = vsel %vm4095_vm12, %v4092_v21, %v4094_v16  ;;  %v4101_v2 = vsel %vm4095_vm12, %v4090_v62, %v4092_v21  ;;  %v4103_v32 = vsel %vm4095_vm12, %v4094_v16, %v4080_v52  ;;  %18561 = vmatmul.mubr.msk.f32.vlgmr.msra.gmra.mrb[0].mxu1 %vm427_vm2, %v18555_v56  ;;  %vm12027_vm12 = vcmask 457728  }
 0x135   : > { %6787 = vrot.lane.b32.xlu1 %v21033_v33, %s20272_s15  ;;  %6785 = vrot.lane.b32.xlu0 %v20388_v6, %s20272_s15 }
 0x136   : > { %18562 = vmatprep.subr.msk.mxu0 %vm431_vm1, %v4101_v2  ;;  %18565 = vmatprep.subr.msk.mxu1 %vm431_vm1, %v4103_v32 }
 0x137   : > { %18563 = vmatpush1.msk.msra.mxu0 %vm431_vm1, %v4100_v36  ;;  %18566 = vmatpush1.msk.msra.mxu1 %vm431_vm1, %v4102_v26  ;;  %v4422_v4 = vpop.permute.xlu1 %4421  ;;  %v4420_v37 = vpop.permute.xlu0 %4419  ;;  %v18581_v36 = vld [vmem:[%s23707_s1 + $0x68] sm:$0x3f] }
 0x138   : > { %v4435_v41 = vsel %vm4433_vm13, %v4420_v37, %v4422_v4  ;;  %18564 = vmatmul.mubr.msk.f32.vlgmr.msra.gmra.mrb[2].mxu0 %vm427_vm2, %v18555_v56  ;;  %4400 = vmatprep.mubr.f32.mxu1 %v23719_v0 }
 0x139   : > { %6789 = vrot.lane.b32.xlu1 %v20373_v3, %s20272_s15  ;;  %6783 = vrot.lane.b32.xlu0 %v20995_v1, %s20272_s15 }
 0x13a   : > { %18569 = vmatprep.subr.msk.mxu0 %vm431_vm1, %v4435_v41  ;;  %18567 = vmatmul.mubr.msk.f32.vlgmr.msra.gmra.mrb[2].mxu1 %vm427_vm2, %v18555_v56 }
 0x13b   : > { %v4424_v43 = vpop.permute.xlu1 %4423  ;;  %v4418_v44 = vpop.permute.xlu0 %4417  ;;  %4525 = vmatprep.mubr.f32.mxu0 %v23719_v0  ;;  %4596 = vmatprep.mubr.f32.mxu1 %v23719_v0 }
 0x13c   : > { %v4434_v7 = vsel %vm4433_vm13, %v4418_v44, %v4420_v37  ;;  %v4436_v52 = vsel %vm4433_vm13, %v4422_v4, %v4424_v43 }
 0x13d   : > { %6793 = vrot.lane.b32.xlu1 %v20384_v5, %s20272_s15  ;;  %6791 = vrot.lane.b32.xlu0 %v21010_v61, %s20272_s15 }
 0x13e   : > { %18570 = vmatpush1.msk.msra.mxu0 %vm431_vm1, %v4434_v7 }
 0x13f   : > { %v4428_v48 = vpop.permute.xlu1 %4427  ;;  %v4426_v50 = vpop.permute.xlu0 %4425  ;;  %18571 = vmatmul.mubr.msk.f32.vlgmr.msra.gmra.mrb[0].mxu0 %vm427_vm2, %v18568_v47 }
 0x140   : > { %v4437_v51 = vsel %vm4433_vm13, %v4424_v43, %v4426_v50  ;;  %4667 = vmatprep.mubr.f32.mxu0 %v23719_v0  ;;  %v4438_v15 = vsel %vm4433_vm13, %v4426_v50, %v4428_v48 }
 0x141   : > { %6797 = vrot.lane.b32.xlu1 %v20399_v8, %s20272_s15  ;;  %6795 = vrot.lane.b32.xlu0 %v21021_v11, %s20272_s15  ;;  %s20281_s15 = smov 112  }
 0x142   : > { %18572 = vmatprep.subr.msk.mxu1 %vm431_vm1, %v4437_v51 }
 0x143   : > { %18573 = vmatpush1.msk.msra.mxu1 %vm431_vm1, %v4436_v52  ;;  %v4432_v55 = vpop.permute.xlu1 %4431  ;;  %v4430_v56 = vpop.permute.xlu0 %4429 }
 0x144   : > { %v4440_v62 = vsel %vm4433_vm13, %v4430_v56, %v4432_v55  ;;  %v4439_v9 = vsel %vm4433_vm13, %v4428_v48, %v4430_v56  ;;  %v4441_v10 = vsel %vm4433_vm13, %v4432_v55, %v4418_v44  ;;  %18574 = vmatmul.mubr.msk.f32.vlgmr.msra.gmra.mrb[0].mxu1 %vm427_vm2, %v18568_v47 }
 0x145   : > { %18575 = vmatprep.subr.msk.mxu0 %vm431_vm1, %v4439_v9  ;;  %18578 = vmatprep.subr.msk.mxu1 %vm431_vm1, %v4441_v10 }
 0x146   : > { %18576 = vmatpush1.msk.msra.mxu0 %vm431_vm1, %v4438_v15  ;;  %18579 = vmatpush1.msk.msra.mxu1 %vm431_vm1, %v4440_v62  ;;  %v18594_v15 = vld [vmem:[%s23707_s1 + $0x70] sm:$0x3f] }
 0x147   : > { %v4760_v16 = vpop.permute.xlu1 %4759  ;;  %v4758_v21 = vpop.permute.xlu0 %4757  ;;  %18577 = vmatmul.mubr.msk.f32.vlgmr.msra.gmra.mrb[2].mxu0 %vm427_vm2, %v18568_v47  ;;  %4738 = vmatprep.mubr.f32.mxu1 %v23719_v0 }
 0x148   : > { %v4773_v26 = vsel %vm4771_vm14, %v4758_v21, %v4760_v16  ;;  %18580 = vmatmul.mubr.msk.f32.vlgmr.msra.gmra.mrb[2].mxu1 %vm427_vm2, %v18568_v47  ;;  %4863 = vmatprep.mubr.f32.mxu0 %v23719_v0 }
 0x149   : > { %18582 = vmatprep.subr.msk.mxu0 %vm431_vm1, %v4773_v26  ;;  %4934 = vmatprep.mubr.f32.mxu1 %v23719_v0 }
 0x14b   : > { %v4762_v2 = vpop.permute.xlu1 %4761  ;;  %v4756_v32 = vpop.permute.xlu0 %4755 }
 0x14c   : > { %v4772_v4 = vsel %vm4771_vm14, %v4756_v32, %v4758_v21  ;;  %v4774_v44 = vsel %vm4771_vm14, %v4760_v16, %v4762_v2 }
 0x14d   : > { %18583 = vmatpush1.msk.msra.mxu0 %vm431_vm1, %v4772_v4  ;;  %v20273_v4 = vmov 0  }
 0x14e   : > { %18584 = vmatmul.mubr.msk.f32.vlgmr.msra.gmra.mrb[0].mxu0 %vm427_vm2, %v18581_v36  ;;  %20040 = vset.pattern.permute.xlu0 %v20273_v4 }
 0x14f   : > { %v4766_v37 = vpop.permute.xlu1 %4765  ;;  %v4764_v41 = vpop.permute.xlu0 %4763  ;;  %5005 = vmatprep.mubr.f32.mxu0 %v23719_v0  ;;  %20041 = vset.pattern.permute.xlu1 %v20273_v4 }
 0x150   : > { %v4775_v43 = vsel %vm4771_vm14, %v4762_v2, %v4764_v41  ;;  %v4776_v52 = vsel %vm4771_vm14, %v4764_v41, %v4766_v37 }
 0x151   : > { %18585 = vmatprep.subr.msk.mxu1 %vm431_vm1, %v4775_v43 }
 0x152   : > { %18586 = vmatpush1.msk.msra.mxu1 %vm431_vm1, %v4774_v44 }
 0x153   : > { %v4770_v7 = vpop.permute.xlu1 %4769  ;;  %v4768_v47 = vpop.permute.xlu0 %4767  ;;  %18587 = vmatmul.mubr.msk.f32.vlgmr.msra.gmra.mrb[0].mxu1 %vm427_vm2, %v18581_v36 }
 0x154   : > { %v4778_v48 = vsel %vm4771_vm14, %v4768_v47, %v4770_v7  ;;  %v4777_v50 = vsel %vm4771_vm14, %v4766_v37, %v4768_v47  ;;  %v4779_v51 = vsel %vm4771_vm14, %v4770_v7, %v4756_v32  ;;  %5076 = vmatprep.mubr.f32.mxu1 %v23719_v0  ;;  %v8604_v32 = vld [vmem:[%s23708_s2] sm:$0x3f]  ;;  %vm18266_vm14 = vcmask 1043456  }
 0x155   : > { %18588 = vmatprep.subr.msk.mxu0 %vm431_vm1, %v4777_v50  ;;  %18591 = vmatprep.subr.msk.mxu1 %vm431_vm1, %v4779_v51 }
 0x156   : > { %18589 = vmatpush1.msk.msra.mxu0 %vm431_vm1, %v4776_v52  ;;  %18592 = vmatpush1.msk.msra.mxu1 %vm431_vm1, %v4778_v48 }
 0x157   : > { %v5098_v55 = vpop.permute.xlu1 %5097  ;;  %v5096_v56 = vpop.permute.xlu0 %5095  ;;  %18590 = vmatmul.mubr.msk.f32.vlgmr.msra.gmra.mrb[2].mxu0 %vm427_vm2, %v18581_v36  ;;  %18593 = vmatmul.mubr.msk.f32.vlgmr.msra.gmra.mrb[2].mxu1 %vm427_vm2, %v18581_v36 }
 0x158   : > { %v5111_v62 = vsel %vm5109_vm15, %v5096_v56, %v5098_v55  ;;  %5201 = vmatprep.mubr.f32.mxu0 %v23719_v0  ;;  %5272 = vmatprep.mubr.f32.mxu1 %v23719_v0 }
 0x159   : > { %18595 = vmatprep.subr.msk.mxu0 %vm431_vm1, %v5111_v62  ;;  %8607 = vperm.xlu0 %20040, %v8604_v32  }
 0x15b   : > { %v5100_v9 = vpop.permute.xlu1 %5099  ;;  %v5094_v10 = vpop.permute.xlu0 %5093 }
 0x15c   : > { %v5110_v16 = vsel %vm5109_vm15, %v5094_v10, %v5096_v56  ;;  %v5112_v36 = vsel %vm5109_vm15, %v5098_v55, %v5100_v9  ;;  %v18607_v56 = vld [vmem:[%s23707_s1 + $0x78] sm:$0x3f] }
 0x15d   : > { %18596 = vmatpush1.msk.msra.mxu0 %vm431_vm1, %v5110_v16 }
 0x15e   : > { %18597 = vmatmul.mubr.msk.f32.vlgmr.msra.gmra.mrb[0].mxu0 %vm427_vm2, %v18594_v15 }
 0x15f   : > { %v5104_v21 = vpop.permute.xlu1 %5103  ;;  %v5102_v26 = vpop.permute.xlu0 %5101  ;;  %5343 = vmatprep.mubr.f32.mxu0 %v23719_v0 }
 0x160   : > { %v5113_v2 = vsel %vm5109_vm15, %v5100_v9, %v5102_v26  ;;  %v5114_v47 = vsel %vm5109_vm15, %v5102_v26, %v5104_v21 }
 0x161   : > { %18598 = vmatprep.subr.msk.mxu1 %vm431_vm1, %v5113_v2 }
 0x162   : > { %18599 = vmatpush1.msk.msra.mxu1 %vm431_vm1, %v5112_v36 }
 0x163   : > { %v5108_v37 = vpop.permute.xlu1 %5107  ;;  %v5106_v41 = vpop.permute.xlu0 %5105  ;;  %18600 = vmatmul.mubr.msk.f32.vlgmr.msra.gmra.mrb[0].mxu1 %vm427_vm2, %v18594_v15 }
 0x164   : > { %v5116_v43 = vsel %vm5109_vm15, %v5106_v41, %v5108_v37  ;;  %v5115_v44 = vsel %vm5109_vm15, %v5104_v21, %v5106_v41  ;;  %v5117_v7 = vsel %vm5109_vm15, %v5108_v37, %v5094_v10  ;;  %5414 = vmatprep.mubr.f32.mxu1 %v23719_v0 }
 0x165   : > { %18601 = vmatprep.subr.msk.mxu0 %vm431_vm1, %v5115_v44  ;;  %18604 = vmatprep.subr.msk.mxu1 %vm431_vm1, %v5117_v7 }
 0x166   : > { %18602 = vmatpush1.msk.msra.mxu0 %vm431_vm1, %v5114_v47  ;;  %18605 = vmatpush1.msk.msra.mxu1 %vm431_vm1, %v5116_v43  ;;  %v18620_v47 = vld [vmem:[%s23707_s1 + $0x80] sm:$0x3f] }
 0x167   : > { %v5436_v48 = vpop.permute.xlu1 %5435  ;;  %v5434_v50 = vpop.permute.xlu0 %5433  ;;  %18603 = vmatmul.mubr.msk.f32.vlgmr.msra.gmra.mrb[2].mxu0 %vm427_vm2, %v18594_v15  ;;  %18606 = vmatmul.mubr.msk.f32.vlgmr.msra.gmra.mrb[2].mxu1 %vm427_vm2, %v18594_v15 }
 0x168   : > { %v5449_v51 = vsel %vm5447_vm4, %v5434_v50, %v5436_v48  ;;  %5539 = vmatprep.mubr.f32.mxu0 %v23719_v0  ;;  %5610 = vmatprep.mubr.f32.mxu1 %v23719_v0 }
 0x169   : > { %18608 = vmatprep.subr.msk.mxu0 %vm431_vm1, %v5449_v51 }
 0x16b   : > { %v5438_v52 = vpop.permute.xlu1 %5437  ;;  %v5432_v55 = vpop.permute.xlu0 %5431 }
 0x16c   : > { %v5448_v62 = vsel %vm5447_vm4, %v5432_v55, %v5434_v50  ;;  %v5450_v16 = vsel %vm5447_vm4, %v5436_v48, %v5438_v52 }
 0x16d   : > { %18609 = vmatpush1.msk.msra.mxu0 %vm431_vm1, %v5448_v62 }
 0x16e   : > { %18610 = vmatmul.mubr.msk.f32.vlgmr.msra.gmra.mrb[0].mxu0 %vm427_vm2, %v18607_v56 }
 0x16f   : > { %v5442_v9 = vpop.permute.xlu1 %5441  ;;  %v5440_v10 = vpop.permute.xlu0 %5439  ;;  %5681 = vmatprep.mubr.f32.mxu0 %v23719_v0 }
 0x170   : > { %v5451_v15 = vsel %vm5447_vm4, %v5438_v52, %v5440_v10  ;;  %v5452_v4 = vsel %vm5447_vm4, %v5440_v10, %v5442_v9 }
 0x171   : > { %18611 = vmatprep.subr.msk.mxu1 %vm431_vm1, %v5451_v15 }
 0x172   : > { %18612 = vmatpush1.msk.msra.mxu1 %vm431_vm1, %v5450_v16 }
 0x173   : > { %v5446_v21 = vpop.permute.xlu1 %5445  ;;  %v5444_v26 = vpop.permute.xlu0 %5443  ;;  %18613 = vmatmul.mubr.msk.f32.vlgmr.msra.gmra.mrb[0].mxu1 %vm427_vm2, %v18607_v56 }
 0x174   : > { %v5454_v2 = vsel %vm5447_vm4, %v5444_v26, %v5446_v21  ;;  %v5453_v32 = vsel %vm5447_vm4, %v5442_v9, %v5444_v26  ;;  %v5455_v36 = vsel %vm5447_vm4, %v5446_v21, %v5432_v55  ;;  %5752 = vmatprep.mubr.f32.mxu1 %v23719_v0  ;;  %vm18345_vm4 = vcmask 7168  }
 0x175   : > { %18614 = vmatprep.subr.msk.mxu0 %vm431_vm1, %v5453_v32  ;;  %18617 = vmatprep.subr.msk.mxu1 %vm431_vm1, %v5455_v36 }
 0x176   : > { %18615 = vmatpush1.msk.msra.mxu0 %vm431_vm1, %v5452_v4  ;;  %18618 = vmatpush1.msk.msra.mxu1 %vm431_vm1, %v5454_v2  ;;  %v18633_v4 = vld [vmem:[%s23707_s1 + $0x88] sm:$0x3f] }
 0x177   : > { %v5774_v37 = vpop.permute.xlu1 %5773  ;;  %v5772_v41 = vpop.permute.xlu0 %5771  ;;  %18616 = vmatmul.mubr.msk.f32.vlgmr.msra.gmra.mrb[2].mxu0 %vm427_vm2, %v18607_v56  ;;  %18619 = vmatmul.mubr.msk.f32.vlgmr.msra.gmra.mrb[2].mxu1 %vm427_vm2, %v18607_v56 }
 0x178   : > { %v5787_v43 = vsel %vm5785_vm7, %v5772_v41, %v5774_v37  ;;  %5877 = vmatprep.mubr.f32.mxu0 %v23719_v0  ;;  %5948 = vmatprep.mubr.f32.mxu1 %v23719_v0 }
 0x179   : > { %18621 = vmatprep.subr.msk.mxu0 %vm431_vm1, %v5787_v43 }
 0x17b   : > { %v5776_v44 = vpop.permute.xlu1 %5775  ;;  %v5770_v7 = vpop.permute.xlu0 %5769 }
 0x17c   : > { %v5786_v48 = vsel %vm5785_vm7, %v5770_v7, %v5772_v41  ;;  %v5788_v55 = vsel %vm5785_vm7, %v5774_v37, %v5776_v44 }
 0x17d   : > { %18622 = vmatpush1.msk.msra.mxu0 %vm431_vm1, %v5786_v48 }
 0x17e   : > { %18623 = vmatmul.mubr.msk.f32.vlgmr.msra.gmra.mrb[0].mxu0 %vm427_vm2, %v18620_v47 }
 0x17f   : > { %v5780_v50 = vpop.permute.xlu1 %5779  ;;  %v5778_v51 = vpop.permute.xlu0 %5777  ;;  %6019 = vmatprep.mubr.f32.mxu0 %v23719_v0 }
 0x180   : > { %v5789_v52 = vsel %vm5785_vm7, %v5776_v44, %v5778_v51  ;;  %v5790_v16 = vsel %vm5785_vm7, %v5778_v51, %v5780_v50 }
 0x181   : > { %18624 = vmatprep.subr.msk.mxu1 %vm431_vm1, %v5789_v52 }
 0x182   : > { %18625 = vmatpush1.msk.msra.mxu1 %vm431_vm1, %v5788_v55 }
 0x183   : > { %v5784_v56 = vpop.permute.xlu1 %5783  ;;  %v5782_v62 = vpop.permute.xlu0 %5781  ;;  %18626 = vmatmul.mubr.msk.f32.vlgmr.msra.gmra.mrb[0].mxu1 %vm427_vm2, %v18620_v47 }
 0x184   : > { %v5792_v9 = vsel %vm5785_vm7, %v5782_v62, %v5784_v56  ;;  %v5791_v10 = vsel %vm5785_vm7, %v5780_v50, %v5782_v62  ;;  %v5793_v15 = vsel %vm5785_vm7, %v5784_v56, %v5770_v7  ;;  %6090 = vmatprep.mubr.f32.mxu1 %v23719_v0 }
 0x185   : > { %18627 = vmatprep.subr.msk.mxu0 %vm431_vm1, %v5791_v10  ;;  %18630 = vmatprep.subr.msk.mxu1 %vm431_vm1, %v5793_v15 }
 0x186   : > { %18628 = vmatpush1.msk.msra.mxu0 %vm431_vm1, %v5790_v16  ;;  %18631 = vmatpush1.msk.msra.mxu1 %vm431_vm1, %v5792_v9  ;;  %v18646_v16 = vld [vmem:[%s23707_s1 + $0x90] sm:$0x3f] }
 0x187   : > { %v6112_v21 = vpop.permute.xlu1 %6111  ;;  %v6110_v26 = vpop.permute.xlu0 %6109  ;;  %18629 = vmatmul.mubr.msk.f32.vlgmr.msra.gmra.mrb[2].mxu0 %vm427_vm2, %v18620_v47  ;;  %18632 = vmatmul.mubr.msk.f32.vlgmr.msra.gmra.mrb[2].mxu1 %vm427_vm2, %v18620_v47 }
 0x188   : > { %v6125_v2 = vsel %vm6123_vm8, %v6110_v26, %v6112_v21  ;;  %6215 = vmatprep.mubr.f32.mxu0 %v23719_v0  ;;  %6286 = vmatprep.mubr.f32.mxu1 %v23719_v0 }
 0x189   : > { %18634 = vmatprep.subr.msk.mxu0 %vm431_vm1, %v6125_v2 }
 0x18b   : > { %v6114_v32 = vpop.permute.xlu1 %6113  ;;  %v6108_v36 = vpop.permute.xlu0 %6107 }
 0x18c   : > { %v6124_v37 = vsel %vm6123_vm8, %v6108_v36, %v6110_v26  ;;  %v6126_v7 = vsel %vm6123_vm8, %v6112_v21, %v6114_v32 }
 0x18d   : > { %18635 = vmatpush1.msk.msra.mxu0 %vm431_vm1, %v6124_v37 }
 0x18e   : > { %18636 = vmatmul.mubr.msk.f32.vlgmr.msra.gmra.mrb[0].mxu0 %vm427_vm2, %v18633_v4 }
 0x18f   : > { %v6118_v41 = vpop.permute.xlu1 %6117  ;;  %v6116_v43 = vpop.permute.xlu0 %6115  ;;  %6357 = vmatprep.mubr.f32.mxu0 %v23719_v0 }
 0x190   : > { %v6127_v44 = vsel %vm6123_vm8, %v6114_v32, %v6116_v43  ;;  %v6128_v55 = vsel %vm6123_vm8, %v6116_v43, %v6118_v41 }
 0x191   : > { %18637 = vmatprep.subr.msk.mxu1 %vm431_vm1, %v6127_v44 }
 0x192   : > { %18638 = vmatpush1.msk.msra.mxu1 %vm431_vm1, %v6126_v7 }
 0x193   : > { %v6122_v47 = vpop.permute.xlu1 %6121  ;;  %v6120_v48 = vpop.permute.xlu0 %6119  ;;  %18639 = vmatmul.mubr.msk.f32.vlgmr.msra.gmra.mrb[0].mxu1 %vm427_vm2, %v18633_v4 }
 0x194   : > { %v6130_v50 = vsel %vm6123_vm8, %v6120_v48, %v6122_v47  ;;  %v6129_v51 = vsel %vm6123_vm8, %v6118_v41, %v6120_v48  ;;  %v6131_v52 = vsel %vm6123_vm8, %v6122_v47, %v6108_v36  ;;  %6428 = vmatprep.mubr.f32.mxu1 %v23719_v0 }
 0x195   : > { %18640 = vmatprep.subr.msk.mxu0 %vm431_vm1, %v6129_v51  ;;  %18643 = vmatprep.subr.msk.mxu1 %vm431_vm1, %v6131_v52 }
 0x196   : > { %18641 = vmatpush1.msk.msra.mxu0 %vm431_vm1, %v6128_v55  ;;  %18644 = vmatpush1.msk.msra.mxu1 %vm431_vm1, %v6130_v50  ;;  %v18659_v55 = vld [vmem:[%s23707_s1 + $0x98] sm:$0x3f] }
 0x197   : > { %v6450_v56 = vpop.permute.xlu1 %6449  ;;  %v6448_v62 = vpop.permute.xlu0 %6447  ;;  %18642 = vmatmul.mubr.msk.f32.vlgmr.msra.gmra.mrb[2].mxu0 %vm427_vm2, %v18633_v4  ;;  %18645 = vmatmul.mubr.msk.f32.vlgmr.msra.gmra.mrb[2].mxu1 %vm427_vm2, %v18633_v4 }
 0x198   : > { %v6463_v9 = vsel %vm6461_vm9, %v6448_v62, %v6450_v56  ;;  %6553 = vmatprep.mubr.f32.mxu0 %v23719_v0  ;;  %6624 = vmatprep.mubr.f32.mxu1 %v23719_v0 }
 0x199   : > { %18647 = vmatprep.subr.msk.mxu0 %vm431_vm1, %v6463_v9 }
 0x19b   : > { %v6452_v10 = vpop.permute.xlu1 %6451  ;;  %v6446_v15 = vpop.permute.xlu0 %6445 }
 0x19c   : > { %v6462_v21 = vsel %vm6461_vm9, %v6446_v15, %v6448_v62  ;;  %v6464_v36 = vsel %vm6461_vm9, %v6450_v56, %v6452_v10 }
 0x19d   : > { %18648 = vmatpush1.msk.msra.mxu0 %vm431_vm1, %v6462_v21 }
 0x19e   : > { %18649 = vmatmul.mubr.msk.f32.vlgmr.msra.gmra.mrb[0].mxu0 %vm427_vm2, %v18646_v16 }
 0x19f   : > { %v6456_v26 = vpop.permute.xlu1 %6455  ;;  %v6454_v2 = vpop.permute.xlu0 %6453  ;;  %6695 = vmatprep.mubr.f32.mxu0 %v23719_v0 }
 0x1a0   : > { %v6465_v32 = vsel %vm6461_vm9, %v6452_v10, %v6454_v2  ;;  %v6466_v7 = vsel %vm6461_vm9, %v6454_v2, %v6456_v26 }
 0x1a1   : > { %18650 = vmatprep.subr.msk.mxu1 %vm431_vm1, %v6465_v32 }
 0x1a2   : > { %18651 = vmatpush1.msk.msra.mxu1 %vm431_vm1, %v6464_v36 }
 0x1a3   : > { %v6460_v4 = vpop.permute.xlu1 %6459  ;;  %v6458_v37 = vpop.permute.xlu0 %6457  ;;  %18652 = vmatmul.mubr.msk.f32.vlgmr.msra.gmra.mrb[0].mxu1 %vm427_vm2, %v18646_v16 }
 0x1a4   : > { %v6468_v41 = vsel %vm6461_vm9, %v6458_v37, %v6460_v4  ;;  %v6467_v43 = vsel %vm6461_vm9, %v6456_v26, %v6458_v37  ;;  %v6469_v44 = vsel %vm6461_vm9, %v6460_v4, %v6446_v15  ;;  %6766 = vmatprep.mubr.f32.mxu1 %v23719_v0  ;;  %v18672_v4 = vld [vmem:[%s23707_s1 + $0xa0] sm:$0x3f] }
 0x1a5   : > { %18653 = vmatprep.subr.msk.mxu0 %vm431_vm1, %v6467_v43  ;;  %18656 = vmatprep.subr.msk.mxu1 %vm431_vm1, %v6469_v44 }
 0x1a6   : > { %18654 = vmatpush1.msk.msra.mxu0 %vm431_vm1, %v6466_v7  ;;  %18657 = vmatpush1.msk.msra.mxu1 %vm431_vm1, %v6468_v41 }
 0x1a7   : > { %v6788_v47 = vpop.permute.xlu1 %6787  ;;  %v6786_v48 = vpop.permute.xlu0 %6785  ;;  %18655 = vmatmul.mubr.msk.f32.vlgmr.msra.gmra.mrb[2].mxu0 %vm427_vm2, %v18646_v16  ;;  %18658 = vmatmul.mubr.msk.f32.vlgmr.msra.gmra.mrb[2].mxu1 %vm427_vm2, %v18646_v16 }
 0x1a8   : > { %v6801_v50 = vsel %vm6799_vm10, %v6786_v48, %v6788_v47  ;;  %6891 = vmatprep.mubr.f32.mxu0 %v23719_v0  ;;  %6962 = vmatprep.mubr.f32.mxu1 %v23719_v0 }
 0x1a9   : > { %18660 = vmatprep.subr.msk.mxu0 %vm431_vm1, %v6801_v50 }
 0x1ab   : > { %v6790_v51 = vpop.permute.xlu1 %6789  ;;  %v6784_v52 = vpop.permute.xlu0 %6783 }
 0x1ac   : > { %v6800_v56 = vsel %vm6799_vm10, %v6784_v52, %v6786_v48  ;;  %v6802_v15 = vsel %vm6799_vm10, %v6788_v47, %v6790_v51 }
 0x1ad   : > { %18661 = vmatpush1.msk.msra.mxu0 %vm431_vm1, %v6800_v56 }
 0x1ae   : > { %18662 = vmatmul.mubr.msk.f32.vlgmr.msra.gmra.mrb[0].mxu0 %vm427_vm2, %v18659_v55 }
 0x1af   : > { %v6794_v62 = vpop.permute.xlu1 %6793  ;;  %v6792_v9 = vpop.permute.xlu0 %6791  ;;  %7033 = vmatprep.mubr.f32.mxu0 %v23719_v0 }
 0x1b0   : > { %v6803_v10 = vsel %vm6799_vm10, %v6790_v51, %v6792_v9  ;;  %v6804_v36 = vsel %vm6799_vm10, %v6792_v9, %v6794_v62 }
 0x1b1   : > { %18663 = vmatprep.subr.msk.mxu1 %vm431_vm1, %v6803_v10 }
 0x1b2   : > { %18664 = vmatpush1.msk.msra.mxu1 %vm431_vm1, %v6802_v15 }
 0x1b3   : > { %v6798_v16 = vpop.permute.xlu1 %6797  ;;  %18665 = vmatmul.mubr.msk.f32.vlgmr.msra.gmra.mrb[0].mxu1 %vm427_vm2, %v18659_v55  ;;  %v6796_v21 = vpop.permute.xlu0 %6795 }
 0x1b4   : > { %v6806_v26 = vsel %vm6799_vm10, %v6796_v21, %v6798_v16  ;;  %v6805_v2 = vsel %vm6799_vm10, %v6794_v62, %v6796_v21  ;;  %v6807_v32 = vsel %vm6799_vm10, %v6798_v16, %v6784_v52  ;;  %7104 = vmatprep.mubr.f32.mxu1 %v23719_v0 }
 0x1b5   : > { %18666 = vmatprep.subr.msk.mxu0 %vm431_vm1, %v6805_v2  ;;  %18669 = vmatprep.subr.msk.mxu1 %vm431_vm1, %v6807_v32 }
 0x1b6   : > { %18667 = vmatpush1.msk.msra.mxu0 %vm431_vm1, %v6804_v36  ;;  %18670 = vmatpush1.msk.msra.mxu1 %vm431_vm1, %v6806_v26  ;;  %v21449_v36 = vld [vmem:[%s23709_s3] sm:$0xff] }
 0x1b7   : > { %18668 = vmatmul.mubr.msk.f32.vlgmr.msra.gmra.mrb[2].mxu0 %vm427_vm2, %v18659_v55  ;;  %18671 = vmatmul.mubr.msk.f32.vlgmr.msra.gmra.mrb[2].mxu1 %vm427_vm2, %v18659_v55 }
 0x1b8   : > { %18673 = vmatprep.subr.msk.mxu0 %vm431_vm1, %v21033_v33  ;;  %18676 = vmatprep.subr.msk.mxu1 %vm431_vm1, %v21010_v61 }
 0x1b9   : > { %18674 = vmatpush1.msk.msra.mxu0 %vm431_vm1, %v20388_v6  ;;  %18677 = vmatpush1.msk.msra.mxu1 %vm431_vm1, %v20373_v3  ;;  %v18685_v3 = vld [vmem:[%s23707_s1 + $0xa8] sm:$0x3f]  ;;  %v18711_v6 = vld [vmem:[%s23707_s1 + $0xb8] sm:$0x3f] }
 0x1ba   : > { %7188 = vmatprep.mubr.f32.mxu0 %v23719_v0  ;;  %7259 = vmatprep.mubr.f32.mxu1 %v23719_v0 }
 0x1bb   : > { %18679 = vmatprep.subr.msk.mxu0 %vm431_vm1, %v21021_v11  ;;  %18682 = vmatprep.subr.msk.mxu1 %vm431_vm1, %v20995_v1 }
 0x1bc   : > { %18675 = vmatmul.mubr.msk.f32.vlgmr.msra.gmra.mrb[0].mxu0 %vm427_vm2, %v18672_v4  ;;  %18678 = vmatmul.mubr.msk.f32.vlgmr.msra.gmra.mrb[0].mxu1 %vm427_vm2, %v18672_v4 }
 0x1bd   : > { %18680 = vmatpush1.msk.msra.mxu0 %vm431_vm1, %v20384_v5  ;;  %18683 = vmatpush1.msk.msra.mxu1 %vm431_vm1, %v20399_v8  ;;  %v18698_v5 = vld [vmem:[%s23707_s1 + $0xb0] sm:$0x3f]  ;;  %v18724_v8 = vld [vmem:[%s23707_s1 + $0xc0] sm:$0x3f] }
 0x1be   : > { %18686 = vmatprep.subr.msk.mxu0 %vm431_vm1, %v20485_v14  ;;  %18689 = vmatprep.subr.msk.mxu1 %vm431_vm1, %v20526_v25 }
 0x1bf   : > { %7330 = vmatprep.mubr.f32.mxu0 %v23719_v0  ;;  %7401 = vmatprep.mubr.f32.mxu1 %v23719_v0 }
 0x1c0   : > { %18681 = vmatmul.mubr.msk.f32.vlgmr.msra.gmra.mrb[2].mxu0 %vm427_vm2, %v18672_v4  ;;  %18684 = vmatmul.mubr.msk.f32.vlgmr.msra.gmra.mrb[2].mxu1 %vm427_vm2, %v18672_v4 }
 0x1c1   : > { %18687 = vmatpush1.msk.msra.mxu0 %vm431_vm1, %v20498_v18  ;;  %18690 = vmatpush1.msk.msra.mxu1 %vm431_vm1, %v20482_v13 }
 0x1c2   : > { %18692 = vmatprep.subr.msk.mxu0 %vm431_vm1, %v20512_v22  ;;  %18695 = vmatprep.subr.msk.mxu1 %vm431_vm1, %v20501_v19 }
 0x1c3   : > { %7485 = vmatprep.mubr.f32.mxu0 %v23719_v0  ;;  %7556 = vmatprep.mubr.f32.mxu1 %v23719_v0 }
 0x1c4   : > { %18688 = vmatmul.mubr.msk.f32.vlgmr.msra.gmra.mrb[0].mxu0 %vm427_vm2, %v18685_v3  ;;  %18691 = vmatmul.mubr.msk.f32.vlgmr.msra.gmra.mrb[0].mxu1 %vm427_vm2, %v18685_v3 }
 0x1c5   : > { %18693 = vmatpush1.msk.msra.mxu0 %vm431_vm1, %v20518_v24  ;;  %18696 = vmatpush1.msk.msra.mxu1 %vm431_vm1, %v20515_v23 }
 0x1c6   : > { %18699 = vmatprep.subr.msk.mxu0 %vm431_vm1, %v20592_v38  ;;  %18702 = vmatprep.subr.msk.mxu1 %vm431_vm1, %v20620_v45 }
 0x1c7   : > { %7627 = vmatprep.mubr.f32.mxu0 %v23719_v0  ;;  %7698 = vmatprep.mubr.f32.mxu1 %v23719_v0 }
 0x1c8   : > { %18694 = vmatmul.mubr.msk.f32.vlgmr.msra.gmra.mrb[2].mxu0 %vm427_vm2, %v18685_v3  ;;  %18697 = vmatmul.mubr.msk.f32.vlgmr.msra.gmra.mrb[2].mxu1 %vm427_vm2, %v18685_v3 }
 0x1c9   : > { %18700 = vmatpush1.msk.msra.mxu0 %vm431_vm1, %v20558_v31  ;;  %18703 = vmatpush1.msk.msra.mxu1 %vm431_vm1, %v20578_v35 }
 0x1ca   : > { %18705 = vmatprep.subr.msk.mxu0 %vm431_vm1, %v20609_v42  ;;  %18708 = vmatprep.subr.msk.mxu1 %vm431_vm1, %v20572_v34 }
 0x1cb   : > { %7782 = vmatprep.mubr.f32.mxu0 %v23719_v0  ;;  %7853 = vmatprep.mubr.f32.mxu1 %v23719_v0 }
 0x1cc   : > { %18701 = vmatmul.mubr.msk.f32.vlgmr.msra.gmra.mrb[0].mxu0 %vm427_vm2, %v18698_v5  ;;  %18704 = vmatmul.mubr.msk.f32.vlgmr.msra.gmra.mrb[0].mxu1 %vm427_vm2, %v18698_v5 }
 0x1cd   : > { %18706 = vmatpush1.msk.msra.mxu0 %vm431_vm1, %v20597_v39  ;;  %18709 = vmatpush1.msk.msra.mxu1 %vm431_vm1, %v20600_v40 }
 0x1ce   : > { %18712 = vmatprep.subr.msk.mxu0 %vm431_vm1, %v20659_v54  ;;  %18715 = vmatprep.subr.msk.mxu1 %vm431_vm1, %v20682_v60 }
 0x1cf   : > { %7924 = vmatprep.mubr.f32.mxu0 %v23719_v0  ;;  %7995 = vmatprep.mubr.f32.mxu1 %v23719_v0 }
 0x1d0   : > { %18707 = vmatmul.mubr.msk.f32.vlgmr.msra.gmra.mrb[2].mxu0 %vm427_vm2, %v18698_v5  ;;  %18710 = vmatmul.mubr.msk.f32.vlgmr.msra.gmra.mrb[2].mxu1 %vm427_vm2, %v18698_v5 }
 0x1d1   : > { %18713 = vmatpush1.msk.msra.mxu0 %vm431_vm1, %v20625_v46  ;;  %18716 = vmatpush1.msk.msra.mxu1 %vm431_vm1, %v20654_v53 }
 0x1d2   : > { %18718 = vmatprep.subr.msk.mxu0 %vm431_vm1, %v20672_v57  ;;  %18721 = vmatprep.subr.msk.mxu1 %vm431_vm1, %v20638_v49 }
 0x1d3   : > { %8079 = vmatprep.mubr.f32.mxu0 %v23719_v0  ;;  %8150 = vmatprep.mubr.f32.mxu1 %v23719_v0 }
 0x1d4   : > { %18714 = vmatmul.mubr.msk.f32.vlgmr.msra.gmra.mrb[0].mxu0 %vm427_vm2, %v18711_v6  ;;  %18717 = vmatmul.mubr.msk.f32.vlgmr.msra.gmra.mrb[0].mxu1 %vm427_vm2, %v18711_v6 }
 0x1d5   : > { %18719 = vmatpush1.msk.msra.mxu0 %vm431_vm1, %v20675_v58  ;;  %18722 = vmatpush1.msk.msra.mxu1 %vm431_vm1, %v20678_v59 }
 0x1d6   : > { %18725 = vmatprep.subr.msk.mxu0 %vm431_vm1, %v20722_v20  ;;  %18728 = vmatprep.subr.msk.mxu1 %vm431_vm1, %v20741_v30 }
 0x1d7   : > { %8221 = vmatprep.mubr.f32.mxu0 %v23719_v0  ;;  %8292 = vmatprep.mubr.f32.mxu1 %v23719_v0 }
 0x1d8   : > { %18720 = vmatmul.mubr.msk.f32.vlgmr.msra.gmra.mrb[2].mxu0 %vm427_vm2, %v18711_v6  ;;  %18723 = vmatmul.mubr.msk.f32.vlgmr.msra.gmra.mrb[2].mxu1 %vm427_vm2, %v18711_v6  ;;  %v8608_v13 = vpop.permute.xlu0 %8607  ;;  %v21466_v6 = vld [vmem:[%s23709_s3 + $0x8] sm:$0xff] }
 0x1d9   : > { %18726 = vmatpush1.msk.msra.mxu0 %vm431_vm1, %v20695_v63  ;;  %18729 = vmatpush1.msk.msra.mxu1 %vm431_vm1, %v20718_v17 }
 0x1da   : > { %18731 = vmatprep.subr.msk.mxu0 %vm431_vm1, %v20731_v27  ;;  %18734 = vmatprep.subr.msk.mxu1 %vm431_vm1, %v20710_v12 }
 0x1db   : > { %8376 = vmatprep.mubr.f32.mxu0 %v23719_v0  ;;  %8447 = vmatprep.mubr.f32.mxu1 %v23719_v0 }
 0x1dc   : > { %18727 = vmatmul.mubr.msk.f32.vlgmr.msra.gmra.mrb[0].mxu0 %vm427_vm2, %v18724_v8  ;;  %18730 = vmatmul.mubr.msk.f32.vlgmr.msra.gmra.mrb[0].mxu1 %vm427_vm2, %v18724_v8 }
 0x1dd   : > { %18732 = vmatpush1.msk.msra.mxu0 %vm431_vm1, %v20734_v28  ;;  %18735 = vmatpush1.msk.msra.mxu1 %vm431_vm1, %v20737_v29  ;;  %vm8771_vm1 = vcmask 1045504  }
 0x1de   : > { %8518 = vmatprep.mubr.f32.mxu0 %v23719_v0  ;;  %8589 = vmatprep.mubr.f32.mxu1 %v23719_v0 }
 0x1e0   : > { %18733 = vmatmul.mubr.msk.f32.vlgmr.msra.gmra.mrb[2].mxu0 %vm427_vm2, %v18724_v8  ;;  %18736 = vmatmul.mubr.msk.f32.vlgmr.msra.gmra.mrb[2].mxu1 %vm427_vm2, %v18724_v8  ;;  %vm9810_vm2 = vcmask 998400  }
 0x1e1   : > { %9180 = vmatprep.mubr.f32.mxu0 %v23719_v0  ;;  %8852 = vmatprep.mubr.f32.mxu1 %v23719_v0 }
 0x2af   : > { %v8378_v14 = vpop.f32.mrb[0].mxu0  ;;  %v8449_v18 = vpop.f32.mrb[0].mxu1 }
 0x2b0   : > { %v8380_v19 = vpop.f32.mrb[1].mxu0  ;;  %v8451_v22 = vpop.f32.mrb[1].mxu1  ;;  %v8612_v23 = vadd.f32 %v8608_v13, %v8449_v18  ;;  %v8610_v39 = vadd.f32 %v8608_v13, %v8378_v14 }
 0x2b1   : > { %v8613_v24 = vadd.f32 %v8608_v13, %v8451_v22  ;;  %v8611_v25 = vadd.f32 %v8608_v13, %v8380_v19 }
 0x2b2   : > { %v8620_v31 = vmax.f32 %v8612_v23, 0.0  ;;  %v8618_v53 = vmax.f32 %v8610_v39, 0.0 }
 0x2b3   : > { %v8621_v34 = vmax.f32 %v8613_v24, 0.0  ;;  %v8520_v35 = vpop.f32.mrb[2].mxu0  ;;  %v8591_v38 = vpop.f32.mrb[2].mxu1  ;;  %v8619_v45 = vmax.f32 %v8611_v25, 0.0 }
 0x2b4   : > { %v8522_v40 = vpop.f32.mrb[3].mxu0  ;;  %v8593_v42 = vpop.f32.mrb[3].mxu1  ;;  %8638 = vrot.lane.b32.xlu1 %v8620_v31, %s20254_s23  ;;  %v8614_v46 = vadd.f32 %v8608_v13, %v8520_v35  ;;  %v8616_v49 = vadd.f32 %v8608_v13, %v8591_v38 }
 0x2b5   : > { %8640 = vrot.lane.b32.xlu0 %v8621_v34, %s20254_s23  ;;  %v8615_v57 = vadd.f32 %v8608_v13, %v8522_v40  ;;  %v8617_v60 = vadd.f32 %v8608_v13, %v8593_v42 }
 0x2b6   : > { %v8622_v54 = vmax.f32 %v8614_v46, 0.0  ;;  %v8624_v58 = vmax.f32 %v8616_v49, 0.0 }
 0x2b7   : > { %v8623_v59 = vmax.f32 %v8615_v57, 0.0  ;;  %v8625_v63 = vmax.f32 %v8617_v60, 0.0 }
 0x2b8   : > { %8636 = vrot.lane.b32.xlu1 %v8619_v45, %s20254_s23 }
 0x2b9   : > { %8634 = vrot.lane.b32.xlu0 %v8618_v53, %s20254_s23 }
 0x2bc   : > { %8642 = vrot.lane.b32.xlu1 %v8622_v54, %s20254_s23 }
 0x2bd   : > { %8646 = vrot.lane.b32.xlu0 %v8624_v58, %s20254_s23 }
 0x2c0   : > { %8644 = vrot.lane.b32.xlu1 %v8623_v59, %s20254_s23 }
 0x2c4   : > { %8648 = vrot.lane.b32.xlu1 %v8625_v63, %s20254_s23  ;;  %s19217_s23 = sshll.u32 %s23823_s18, 4 }
 0x326   : > { %v8639_v12 = vpop.permute.xlu1 %8638 }
 0x327   : > { %v8641_v17 = vpop.permute.xlu0 %8640 }
 0x328   : > { %v8652_v20 = vsel %vm418_vm0, %v8639_v12, %v8641_v17 }
 0x329   : > { %v8668_v27 = vmax.f32 %v8620_v31, %v8652_v20 }
 0x32a   : > { %v8637_v28 = vpop.permute.xlu1 %8636 }
 0x32b   : > { %v8651_v29 = vsel %vm418_vm0, %v8637_v28, %v8639_v12  ;;  %8689 = vrot.lane.b32.xlu1 %v8668_v27, %s20258_s27  ;;  %v8635_v30 = vpop.permute.xlu0 %8634 }
 0x32c   : > { %v8667_v1 = vmax.f32 %v8619_v45, %v8651_v29  ;;  %v8650_v61 = vsel %vm418_vm0, %v8635_v30, %v8637_v28  ;;  %v8675_v9 = vmax.f32 %v8618_v53, %v8635_v30 }
 0x32d   : > { %v8666_v11 = vmax.f32 %v8618_v53, %v8650_v61 }
 0x32e   : > { %v8643_v33 = vpop.permute.xlu1 %8642  ;;  %8687 = vrot.lane.b32.xlu0 %v8667_v1, %s20258_s27 }
 0x32f   : > { %v8653_v37 = vsel %vm418_vm0, %v8641_v17, %v8643_v33  ;;  %8685 = vrot.lane.b32.xlu1 %v8666_v11, %s20258_s27  ;;  %v8647_v43 = vpop.permute.xlu0 %8646 }
 0x330   : > { %v8669_v41 = vmax.f32 %v8621_v34, %v8653_v37  ;;  %v21695_v37 = vld [vmem:[%s23709_s3 + $0x20] sm:$0xff] }
 0x332   : > { %v8645_v44 = vpop.permute.xlu1 %8644  ;;  %8691 = vrot.lane.b32.xlu0 %v8669_v41, %s20258_s27 }
 0x333   : > { %v8654_v7 = vsel %vm418_vm0, %v8643_v33, %v8645_v44  ;;  %v8655_v47 = vsel %vm418_vm0, %v8645_v44, %v8647_v43 }
 0x334   : > { %v8670_v48 = vmax.f32 %v8622_v54, %v8654_v7  ;;  %v8671_v50 = vmax.f32 %v8623_v59, %v8655_v47  ;;  %v21617_v54 = vld [vmem:[%s23709_s3 + $0x10] sm:$0xff]  ;;  %v21726_v47 = vld [vmem:[%s23709_s3 + $0x28] sm:$0xff] }
 0x336   : > { %v8649_v51 = vpop.permute.xlu1 %8648  ;;  %8693 = vrot.lane.b32.xlu0 %v8670_v48, %s20258_s27  ;;  %8695 = vrot.lane.b32.xlu1 %v8671_v50, %s20258_s27 }
 0x337   : > { %v8656_v52 = vsel %vm418_vm0, %v8647_v43, %v8649_v51  ;;  %v8657_v55 = vsel %vm418_vm0, %v8649_v51, %v8635_v30  ;;  %vm8764_vm0 = vcmask 48128  }
 0x338   : > { %v8672_v56 = vmax.f32 %v8624_v58, %v8656_v52  ;;  %v8673_v62 = vmax.f32 %v8625_v63, %v8657_v55  ;;  %v21638_v63 = vld [vmem:[%s23709_s3 + $0x18] sm:$0xff] }
 0x33a   : > { %8697 = vrot.lane.b32.xlu0 %v8672_v56, %s20258_s27  ;;  %8699 = vrot.lane.b32.xlu1 %v8673_v62, %s20258_s27 }
 0x33e   : > { %8701 = vrot.lane.b32.xlu0 %v8675_v9, %s20258_s27 }
 0x39d   : > { %v8690_v10 = vpop.permute.xlu1 %8689 }
 0x3a0   : > { %v8688_v15 = vpop.permute.xlu0 %8687 }
 0x3a1   : > { %v8704_v16 = vsel %vm2067_vm6, %v8688_v15, %v8690_v10  ;;  %v8686_v21 = vpop.permute.xlu1 %8685 }
 0x3a2   : > { %v21441_v26 = vmax.f32 %v8667_v1, %v8704_v16  ;;  %v8703_v2 = vsel %vm2067_vm6, %v8686_v21, %v8688_v15  ;;  %v21783_v16 = vld [vmem:[%s23709_s3 + $0x30] sm:$0xff] }
 0x3a3   : > { %v21444_v32 = vmax.f32 %v8666_v11, %v8703_v2 }
 0x3a4   : > { %8742 = vrot.lane.b32.xlu1 %v21441_v26, %s20255_s24  ;;  %18755 = vmatprep.subr.msk.mxu0 %vm8771_vm1, %v21441_v26  ;;  %v8692_v4 = vpop.permute.xlu0 %8691 }
 0x3a5   : > { %v8705_v3 = vsel %vm2067_vm6, %v8690_v10, %v8692_v4  ;;  %18756 = vmatpush1.msk.msra.mxu0 %vm8771_vm1, %v21444_v32 }
 0x3a6   : > { %v21458_v5 = vmax.f32 %v8668_v27, %v8705_v3  ;;  %18757 = vmatmul.mubr.msk.f32.vlgmr.msra.gmra.mrb[4].mxu0 %vm8764_vm0, %v21449_v36 }
 0x3a7   : > { %9186 = vmatprep.mubr.f32.mxu0 %v23719_v0 }
 0x3a8   : > { %v8696_v8 = vpop.permute.xlu1 %8695  ;;  %8740 = vrot.lane.b32.xlu1 %v21444_v32, %s20255_s24  ;;  %8744 = vrot.lane.b32.xlu0 %v21458_v5, %s20255_s24  ;;  %v8694_v13 = vpop.permute.xlu0 %8693 }
 0x3a9   : > { %v8706_v14 = vsel %vm2067_vm6, %v8692_v4, %v8694_v13  ;;  %v8707_v18 = vsel %vm2067_vm6, %v8694_v13, %v8696_v8 }
 0x3aa   : > { %v21474_v19 = vmax.f32 %v8669_v41, %v8706_v14  ;;  %v21476_v22 = vmax.f32 %v8670_v48, %v8707_v18  ;;  %18758 = vmatmul.mubr.msk.f32.gmra.mrb[6].mxu0 %vm8764_vm0, %v21466_v6 }
 0x3ab   : > { %9334 = vmatprep.mubr.f32.mxu0 %v23719_v0 }
 0x3ac   : > { %v8700_v23 = vpop.permute.xlu1 %8699  ;;  %8748 = vrot.lane.b32.xlu1 %v21476_v22, %s20255_s24  ;;  %8746 = vrot.lane.b32.xlu0 %v21474_v19, %s20255_s24  ;;  %v8698_v24 = vpop.permute.xlu0 %8697 }
 0x3ad   : > { %v8708_v25 = vsel %vm2067_vm6, %v8696_v8, %v8698_v24  ;;  %v8709_v31 = vsel %vm2067_vm6, %v8698_v24, %v8700_v23  ;;  %v21807_v8 = vld [vmem:[%s23709_s3 + $0x38] sm:$0xff] }
 0x3ae   : > { %v21487_v34 = vmax.f32 %v8671_v50, %v8708_v25  ;;  %v21489_v35 = vmax.f32 %v8672_v56, %v8709_v31  ;;  %v17314_v56 = vld [vmem:[%s23710_s4 + $0x8] sm:$0xff] }
 0x3b0   : > { %8752 = vrot.lane.b32.xlu1 %v21489_v35, %s20255_s24  ;;  %8750 = vrot.lane.b32.xlu0 %v21487_v34, %s20255_s24  ;;  %v8702_v38 = vpop.permute.xlu0 %8701 }
 0x3b1   : > { %18763 = vmatprep.subr.msk.mxu0 %vm8771_vm1, %v21487_v34  ;;  %v8710_v39 = vsel %vm2067_vm6, %v8700_v23, %v8702_v38  ;;  %vm10180_vm6 = vcmask 982016  }
 0x3b2   : > { %v21498_v40 = vmax.f32 %v8673_v62, %v8710_v39  ;;  %18764 = vmatpush1.msk.msra.mxu0 %vm8771_vm1, %v21476_v22 }
 0x3b3   : > { %18765 = vmatmul.mubr.msk.f32.vlgmr.msra.gmra.mrb[8].mxu0 %vm8764_vm0, %v21449_v36 }
 0x3b4   : > { %9427 = vrot.lane.b32.xlu1 %v21441_v26, %s20257_s26  ;;  %8754 = vrot.lane.b32.xlu0 %v21498_v40, %s20255_s24 }
 0x3b5   : > { %9340 = vmatprep.mubr.f32.mxu0 %v23719_v0 }
 0x3b7   : > { %18766 = vmatmul.mubr.msk.f32.gmra.mrb[10].mxu0 %vm8764_vm0, %v21466_v6 }
 0x3b8   : > { %9425 = vrot.lane.b32.xlu1 %v21444_v32, %s20257_s26  ;;  %9429 = vrot.lane.b32.xlu0 %v21458_v5, %s20257_s26 }
 0x3b9   : > { %9535 = vmatprep.mubr.f32.mxu0 %v23719_v0 }
 0x3bc   : > { %9437 = vrot.lane.b32.xlu1 %v21489_v35, %s20257_s26  ;;  %9435 = vrot.lane.b32.xlu0 %v21487_v34, %s20257_s26 }
 0x3c0   : > { %9431 = vrot.lane.b32.xlu1 %v21474_v19, %s20257_s26  ;;  %9433 = vrot.lane.b32.xlu0 %v21476_v22, %s20257_s26 }
 0x3c4   : > { %9798 = vrot.lane.b32.xlu1 %v21458_v5, %s20274_s22  ;;  %9796 = vrot.lane.b32.xlu0 %v21441_v26, %s20274_s22 }
 0x3c8   : > { %9439 = vrot.lane.b32.xlu1 %v21498_v40, %s20257_s26  ;;  %9794 = vrot.lane.b32.xlu0 %v21444_v32, %s20274_s22 }
 0x3cc   : > { %9806 = vrot.lane.b32.xlu1 %v21489_v35, %s20274_s22  ;;  %9804 = vrot.lane.b32.xlu0 %v21487_v34, %s20274_s22 }
 0x3d0   : > { %9800 = vrot.lane.b32.xlu1 %v21474_v19, %s20274_s22  ;;  %9802 = vrot.lane.b32.xlu0 %v21476_v22, %s20274_s22 }
 0x3d4   : > { %10168 = vrot.lane.b32.xlu1 %v21458_v5, %s20275_s16  ;;  %10166 = vrot.lane.b32.xlu0 %v21441_v26, %s20275_s16 }
 0x3d8   : > { %9808 = vrot.lane.b32.xlu1 %v21498_v40, %s20274_s22  ;;  %10164 = vrot.lane.b32.xlu0 %v21444_v32, %s20275_s16 }
 0x3dc   : > { %10176 = vrot.lane.b32.xlu1 %v21489_v35, %s20275_s16  ;;  %10174 = vrot.lane.b32.xlu0 %v21487_v34, %s20275_s16 }
 0x3e0   : > { %10170 = vrot.lane.b32.xlu1 %v21474_v19, %s20275_s16  ;;  %10172 = vrot.lane.b32.xlu0 %v21476_v22, %s20275_s16 }
 0x3e4   : > { %10538 = vrot.lane.b32.xlu1 %v21458_v5, %s20263_s21  ;;  %10536 = vrot.lane.b32.xlu0 %v21441_v26, %s20263_s21 }
 0x3e8   : > { %10178 = vrot.lane.b32.xlu1 %v21498_v40, %s20275_s16  ;;  %10534 = vrot.lane.b32.xlu0 %v21444_v32, %s20263_s21 }
 0x3ec   : > { %10546 = vrot.lane.b32.xlu1 %v21489_v35, %s20263_s21  ;;  %10544 = vrot.lane.b32.xlu0 %v21487_v34, %s20263_s21 }
 0x3f0   : > { %10540 = vrot.lane.b32.xlu1 %v21474_v19, %s20263_s21  ;;  %10542 = vrot.lane.b32.xlu0 %v21476_v22, %s20263_s21 }
 0x3f4   : > { %10907 = vrot.lane.b32.xlu1 %v21458_v5, %s20265_s13  ;;  %10905 = vrot.lane.b32.xlu0 %v21441_v26, %s20265_s13 }
 0x3f8   : > { %10548 = vrot.lane.b32.xlu1 %v21498_v40, %s20263_s21  ;;  %10903 = vrot.lane.b32.xlu0 %v21444_v32, %s20265_s13 }
 0x3fc   : > { %10915 = vrot.lane.b32.xlu1 %v21489_v35, %s20265_s13  ;;  %10913 = vrot.lane.b32.xlu0 %v21487_v34, %s20265_s13 }
 0x400   : > { %10909 = vrot.lane.b32.xlu1 %v21474_v19, %s20265_s13  ;;  %10911 = vrot.lane.b32.xlu0 %v21476_v22, %s20265_s13 }
 0x404   : > { %11276 = vrot.lane.b32.xlu1 %v21458_v5, %s20267_s25  ;;  %11274 = vrot.lane.b32.xlu0 %v21441_v26, %s20267_s25 }
 0x408   : > { %10917 = vrot.lane.b32.xlu1 %v21498_v40, %s20265_s13  ;;  %11272 = vrot.lane.b32.xlu0 %v21444_v32, %s20267_s25 }
 0x40c   : > { %11284 = vrot.lane.b32.xlu1 %v21489_v35, %s20267_s25  ;;  %11282 = vrot.lane.b32.xlu0 %v21487_v34, %s20267_s25 }
 0x410   : > { %11278 = vrot.lane.b32.xlu1 %v21474_v19, %s20267_s25  ;;  %11280 = vrot.lane.b32.xlu0 %v21476_v22, %s20267_s25 }
 0x414   : > { %11645 = vrot.lane.b32.xlu1 %v21458_v5, %s20276_s19  ;;  %11643 = vrot.lane.b32.xlu0 %v21441_v26, %s20276_s19 }
 0x416   : > { %v8743_v42 = vpop.permute.xlu1 %8742 }
 0x418   : > { %11286 = vrot.lane.b32.xlu1 %v21498_v40, %s20267_s25  ;;  %11641 = vrot.lane.b32.xlu0 %v21444_v32, %s20276_s19 }
 0x41a   : > { %v8741_v45 = vpop.permute.xlu1 %8740  ;;  %v8745_v46 = vpop.permute.xlu0 %8744 }
 0x41b   : > { %v21605_v49 = vsel %vm1053_vm3, %v8741_v45, %v8743_v42  ;;  %v21608_v53 = vsel %vm1053_vm3, %v8743_v42, %v8745_v46 }
 0x41c   : > { %11653 = vrot.lane.b32.xlu1 %v21489_v35, %s20276_s19  ;;  %11651 = vrot.lane.b32.xlu0 %v21487_v34, %s20276_s19 }
 0x41d   : > { %18739 = vmatprep.subr.msk.mxu1 %vm8771_vm1, %v21608_v53 }
 0x41e   : > { %18740 = vmatpush1.msk.msra.mxu1 %vm8771_vm1, %v21605_v49  ;;  %v8749_v57 = vpop.permute.xlu1 %8748  ;;  %v8747_v58 = vpop.permute.xlu0 %8746 }
 0x41f   : > { %18741 = vmatmul.mubr.msk.f32.vlgmr.msra.gmra.mrb[4].mxu1 %vm8764_vm0, %v21617_v54  ;;  %v21626_v59 = vsel %vm1053_vm3, %v8745_v46, %v8747_v58  ;;  %v21629_v60 = vsel %vm1053_vm3, %v8747_v58, %v8749_v57 }
 0x420   : > { %11647 = vrot.lane.b32.xlu1 %v21474_v19, %s20276_s19  ;;  %11649 = vrot.lane.b32.xlu0 %v21476_v22, %s20276_s19 }
 0x421   : > { %18743 = vmatprep.subr.msk.mxu1 %vm8771_vm1, %v21629_v60  ;;  %8858 = vmatprep.mubr.f32.mxu1 %v23719_v0 }
 0x422   : > { %18744 = vmatpush1.msk.msra.mxu1 %vm8771_vm1, %v21626_v59  ;;  %v8753_v12 = vpop.permute.xlu1 %8752  ;;  %v8751_v17 = vpop.permute.xlu0 %8750 }
 0x423   : > { %18742 = vmatmul.mubr.msk.f32.gmra.mrb[6].mxu1 %vm8764_vm0, %v21638_v63  ;;  %v21648_v20 = vsel %vm1053_vm3, %v8751_v17, %v8753_v12  ;;  %v21658_v29 = vsel %vm1053_vm3, %v8749_v57, %v8751_v17 }
 0x424   : > { %12015 = vrot.lane.b32.xlu1 %v21458_v5, %s20277_s29  ;;  %12013 = vrot.lane.b32.xlu0 %v21441_v26, %s20277_s29 }
 0x425   : > { %18747 = vmatprep.subr.msk.mxu1 %vm8771_vm1, %v21648_v20  ;;  %8929 = vmatprep.mubr.f32.mxu1 %v23719_v0 }
 0x426   : > { %v9428_v27 = vpop.permute.xlu1 %9427  ;;  %v8755_v28 = vpop.permute.xlu0 %8754 }
 0x427   : > { %18745 = vmatmul.mubr.msk.f32.vlgmr.msra.gmra.mrb[8].mxu1 %vm8764_vm0, %v21617_v54  ;;  %v21663_v30 = vsel %vm1053_vm3, %v8755_v28, %v8741_v45  ;;  %v21705_v44 = vsel %vm1053_vm3, %v8753_v12, %v8755_v28  ;;  %v21865_v45 = vld [vmem:[%s23709_s3 + $0x40] sm:$0xff] }
 0x428   : > { %18748 = vmatpush1.msk.msra.mxu1 %vm8771_vm1, %v21658_v29  ;;  %11655 = vrot.lane.b32.xlu1 %v21498_v40, %s20276_s19  ;;  %s386_s19 = scalar_lea.vmem %s23717_s11, %s19217_s23 }
 0x429   : > { %12011 = vrot.lane.b32.xlu0 %v21444_v32, %s20277_s29  ;;  %18751 = vmatprep.subr.msk.mxu1 %vm8771_vm1, %v21663_v30 }
 0x42a   : > { %8935 = vmatprep.mubr.f32.mxu1 %v23719_v0  ;;  %v21674_v1 = vpop.permute.xlu1 %9425  ;;  %v21676_v61 = vpop.permute.xlu0 %9429 }
 0x42b   : > { %v21680_v11 = vsel %vm1729_vm5, %v21674_v1, %v9428_v27  ;;  %18746 = vmatmul.mubr.msk.f32.gmra.mrb[10].mxu1 %vm8764_vm0, %v21638_v63  ;;  %v21686_v33 = vsel %vm1729_vm5, %v9428_v27, %v21676_v61 }
 0x42c   : > { %12023 = vrot.lane.b32.xlu1 %v21489_v35, %s20277_s29  ;;  %18773 = vmatprep.subr.msk.mxu0 %vm8771_vm1, %v21686_v33 }
 0x42d   : > { %12021 = vrot.lane.b32.xlu0 %v21487_v34, %s20277_s29  ;;  %9006 = vmatprep.mubr.f32.mxu1 %v23719_v0 }
 0x42e   : > { %18774 = vmatpush1.msk.msra.mxu0 %vm8771_vm1, %v21680_v11  ;;  %v21702_v41 = vpop.permute.xlu1 %9437  ;;  %v9436_v43 = vpop.permute.xlu0 %9435 }
 0x42f   : > { %18749 = vmatmul.mubr.msk.f32.vlgmr.msra.gmra.mrb[12].mxu1 %vm8764_vm0, %v21617_v54  ;;  %18775 = vmatmul.mubr.msk.f32.vlgmr.msra.gmra.mrb[4].mxu0 %vm8764_vm0, %v21695_v37  ;;  %v21713_v7 = vsel %vm1729_vm5, %v9436_v43, %v21702_v41 }
 0x430   : > { %18752 = vmatpush1.msk.msra.mxu1 %vm8771_vm1, %v21705_v44  ;;  %12017 = vrot.lane.b32.xlu1 %v21474_v19, %s20277_s29 }
 0x431   : > { %18759 = vmatprep.subr.msk.mxu1 %vm8771_vm1, %v21474_v19  ;;  %12019 = vrot.lane.b32.xlu0 %v21476_v22, %s20277_s29 }
 0x432   : > { %18781 = vmatprep.subr.msk.mxu0 %vm8771_vm1, %v21713_v7  ;;  %9012 = vmatprep.mubr.f32.mxu1 %v23719_v0  ;;  %v9432_v48 = vpop.permute.xlu1 %9431  ;;  %v9434_v50 = vpop.permute.xlu0 %9433 }
 0x433   : > { %9541 = vmatprep.mubr.f32.mxu0 %v23719_v0  ;;  %18750 = vmatmul.mubr.msk.f32.gmra.mrb[14].mxu1 %vm8764_vm0, %v21638_v63  ;;  %v21735_v51 = vsel %vm1729_vm5, %v9434_v50, %v9436_v43  ;;  %v21798_v3 = vsel %vm1729_vm5, %v9432_v48, %v9434_v50  ;;  %v21826_v25 = vsel %vm1729_vm5, %v21676_v61, %v9432_v48 }
 0x434   : > { %18776 = vmatmul.mubr.msk.f32.gmra.mrb[6].mxu0 %vm8764_vm0, %v21726_v47  ;;  %9083 = vmatprep.mubr.f32.mxu1 %v23719_v0 }
 0x435   : > { %12025 = vrot.lane.b32.xlu0 %v21498_v40, %s20277_s29  ;;  %18782 = vmatpush1.msk.msra.mxu0 %vm8771_vm1, %v21735_v51 }
 0x436   : > { %9689 = vmatprep.mubr.f32.mxu0 %v23719_v0  ;;  %v21745_v52 = vpop.permute.xlu1 %9798  ;;  %v9797_v55 = vpop.permute.xlu0 %9796 }
 0x437   : > { %18753 = vmatmul.mubr.msk.f32.vlgmr.msra.gmra.mrb[16].mxu1 %vm8764_vm0, %v21617_v54  ;;  %v21754_v62 = vsel %vm9810_vm2, %v9797_v55, %v21745_v52 }
 0x438   : > { %18760 = vmatpush1.msk.msra.mxu1 %vm8771_vm1, %v21458_v5  ;;  %18783 = vmatmul.mubr.msk.f32.vlgmr.msra.gmra.mrb[8].mxu0 %vm8764_vm0, %v21695_v37 }
 0x439   : > { %18767 = vmatprep.subr.msk.mxu1 %vm8771_vm1, %v21498_v40  ;;  %17322 = vperm.xlu0 %20040, %v17314_v56  }
 0x43a   : > { %18791 = vmatprep.subr.msk.mxu0 %vm8771_vm1, %v21754_v62  ;;  %9088 = vmatprep.mubr.f32.mxu1 %v23719_v0  ;;  %v9440_v9 = vpop.permute.xlu1 %9439  ;;  %v21765_v10 = vpop.permute.xlu0 %9794 }
 0x43b   : > { %9695 = vmatprep.mubr.f32.mxu0 %v23719_v0  ;;  %18754 = vmatmul.mubr.msk.f32.gmra.mrb[18].mxu1 %vm8764_vm0, %v21638_v63  ;;  %v21772_v15 = vsel %vm9810_vm2, %v21765_v10, %v9797_v55  ;;  %v21836_v38 = vsel %vm1729_vm5, %v9440_v9, %v21674_v1  ;;  %v21871_v54 = vsel %vm1729_vm5, %v21702_v41, %v9440_v9  ;;  %v21893_v63 = vld [vmem:[%s23709_s3 + $0x48] sm:$0xff]  ;;  %vm11657_vm5 = vcmask 474112  }
 0x43c   : > { %18784 = vmatmul.mubr.msk.f32.gmra.mrb[10].mxu0 %vm8764_vm0, %v21726_v47  ;;  %9257 = vmatprep.mubr.f32.mxu1 %v23719_v0 }
 0x43d   : > { %18792 = vmatpush1.msk.msra.mxu0 %vm8771_vm1, %v21772_v15  ;;  %9905 = vmatprep.mubr.f32.mxu0 %v23719_v0 }
 0x43e   : > { %v21785_v21 = vpop.permute.xlu1 %9806  ;;  %v9805_v2 = vpop.permute.xlu0 %9804 }
 0x43f   : > { %18761 = vmatmul.mubr.msk.f32.vlgmr.msra.gmra.mrb[8].mxu1 %vm8764_vm0, %v21449_v36  ;;  %v21791_v4 = vsel %vm9810_vm2, %v9805_v2, %v21785_v21 }
 0x440   : > { %18768 = vmatpush1.msk.msra.mxu1 %vm8771_vm1, %v21489_v35  ;;  %18793 = vmatmul.mubr.msk.f32.vlgmr.msra.gmra.mrb[4].mxu0 %vm8764_vm0, %v21783_v16 }
 0x441   : > { %18777 = vmatprep.subr.msk.mxu1 %vm8771_vm1, %v21798_v3  ;;  %18799 = vmatprep.subr.msk.mxu0 %vm8771_vm1, %v21791_v4 }
 0x442   : > { %9263 = vmatprep.mubr.f32.mxu1 %v23719_v0  ;;  %9911 = vmatprep.mubr.f32.mxu0 %v23719_v0  ;;  %v9801_v13 = vpop.permute.xlu1 %9800  ;;  %v9803_v14 = vpop.permute.xlu0 %9802 }
 0x443   : > { %18762 = vmatmul.mubr.msk.f32.gmra.mrb[10].mxu1 %vm8764_vm0, %v21466_v6  ;;  %v21814_v18 = vsel %vm9810_vm2, %v9803_v14, %v9805_v2  ;;  %v21880_v58 = vsel %vm9810_vm2, %v9801_v13, %v9803_v14  ;;  %v21912_v61 = vsel %vm9810_vm2, %v21745_v52, %v9801_v13  ;;  %v21951_v52 = vld [vmem:[%s23709_s3 + $0x50] sm:$0xff] }
 0x444   : > { %18794 = vmatmul.mubr.msk.f32.gmra.mrb[6].mxu0 %vm8764_vm0, %v21807_v8  ;;  %9411 = vmatprep.mubr.f32.mxu1 %v23719_v0 }
 0x445   : > { %18800 = vmatpush1.msk.msra.mxu0 %vm8771_vm1, %v21814_v18  ;;  %10059 = vmatprep.mubr.f32.mxu0 %v23719_v0 }
 0x446   : > { %v21822_v23 = vpop.permute.xlu1 %10168  ;;  %v10167_v24 = vpop.permute.xlu0 %10166 }
 0x447   : > { %18769 = vmatmul.mubr.msk.f32.vlgmr.msra.gmra.mrb[20].mxu1 %vm8764_vm0, %v21449_v36  ;;  %v21832_v31 = vsel %vm10180_vm6, %v10167_v24, %v21822_v23 }
 0x448   : > { %18778 = vmatpush1.msk.msra.mxu1 %vm8771_vm1, %v21826_v25  ;;  %18801 = vmatmul.mubr.msk.f32.vlgmr.msra.gmra.mrb[8].mxu0 %vm8764_vm0, %v21783_v16 }
 0x449   : > { %18785 = vmatprep.subr.msk.mxu1 %vm8771_vm1, %v21836_v38  ;;  %18809 = vmatprep.subr.msk.mxu0 %vm8771_vm1, %v21832_v31 }
 0x44a   : > { %9416 = vmatprep.mubr.f32.mxu1 %v23719_v0  ;;  %10065 = vmatprep.mubr.f32.mxu0 %v23719_v0  ;;  %v9809_v36 = vpop.permute.xlu1 %9808  ;;  %v21848_v39 = vpop.permute.xlu0 %10164 }
 0x44b   : > { %18770 = vmatmul.mubr.msk.f32.gmra.mrb[22].mxu1 %vm8764_vm0, %v21466_v6  ;;  %v21854_v42 = vsel %vm10180_vm6, %v21848_v39, %v10167_v24  ;;  %v21922_v43 = vsel %vm9810_vm2, %v9809_v36, %v21765_v10  ;;  %v21957_v56 = vsel %vm9810_vm2, %v21785_v21, %v9809_v36  ;;  %v21979_v21 = vld [vmem:[%s23709_s3 + $0x58] sm:$0xff] }
 0x44c   : > { %23750 = vst [vmem:[#allocation2_spill] sm:$0xff] %v21854_v42  ;;  %18802 = vmatmul.mubr.msk.f32.gmra.mrb[10].mxu0 %vm8764_vm0, %v21807_v8  ;;  %9612 = vmatprep.mubr.f32.mxu1 %v23719_v0 }
 0x44d   : > { %18810 = vmatpush1.msk.msra.mxu0 %vm8771_vm1, %v21854_v42  ;;  %10275 = vmatprep.mubr.f32.mxu0 %v23719_v0 }
 0x44e   : > { %v21867_v6 = vpop.permute.xlu1 %10176  ;;  %v10175_v46 = vpop.permute.xlu0 %10174 }
 0x44f   : > { %18779 = vmatmul.mubr.msk.f32.vlgmr.msra.gmra.mrb[8].mxu1 %vm8764_vm0, %v21695_v37  ;;  %v21877_v57 = vsel %vm10180_vm6, %v10175_v46, %v21867_v6 }
 0x450   : > { %18786 = vmatpush1.msk.msra.mxu1 %vm8771_vm1, %v21871_v54  ;;  %18811 = vmatmul.mubr.msk.f32.vlgmr.msra.gmra.mrb[4].mxu0 %vm8764_vm0, %v21865_v45 }
 0x451   : > { %18795 = vmatprep.subr.msk.mxu1 %vm8771_vm1, %v21880_v58  ;;  %18817 = vmatprep.subr.msk.mxu0 %vm8771_vm1, %v21877_v57 }
 0x452   : > { %9618 = vmatprep.mubr.f32.mxu1 %v23719_v0  ;;  %10281 = vmatprep.mubr.f32.mxu0 %v23719_v0  ;;  %v10171_v12 = vpop.permute.xlu1 %10170  ;;  %v10173_v17 = vpop.permute.xlu0 %10172 }
 0x453   : > { %18780 = vmatmul.mubr.msk.f32.gmra.mrb[10].mxu1 %vm8764_vm0, %v21726_v47  ;;  %v21900_v27 = vsel %vm10180_vm6, %v10173_v17, %v10175_v46  ;;  %v21966_v10 = vsel %vm10180_vm6, %v10171_v12, %v10173_v17  ;;  %v21998_v46 = vsel %vm10180_vm6, %v21822_v23, %v10171_v12  ;;  %v22037_v12 = vld [vmem:[%s23709_s3 + $0x60] sm:$0xff] }
 0x454   : > { %18812 = vmatmul.mubr.msk.f32.gmra.mrb[6].mxu0 %vm8764_vm0, %v21893_v63  ;;  %9766 = vmatprep.mubr.f32.mxu1 %v23719_v0  ;;  %23752 = vst [vmem:[#allocation4_spill] sm:$0xff] %v21966_v10 }
 0x455   : > { %18818 = vmatpush1.msk.msra.mxu0 %vm8771_vm1, %v21900_v27  ;;  %10429 = vmatprep.mubr.f32.mxu0 %v23719_v0 }
 0x456   : > { %v21908_v28 = vpop.permute.xlu1 %10538  ;;  %v10537_v1 = vpop.permute.xlu0 %10536 }
 0x457   : > { %18787 = vmatmul.mubr.msk.f32.vlgmr.msra.gmra.mrb[24].mxu1 %vm8764_vm0, %v21695_v37  ;;  %v21918_v41 = vsel %vm3757_vm11, %v10537_v1, %v21908_v28 }
 0x458   : > { %18796 = vmatpush1.msk.msra.mxu1 %vm8771_vm1, %v21912_v61  ;;  %18819 = vmatmul.mubr.msk.f32.vlgmr.msra.gmra.mrb[8].mxu0 %vm8764_vm0, %v21865_v45 }
 0x459   : > { %18803 = vmatprep.subr.msk.mxu1 %vm8771_vm1, %v21922_v43  ;;  %18827 = vmatprep.subr.msk.mxu0 %vm8771_vm1, %v21918_v41 }
 0x45a   : > { %9771 = vmatprep.mubr.f32.mxu1 %v23719_v0  ;;  %10435 = vmatprep.mubr.f32.mxu0 %v23719_v0  ;;  %v10179_v37 = vpop.permute.xlu1 %10178  ;;  %v21934_v48 = vpop.permute.xlu0 %10534 }
 0x45b   : > { %18788 = vmatmul.mubr.msk.f32.gmra.mrb[26].mxu1 %vm8764_vm0, %v21726_v47  ;;  %v21940_v50 = vsel %vm3757_vm11, %v21934_v48, %v10537_v1  ;;  %v22008_v1 = vsel %vm10180_vm6, %v10179_v37, %v21848_v39 }
 0x45c   : > { %23751 = vst [vmem:[#allocation3_spill] sm:$0xff] %v21940_v50  ;;  %18820 = vmatmul.mubr.msk.f32.gmra.mrb[10].mxu0 %vm8764_vm0, %v21893_v63  ;;  %9982 = vmatprep.mubr.f32.mxu1 %v23719_v0  ;;  %23755 = vst [vmem:[#allocation7_spill] sm:$0xff] %v22008_v1 }
 0x45d   : > { %18828 = vmatpush1.msk.msra.mxu0 %vm8771_vm1, %v21940_v50  ;;  %10644 = vmatprep.mubr.f32.mxu0 %v23719_v0 }
 0x45e   : > { %v21953_v47 = vpop.permute.xlu1 %10546  ;;  %v10545_v55 = vpop.permute.xlu0 %10544 }
 0x45f   : > { %18797 = vmatmul.mubr.msk.f32.vlgmr.msra.gmra.mrb[8].mxu1 %vm8764_vm0, %v21783_v16  ;;  %v21963_v9 = vsel %vm3757_vm11, %v10545_v55, %v21953_v47 }
 0x460   : > { %18804 = vmatpush1.msk.msra.mxu1 %vm8771_vm1, %v21957_v56  ;;  %18829 = vmatmul.mubr.msk.f32.vlgmr.msra.gmra.mrb[4].mxu0 %vm8764_vm0, %v21951_v52 }
 0x461   : > { %18813 = vmatprep.subr.msk.mxu1 %vm8771_vm1, %v21966_v10  ;;  %18835 = vmatprep.subr.msk.mxu0 %vm8771_vm1, %v21963_v9 }
 0x462   : > { %9988 = vmatprep.mubr.f32.mxu1 %v23719_v0  ;;  %10650 = vmatprep.mubr.f32.mxu0 %v23719_v0  ;;  %v10541_v2 = vpop.permute.xlu1 %10540  ;;  %v10543_v13 = vpop.permute.xlu0 %10542 }
 0x463   : > { %18798 = vmatmul.mubr.msk.f32.gmra.mrb[10].mxu1 %vm8764_vm0, %v21807_v8  ;;  %v21986_v14 = vsel %vm3757_vm11, %v10543_v13, %v10545_v55 }
 0x464   : > { %23753 = vst [vmem:[#allocation5_spill] sm:$0xff] %v21986_v14  ;;  %18830 = vmatmul.mubr.msk.f32.gmra.mrb[6].mxu0 %vm8764_vm0, %v21979_v21  ;;  %10136 = vmatprep.mubr.f32.mxu1 %v23719_v0 }
 0x465   : > { %18836 = vmatpush1.msk.msra.mxu0 %vm8771_vm1, %v21986_v14  ;;  %10798 = vmatprep.mubr.f32.mxu0 %v23719_v0 }
 0x466   : > { %v21994_v24 = vpop.permute.xlu1 %10907  ;;  %v10906_v36 = vpop.permute.xlu0 %10905 }
 0x467   : > { %18805 = vmatmul.mubr.msk.f32.vlgmr.msra.gmra.mrb[28].mxu1 %vm8764_vm0, %v21783_v16  ;;  %v22004_v17 = vsel %vm4433_vm13, %v10906_v36, %v21994_v24 }
 0x468   : > { %23754 = vst [vmem:[#allocation6_spill] sm:$0xff] %v22004_v17  ;;  %18814 = vmatpush1.msk.msra.mxu1 %vm8771_vm1, %v21998_v46  ;;  %18837 = vmatmul.mubr.msk.f32.vlgmr.msra.gmra.mrb[8].mxu0 %vm8764_vm0, %v21951_v52 }
 0x469   : > { %18821 = vmatprep.subr.msk.mxu1 %vm8771_vm1, %v22008_v1  ;;  %18845 = vmatprep.subr.msk.mxu0 %vm8771_vm1, %v22004_v17  ;;  %v22084_v1 = vsel %vm3757_vm11, %v21908_v28, %v10541_v2 }
 0x46a   : > { %10141 = vmatprep.mubr.f32.mxu1 %v23719_v0  ;;  %10804 = vmatprep.mubr.f32.mxu0 %v23719_v0  ;;  %v10549_v16 = vpop.permute.xlu1 %10548  ;;  %v22020_v23 = vpop.permute.xlu0 %10903 }
 0x46b   : > { %18806 = vmatmul.mubr.msk.f32.gmra.mrb[30].mxu1 %vm8764_vm0, %v21807_v8  ;;  %v22026_v39 = vsel %vm4433_vm13, %v22020_v23, %v10906_v36  ;;  %v22043_v36 = vsel %vm10180_vm6, %v21867_v6, %v10179_v37  ;;  %v22065_v6 = vld [vmem:[%s23709_s3 + $0x68] sm:$0xff]  ;;  %v23759_v37 = vmov 0.0   ;;  %v22094_v42 = vsel %vm3757_vm11, %v10549_v16, %v21934_v48 }
 0x46c   : > { %23756 = vst [vmem:[#allocation8_spill] sm:$0xff] %v22026_v39  ;;  %18838 = vmatmul.mubr.msk.f32.gmra.mrb[10].mxu0 %vm8764_vm0, %v21979_v21  ;;  %10352 = vmatprep.mubr.f32.mxu1 %v23719_v0  ;;  %23762 = vst [vmem:[#allocation13_spill] sm:$0xff] %v22094_v42 }
 0x46d   : > { %18846 = vmatpush1.msk.msra.mxu0 %vm8771_vm1, %v22026_v39  ;;  %11013 = vmatprep.mubr.f32.mxu0 %v23719_v0  ;;  %v22052_v0 = vsel %vm3757_vm11, %v10541_v2, %v10543_v13  ;;  %v22123_v2 = vld [vmem:[%s23709_s3 + $0x70] sm:$0xff] }
 0x46e   : > { %v22039_v8 = vpop.permute.xlu1 %10915  ;;  %v10914_v55 = vpop.permute.xlu0 %10913  ;;  %23758 = vst [vmem:[#allocation10_spill] sm:$0xff] %v22052_v0 }
 0x46f   : > { %18815 = vmatmul.mubr.msk.f32.vlgmr.msra.gmra.mrb[8].mxu1 %vm8764_vm0, %v21865_v45  ;;  %v22049_v39 = vsel %vm4433_vm13, %v10914_v55, %v22039_v8 }
 0x470   : > { %23757 = vst [vmem:[#allocation9_spill] sm:$0xff] %v22049_v39  ;;  %18822 = vmatpush1.msk.msra.mxu1 %vm8771_vm1, %v22043_v36  ;;  %18847 = vmatmul.mubr.msk.f32.vlgmr.msra.gmra.mrb[4].mxu0 %vm8764_vm0, %v22037_v12 }
 0x471   : > { %18831 = vmatprep.subr.msk.mxu1 %vm8771_vm1, %v22052_v0  ;;  %18853 = vmatprep.subr.msk.mxu0 %vm8771_vm1, %v22049_v39 }
 0x472   : > { %10358 = vmatprep.mubr.f32.mxu1 %v23759_v37  ;;  %11019 = vmatprep.mubr.f32.mxu0 %v23759_v37  ;;  %v10910_v13 = vpop.permute.xlu1 %10909  ;;  %v10912_v50 = vpop.permute.xlu0 %10911 }
 0x473   : > { %18816 = vmatmul.mubr.msk.f32.gmra.mrb[10].mxu1 %vm8764_vm0, %v21893_v63  ;;  %v22072_v14 = vsel %vm4433_vm13, %v10912_v50, %v10914_v55  ;;  %v22170_v17 = vsel %vm4433_vm13, %v21994_v24, %v10910_v13 }
 0x474   : > { %23760 = vst [vmem:[#allocation11_spill] sm:$0xff] %v22072_v14  ;;  %18848 = vmatmul.mubr.msk.f32.gmra.mrb[6].mxu0 %vm8764_vm0, %v22065_v6  ;;  %10506 = vmatprep.mubr.f32.mxu1 %v23759_v37  ;;  %23767 = vst [vmem:[#allocation18_spill] sm:$0xff] %v22170_v17 }
 0x475   : > { %18854 = vmatpush1.msk.msra.mxu0 %vm8771_vm1, %v22072_v14  ;;  %11167 = vmatprep.mubr.f32.mxu0 %v23759_v37 }
 0x476   : > { %v22080_v0 = vpop.permute.xlu1 %11276  ;;  %v11275_v39 = vpop.permute.xlu0 %11274 }
 0x477   : > { %18823 = vmatmul.mubr.msk.f32.vlgmr.msra.gmra.mrb[32].mxu1 %vm8764_vm0, %v21865_v45  ;;  %v22090_v55 = vsel %vm5109_vm15, %v11275_v39, %v22080_v0 }
 0x478   : > { %23761 = vst [vmem:[#allocation12_spill] sm:$0xff] %v22090_v55  ;;  %18832 = vmatpush1.msk.msra.mxu1 %vm8771_vm1, %v22084_v1  ;;  %18855 = vmatmul.mubr.msk.f32.vlgmr.msra.gmra.mrb[8].mxu0 %vm8764_vm0, %v22037_v12 }
 0x479   : > { %18839 = vmatprep.subr.msk.mxu1 %vm8771_vm1, %v22094_v42  ;;  %18863 = vmatprep.subr.msk.mxu0 %vm8771_vm1, %v22090_v55  ;;  %v22138_v42 = vsel %vm4433_vm13, %v10910_v13, %v10912_v50  ;;  %v22209_v13 = vld [vmem:[%s23709_s3 + $0x80] sm:$0xff] }
 0x47a   : > { %10511 = vmatprep.mubr.f32.mxu1 %v23759_v37  ;;  %11173 = vmatprep.mubr.f32.mxu0 %v23759_v37  ;;  %v10918_v45 = vpop.permute.xlu1 %10917  ;;  %v22106_v28 = vpop.permute.xlu0 %11272  ;;  %23765 = vst [vmem:[#allocation16_spill] sm:$0xff] %v22138_v42 }
 0x47b   : > { %18824 = vmatmul.mubr.msk.f32.gmra.mrb[34].mxu1 %vm8764_vm0, %v21893_v63  ;;  %v22112_v48 = vsel %vm5109_vm15, %v22106_v28, %v11275_v39  ;;  %v22129_v39 = vsel %vm3757_vm11, %v21953_v47, %v10549_v16  ;;  %v22151_v47 = vld [vmem:[%s23709_s3 + $0x78] sm:$0xff]  ;;  %v22180_v10 = vsel %vm4433_vm13, %v10918_v45, %v22020_v23 }
 0x47c   : > { %23763 = vst [vmem:[#allocation14_spill] sm:$0xff] %v22112_v48  ;;  %18856 = vmatmul.mubr.msk.f32.gmra.mrb[10].mxu0 %vm8764_vm0, %v22065_v6  ;;  %10721 = vmatprep.mubr.f32.mxu1 %v23759_v37  ;;  %23769 = vst [vmem:[#allocation20_spill] sm:$0xff] %v22180_v10 }
 0x47d   : > { %18864 = vmatpush1.msk.msra.mxu0 %vm8771_vm1, %v22112_v48  ;;  %11382 = vmatprep.mubr.f32.mxu0 %v23759_v37 }
 0x47e   : > { %v22125_v63 = vpop.permute.xlu1 %11284  ;;  %v11283_v14 = vpop.permute.xlu0 %11282 }
 0x47f   : > { %18833 = vmatmul.mubr.msk.f32.vlgmr.msra.gmra.mrb[8].mxu1 %vm8764_vm0, %v21951_v52  ;;  %v22135_v48 = vsel %vm5109_vm15, %v11283_v14, %v22125_v63 }
 0x480   : > { %23764 = vst [vmem:[#allocation15_spill] sm:$0xff] %v22135_v48  ;;  %18840 = vmatpush1.msk.msra.mxu1 %vm8771_vm1, %v22129_v39  ;;  %18865 = vmatmul.mubr.msk.f32.vlgmr.msra.gmra.mrb[4].mxu0 %vm8764_vm0, %v22123_v2 }
 0x481   : > { %18849 = vmatprep.subr.msk.mxu1 %vm8771_vm1, %v22138_v42  ;;  %18871 = vmatprep.subr.msk.mxu0 %vm8771_vm1, %v22135_v48 }
 0x482   : > { %10727 = vmatprep.mubr.f32.mxu1 %v23759_v37  ;;  %11388 = vmatprep.mubr.f32.mxu0 %v23759_v37  ;;  %v11279_v50 = vpop.permute.xlu1 %11278  ;;  %v11281_v16 = vpop.permute.xlu0 %11280 }
 0x483   : > { %18834 = vmatmul.mubr.msk.f32.gmra.mrb[10].mxu1 %vm8764_vm0, %v21979_v21  ;;  %v22158_v55 = vsel %vm5109_vm15, %v11281_v16, %v11283_v14 }
 0x484   : > { %23766 = vst [vmem:[#allocation17_spill] sm:$0xff] %v22158_v55  ;;  %18866 = vmatmul.mubr.msk.f32.gmra.mrb[6].mxu0 %vm8764_vm0, %v22151_v47  ;;  %10875 = vmatprep.mubr.f32.mxu1 %v23759_v37 }
 0x485   : > { %18872 = vmatpush1.msk.msra.mxu0 %vm8771_vm1, %v22158_v55  ;;  %11536 = vmatprep.mubr.f32.mxu0 %v23759_v37 }
 0x486   : > { %v22166_v42 = vpop.permute.xlu1 %11645  ;;  %v11644_v48 = vpop.permute.xlu0 %11643 }
 0x487   : > { %18841 = vmatmul.mubr.msk.f32.vlgmr.msra.gmra.mrb[36].mxu1 %vm8764_vm0, %v21951_v52  ;;  %v22176_v14 = vsel %vm11657_vm5, %v11644_v48, %v22166_v42 }
 0x488   : > { %23768 = vst [vmem:[#allocation19_spill] sm:$0xff] %v22176_v14  ;;  %18850 = vmatpush1.msk.msra.mxu1 %vm8771_vm1, %v22170_v17  ;;  %18873 = vmatmul.mubr.msk.f32.vlgmr.msra.gmra.mrb[8].mxu0 %vm8764_vm0, %v22123_v2 }
 0x489   : > { %18857 = vmatprep.subr.msk.mxu1 %vm8771_vm1, %v22180_v10  ;;  %18881 = vmatprep.subr.msk.mxu0 %vm8771_vm1, %v22176_v14  ;;  %v22224_v10 = vsel %vm5109_vm15, %v11279_v50, %v11281_v16 }
 0x48a   : > { %10880 = vmatprep.mubr.f32.mxu1 %v23759_v37  ;;  %11542 = vmatprep.mubr.f32.mxu0 %v23759_v37  ;;  %v11287_v52 = vpop.permute.xlu1 %11286  ;;  %v22192_v24 = vpop.permute.xlu0 %11641  ;;  %23773 = vst [vmem:[#allocation24_spill] sm:$0xff] %v22224_v10 }
 0x48b   : > { %18842 = vmatmul.mubr.msk.f32.gmra.mrb[38].mxu1 %vm8764_vm0, %v21979_v21  ;;  %v22198_v23 = vsel %vm11657_vm5, %v22192_v24, %v11644_v48  ;;  %v22215_v48 = vsel %vm4433_vm13, %v22039_v8, %v10918_v45  ;;  %v22237_v8 = vld [vmem:[%s23709_s3 + $0x88] sm:$0xff]  ;;  %v22266_v17 = vsel %vm5109_vm15, %v11287_v52, %v22106_v28  ;;  %vm18259_vm13 = vcmask 687104  }
 0x48c   : > { %23770 = vst [vmem:[#allocation21_spill] sm:$0xff] %v22198_v23  ;;  %18874 = vmatmul.mubr.msk.f32.gmra.mrb[10].mxu0 %vm8764_vm0, %v22151_v47  ;;  %11090 = vmatprep.mubr.f32.mxu1 %v23759_v37  ;;  %23771 = vst [vmem:[#allocation22_spill] sm:$0xff] %v22215_v48 }
 0x48d   : > { %18882 = vmatpush1.msk.msra.mxu0 %vm8771_vm1, %v22198_v23  ;;  %11752 = vmatprep.mubr.f32.mxu0 %v23759_v37  ;;  %23775 = vst [vmem:[#allocation26_spill] sm:$0xff] %v22266_v17 }
 0x48e   : > { %v22211_v21 = vpop.permute.xlu1 %11653  ;;  %v11652_v55 = vpop.permute.xlu0 %11651 }
 0x48f   : > { %18851 = vmatmul.mubr.msk.f32.vlgmr.msra.gmra.mrb[8].mxu1 %vm8764_vm0, %v22037_v12  ;;  %v22221_v23 = vsel %vm11657_vm5, %v11652_v55, %v22211_v21 }
 0x490   : > { %23772 = vst [vmem:[#allocation23_spill] sm:$0xff] %v22221_v23  ;;  %18858 = vmatpush1.msk.msra.mxu1 %vm8771_vm1, %v22215_v48  ;;  %18883 = vmatmul.mubr.msk.f32.vlgmr.msra.gmra.mrb[4].mxu0 %vm8764_vm0, %v22209_v13  ;;  %v22256_v48 = vsel %vm5109_vm15, %v22080_v0, %v11279_v50 }
 0x491   : > { %18867 = vmatprep.subr.msk.mxu1 %vm8771_vm1, %v22224_v10  ;;  %18889 = vmatprep.subr.msk.mxu0 %vm8771_vm1, %v22221_v23 }
 0x492   : > { %11096 = vmatprep.mubr.f32.mxu1 %v23759_v37  ;;  %11758 = vmatprep.mubr.f32.mxu0 %v23759_v37  ;;  %v11648_v45 = vpop.permute.xlu1 %11647  ;;  %v11650_v16 = vpop.permute.xlu0 %11649 }
 0x493   : > { %18852 = vmatmul.mubr.msk.f32.gmra.mrb[10].mxu1 %vm8764_vm0, %v22065_v6  ;;  %v22244_v14 = vsel %vm11657_vm5, %v11650_v16, %v11652_v55 }
 0x494   : > { %23774 = vst [vmem:[#allocation25_spill] sm:$0xff] %v22244_v14  ;;  %18884 = vmatmul.mubr.msk.f32.gmra.mrb[6].mxu0 %vm8764_vm0, %v22237_v8  ;;  %11244 = vmatprep.mubr.f32.mxu1 %v23759_v37 }
 0x495   : > { %18890 = vmatpush1.msk.msra.mxu0 %vm8771_vm1, %v22244_v14  ;;  %11906 = vmatprep.mubr.f32.mxu0 %v23759_v37  ;;  %v22301_v14 = vsel %vm5109_vm15, %v22125_v63, %v11287_v52  ;;  %v22323_v63 = vld [vmem:[%s23709_s3 + $0x98] sm:$0xff]  ;;  %vm18347_vm15 = vcmask 4096  }
 0x496   : > { %v22252_v10 = vpop.permute.xlu1 %12015  ;;  %v12014_v23 = vpop.permute.xlu0 %12013 }
 0x497   : > { %18859 = vmatmul.mubr.msk.f32.vlgmr.msra.gmra.mrb[40].mxu1 %vm8764_vm0, %v22037_v12  ;;  %v22262_v55 = vsel %vm12027_vm12, %v12014_v23, %v22252_v10 }
 0x498   : > { %18868 = vmatpush1.msk.msra.mxu1 %vm8771_vm1, %v22256_v48  ;;  %18891 = vmatmul.mubr.msk.f32.vlgmr.msra.gmra.mrb[8].mxu0 %vm8764_vm0, %v22209_v13 }
 0x499   : > { %18875 = vmatprep.subr.msk.mxu1 %vm8771_vm1, %v22266_v17  ;;  %18899 = vmatprep.subr.msk.mxu0 %vm8771_vm1, %v22262_v55  ;;  %v22306_v17 = vsel %vm11657_vm5, %v11648_v45, %v11650_v16 }
 0x49a   : > { %11249 = vmatprep.mubr.f32.mxu1 %v23759_v37  ;;  %11912 = vmatprep.mubr.f32.mxu0 %v23759_v37  ;;  %v11656_v0 = vpop.permute.xlu1 %11655  ;;  %23777 = vst [vmem:[#allocation28_spill] sm:$0xff] %v22306_v17 }
 0x49b   : > { %18860 = vmatmul.mubr.msk.f32.gmra.mrb[42].mxu1 %vm8764_vm0, %v22065_v6  ;;  %v22280_v12 = vpop.permute.xlu0 %12011  ;;  %v22295_v6 = vld [vmem:[%s23709_s3 + $0x90] sm:$0xff] }
 0x49c   : > { %18892 = vmatmul.mubr.msk.f32.gmra.mrb[10].mxu0 %vm8764_vm0, %v22237_v8  ;;  %v22286_v28 = vsel %vm12027_vm12, %v22280_v12, %v12014_v23  ;;  %11459 = vmatprep.mubr.f32.mxu1 %v23759_v37 }
 0x49d   : > { %23776 = vst [vmem:[#allocation27_spill] sm:$0xff] %v22286_v28  ;;  %18900 = vmatpush1.msk.msra.mxu0 %vm8771_vm1, %v22286_v28  ;;  %12122 = vmatprep.mubr.f32.mxu0 %v23759_v37 }
 0x49e   : > { %v22297_v50 = vpop.permute.xlu1 %12023 }
 0x49f   : > { %18869 = vmatmul.mubr.msk.f32.vlgmr.msra.gmra.mrb[8].mxu1 %vm8764_vm0, %v22123_v2  ;;  %v12022_v23 = vpop.permute.xlu0 %12021 }
 0x4a0   : > { %18876 = vmatpush1.msk.msra.mxu1 %vm8771_vm1, %v22301_v14  ;;  %18901 = vmatmul.mubr.msk.f32.vlgmr.msra.gmra.mrb[4].mxu0 %vm8764_vm0, %v22295_v6  ;;  %v22314_v28 = vsel %vm12027_vm12, %v12022_v23, %v22297_v50 }
 0x4a1   : > { %18885 = vmatprep.subr.msk.mxu1 %vm8771_vm1, %v22306_v17  ;;  %18907 = vmatprep.subr.msk.mxu0 %vm8771_vm1, %v22314_v28  ;;  %v22342_v17 = vsel %vm11657_vm5, %v22166_v42, %v11648_v45 }
 0x4a2   : > { %11465 = vmatprep.mubr.f32.mxu1 %v23759_v37  ;;  %12128 = vmatprep.mubr.f32.mxu0 %v23759_v37  ;;  %v12018_v42 = vpop.permute.xlu1 %12017 }
 0x4a3   : > { %18870 = vmatmul.mubr.msk.f32.gmra.mrb[10].mxu1 %vm8764_vm0, %v22151_v47  ;;  %v12020_v52 = vpop.permute.xlu0 %12019 }
 0x4a4   : > { %18902 = vmatmul.mubr.msk.f32.gmra.mrb[6].mxu0 %vm8764_vm0, %v22323_v63  ;;  %v22332_v16 = vsel %vm12027_vm12, %v12020_v52, %v12022_v23  ;;  %11613 = vmatprep.mubr.f32.mxu1 %v23759_v37  ;;  %v22348_v23 = vsel %vm11657_vm5, %v11656_v0, %v22192_v24  ;;  %v22375_v24 = vsel %vm11657_vm5, %v22211_v21, %v11656_v0  ;;  %v22393_v21 = vld [vmem:[%s23709_s3 + $0xa8] sm:$0xff] }
 0x4a5   : > { %18908 = vmatpush1.msk.msra.mxu0 %vm8771_vm1, %v22332_v16  ;;  %12276 = vmatprep.mubr.f32.mxu0 %v23759_v37  ;;  %v22407_v0 = vsel %vm12027_vm12, %v22252_v10, %v12018_v42  ;;  %v22436_v10 = vld [vmem:[%s23709_s3 + $0xb0] sm:$0xff] }
 0x4a6   : > { %18917 = vmatprep.subr.msk.mxu0 %vm8771_vm1, %v21458_v5 }
 0x4a7   : > { %18877 = vmatmul.mubr.msk.f32.vlgmr.msra.gmra.mrb[44].mxu1 %vm8764_vm0, %v22123_v2  ;;  %v22371_v2 = vld [vmem:[%s23709_s3 + $0xa0] sm:$0xff]  ;;  %v12026_v45 = vpop.permute.xlu0 %12025 }
 0x4a8   : > { %18886 = vmatpush1.msk.msra.mxu1 %vm8771_vm1, %v22342_v17  ;;  %18909 = vmatmul.mubr.msk.f32.vlgmr.msra.gmra.mrb[8].mxu0 %vm8764_vm0, %v22295_v6 }
 0x4a9   : > { %18918 = vmatpush1.msk.msra.mxu0 %vm8771_vm1, %v21441_v26  ;;  %18893 = vmatprep.subr.msk.mxu1 %vm8771_vm1, %v22348_v23 }
 0x4aa   : > { %18925 = vmatprep.subr.msk.mxu0 %vm8771_vm1, %v21489_v35  ;;  %11618 = vmatprep.mubr.f32.mxu1 %v23759_v37 }
 0x4ab   : > { %12282 = vmatprep.mubr.f32.mxu0 %v23759_v37  ;;  %18878 = vmatmul.mubr.msk.f32.gmra.mrb[46].mxu1 %vm8764_vm0, %v22151_v47  ;;  %v22380_v47 = vsel %vm12027_vm12, %v12018_v42, %v12020_v52  ;;  %v22413_v52 = vsel %vm12027_vm12, %v12026_v45, %v22280_v12  ;;  %v22490_v12 = vld [vmem:[%s23709_s3 + $0xc0] sm:$0xff] }
 0x4ac   : > { %18910 = vmatmul.mubr.msk.f32.gmra.mrb[10].mxu0 %vm8764_vm0, %v22323_v63  ;;  %11829 = vmatprep.mubr.f32.mxu1 %v23759_v37  ;;  %v22590_v42 = vld [vmem:[%s23709_s3 + $0xe0] sm:$0xff] }
 0x4ad   : > { %12451 = vmatprep.mubr.f32.mxu0 %v23759_v37 }
 0x4af   : > { %18887 = vmatmul.mubr.msk.f32.vlgmr.msra.gmra.mrb[8].mxu1 %vm8764_vm0, %v22209_v13 }
 0x4b0   : > { %18894 = vmatpush1.msk.msra.mxu1 %vm8771_vm1, %v22375_v24  ;;  %18919 = vmatmul.mubr.msk.f32.vlgmr.msra.gmra.mrb[4].mxu0 %vm8764_vm0, %v22371_v2 }
 0x4b1   : > { %18926 = vmatpush1.msk.msra.mxu0 %vm8771_vm1, %v21487_v34  ;;  %18903 = vmatprep.subr.msk.mxu1 %vm8771_vm1, %v22380_v47 }
 0x4b2   : > { %18935 = vmatprep.subr.msk.mxu0 %vm8771_vm1, %v21626_v59  ;;  %11835 = vmatprep.mubr.f32.mxu1 %v23759_v37 }
 0x4b3   : > { %12457 = vmatprep.mubr.f32.mxu0 %v23759_v37  ;;  %18888 = vmatmul.mubr.msk.f32.gmra.mrb[10].mxu1 %vm8764_vm0, %v22237_v8 }
 0x4b4   : > { %18920 = vmatmul.mubr.msk.f32.gmra.mrb[6].mxu0 %vm8764_vm0, %v22393_v21  ;;  %11983 = vmatprep.mubr.f32.mxu1 %v23759_v37 }
 0x4b5   : > { %12605 = vmatprep.mubr.f32.mxu0 %v23759_v37 }
 0x4b7   : > { %18895 = vmatmul.mubr.msk.f32.vlgmr.msra.gmra.mrb[48].mxu1 %vm8764_vm0, %v22209_v13  ;;  %v22440_v13 = vsel %vm12027_vm12, %v22297_v50, %v12026_v45  ;;  %v22540_v50 = vld [vmem:[%s23709_s3 + $0xd0] sm:$0xff] }
 0x4b8   : > { %18904 = vmatpush1.msk.msra.mxu1 %vm8771_vm1, %v22407_v0  ;;  %18927 = vmatmul.mubr.msk.f32.vlgmr.msra.gmra.mrb[8].mxu0 %vm8764_vm0, %v22371_v2 }
 0x4b9   : > { %18936 = vmatpush1.msk.msra.mxu0 %vm8771_vm1, %v21608_v53  ;;  %18911 = vmatprep.subr.msk.mxu1 %vm8771_vm1, %v22413_v52 }
 0x4ba   : > { %18943 = vmatprep.subr.msk.mxu0 %vm8771_vm1, %v21705_v44  ;;  %11988 = vmatprep.mubr.f32.mxu1 %v23759_v37 }
 0x4bb   : > { %12611 = vmatprep.mubr.f32.mxu0 %v23759_v37  ;;  %18896 = vmatmul.mubr.msk.f32.gmra.mrb[50].mxu1 %vm8764_vm0, %v22237_v8  ;;  %v22455_v8 = vld [vmem:[%s23709_s3 + $0xb8] sm:$0xff] }
 0x4bc   : > { %18928 = vmatmul.mubr.msk.f32.gmra.mrb[10].mxu0 %vm8764_vm0, %v22393_v21  ;;  %12199 = vmatprep.mubr.f32.mxu1 %v23759_v37 }
 0x4bd   : > { %12780 = vmatprep.mubr.f32.mxu0 %v23759_v37 }
 0x4bf   : > { %18905 = vmatmul.mubr.msk.f32.vlgmr.msra.gmra.mrb[8].mxu1 %vm8764_vm0, %v22295_v6 }
 0x4c0   : > { %18912 = vmatpush1.msk.msra.mxu1 %vm8771_vm1, %v22440_v13  ;;  %18937 = vmatmul.mubr.msk.f32.vlgmr.msra.gmra.mrb[4].mxu0 %vm8764_vm0, %v22436_v10 }
 0x4c1   : > { %18944 = vmatpush1.msk.msra.mxu0 %vm8771_vm1, %v21648_v20  ;;  %18921 = vmatprep.subr.msk.mxu1 %vm8771_vm1, %v21476_v22 }
 0x4c2   : > { %18953 = vmatprep.subr.msk.mxu0 %vm8771_vm1, %v21826_v25  ;;  %12205 = vmatprep.mubr.f32.mxu1 %v23759_v37 }
 0x4c3   : > { %12786 = vmatprep.mubr.f32.mxu0 %v23759_v37  ;;  %18906 = vmatmul.mubr.msk.f32.gmra.mrb[10].mxu1 %vm8764_vm0, %v22323_v63 }
 0x4c4   : > { %18938 = vmatmul.mubr.msk.f32.gmra.mrb[6].mxu0 %vm8764_vm0, %v22455_v8  ;;  %12353 = vmatprep.mubr.f32.mxu1 %v23759_v37 }
 0x4c5   : > { %12934 = vmatprep.mubr.f32.mxu0 %v23759_v37 }
 0x4c7   : > { %18913 = vmatmul.mubr.msk.f32.vlgmr.msra.gmra.mrb[52].mxu1 %vm8764_vm0, %v22295_v6  ;;  %v22505_v6 = vld [vmem:[%s23709_s3 + $0xc8] sm:$0xff] }
 0x4c8   : > { %18922 = vmatpush1.msk.msra.mxu1 %vm8771_vm1, %v21474_v19  ;;  %18945 = vmatmul.mubr.msk.f32.vlgmr.msra.gmra.mrb[8].mxu0 %vm8764_vm0, %v22436_v10 }
 0x4c9   : > { %18954 = vmatpush1.msk.msra.mxu0 %vm8771_vm1, %v21686_v33  ;;  %18929 = vmatprep.subr.msk.mxu1 %vm8771_vm1, %v21444_v32 }
 0x4ca   : > { %18961 = vmatprep.subr.msk.mxu0 %vm8771_vm1, %v21871_v54  ;;  %12358 = vmatprep.mubr.f32.mxu1 %v23759_v37 }
 0x4cb   : > { %12940 = vmatprep.mubr.f32.mxu0 %v23759_v37  ;;  %18914 = vmatmul.mubr.msk.f32.gmra.mrb[54].mxu1 %vm8764_vm0, %v22323_v63  ;;  %v22555_v63 = vld [vmem:[%s23709_s3 + $0xd8] sm:$0xff] }
 0x4cc   : > { %18946 = vmatmul.mubr.msk.f32.gmra.mrb[10].mxu0 %vm8764_vm0, %v22455_v8  ;;  %12528 = vmatprep.mubr.f32.mxu1 %v23759_v37 }
 0x4cd   : > { %13109 = vmatprep.mubr.f32.mxu0 %v23759_v37 }
 0x4cf   : > { %18923 = vmatmul.mubr.msk.f32.vlgmr.msra.gmra.mrb[8].mxu1 %vm8764_vm0, %v22371_v2 }
 0x4d0   : > { %18930 = vmatpush1.msk.msra.mxu1 %vm8771_vm1, %v21498_v40  ;;  %18955 = vmatmul.mubr.msk.f32.vlgmr.msra.gmra.mrb[4].mxu0 %vm8764_vm0, %v22490_v12 }
 0x4d1   : > { %18962 = vmatpush1.msk.msra.mxu0 %vm8771_vm1, %v21713_v7  ;;  %18939 = vmatprep.subr.msk.mxu1 %vm8771_vm1, %v21658_v29 }
 0x4d2   : > { %18971 = vmatprep.subr.msk.mxu0 %vm8771_vm1, %v21912_v61  ;;  %12534 = vmatprep.mubr.f32.mxu1 %v23759_v37 }
 0x4d3   : > { %13115 = vmatprep.mubr.f32.mxu0 %v23759_v37  ;;  %18924 = vmatmul.mubr.msk.f32.gmra.mrb[10].mxu1 %vm8764_vm0, %v22393_v21 }
 0x4d4   : > { %18956 = vmatmul.mubr.msk.f32.gmra.mrb[6].mxu0 %vm8764_vm0, %v22505_v6  ;;  %12682 = vmatprep.mubr.f32.mxu1 %v23759_v37 }
 0x4d5   : > { %13263 = vmatprep.mubr.f32.mxu0 %v23759_v37 }
 0x4d7   : > { %18931 = vmatmul.mubr.msk.f32.vlgmr.msra.gmra.mrb[56].mxu1 %vm8764_vm0, %v22371_v2  ;;  %v22605_v2 = vld [vmem:[%s23709_s3 + $0xe8] sm:$0xff] }
 0x4d8   : > { %18940 = vmatpush1.msk.msra.mxu1 %vm8771_vm1, %v21629_v60  ;;  %18963 = vmatmul.mubr.msk.f32.vlgmr.msra.gmra.mrb[8].mxu0 %vm8764_vm0, %v22490_v12 }
 0x4d9   : > { %18972 = vmatpush1.msk.msra.mxu0 %vm8771_vm1, %v21754_v62  ;;  %18947 = vmatprep.subr.msk.mxu1 %vm8771_vm1, %v21605_v49 }
 0x4da   : > { %18979 = vmatprep.subr.msk.mxu0 %vm8771_vm1, %v21957_v56  ;;  %12687 = vmatprep.mubr.f32.mxu1 %v23759_v37 }
 0x4db   : > { %13269 = vmatprep.mubr.f32.mxu0 %v23759_v37  ;;  %18932 = vmatmul.mubr.msk.f32.gmra.mrb[58].mxu1 %vm8764_vm0, %v22393_v21 }
 0x4dc   : > { %18964 = vmatmul.mubr.msk.f32.gmra.mrb[10].mxu0 %vm8764_vm0, %v22505_v6  ;;  %12857 = vmatprep.mubr.f32.mxu1 %v23759_v37 }
 0x4dd   : > { %13438 = vmatprep.mubr.f32.mxu0 %v23759_v37 }
 0x4df   : > { %18941 = vmatmul.mubr.msk.f32.vlgmr.msra.gmra.mrb[8].mxu1 %vm8764_vm0, %v22436_v10 }
 0x4e0   : > { %18948 = vmatpush1.msk.msra.mxu1 %vm8771_vm1, %v21663_v30  ;;  %18973 = vmatmul.mubr.msk.f32.vlgmr.msra.gmra.mrb[4].mxu0 %vm8764_vm0, %v22540_v50 }
 0x4e1   : > { %18980 = vmatpush1.msk.msra.mxu0 %vm8771_vm1, %v21791_v4  ;;  %18957 = vmatprep.subr.msk.mxu1 %vm8771_vm1, %v21735_v51 }
 0x4e2   : > { %18989 = vmatprep.subr.msk.mxu0 %vm8771_vm1, %v21998_v46  ;;  %12863 = vmatprep.mubr.f32.mxu1 %v23759_v37 }
 0x4e3   : > { %13444 = vmatprep.mubr.f32.mxu0 %v23759_v37  ;;  %18942 = vmatmul.mubr.msk.f32.gmra.mrb[10].mxu1 %vm8764_vm0, %v22455_v8 }
 0x4e4   : > { %18974 = vmatmul.mubr.msk.f32.gmra.mrb[6].mxu0 %vm8764_vm0, %v22555_v63  ;;  %13011 = vmatprep.mubr.f32.mxu1 %v23759_v37 }
 0x4e5   : > { %13592 = vmatprep.mubr.f32.mxu0 %v23759_v37 }
 0x4e7   : > { %18949 = vmatmul.mubr.msk.f32.vlgmr.msra.gmra.mrb[60].mxu1 %vm8764_vm0, %v22436_v10 }
 0x4e8   : > { %18958 = vmatpush1.msk.msra.mxu1 %vm8771_vm1, %v21798_v3  ;;  %18981 = vmatmul.mubr.msk.f32.vlgmr.msra.gmra.mrb[8].mxu0 %vm8764_vm0, %v22540_v50 }
 0x4e9   : > { %18990 = vmatpush1.msk.msra.mxu0 %vm8771_vm1, %v21832_v31  ;;  %18965 = vmatprep.subr.msk.mxu1 %vm8771_vm1, %v21680_v11 }
 0x4ea   : > { %18997 = vmatprep.subr.msk.mxu0 %vm8771_vm1, %v22043_v36  ;;  %13016 = vmatprep.mubr.f32.mxu1 %v23759_v37 }
 0x4eb   : > { %13598 = vmatprep.mubr.f32.mxu0 %v23759_v37  ;;  %18950 = vmatmul.mubr.msk.f32.gmra.mrb[62].mxu1 %vm8764_vm0, %v22455_v8  ;;  %v23782_v8 = vld [vmem:[#allocation18_spill] sm:$0xff] }
 0x4ec   : > { %18982 = vmatmul.mubr.msk.f32.gmra.mrb[10].mxu0 %vm8764_vm0, %v22555_v63  ;;  %13186 = vmatprep.mubr.f32.mxu1 %v23759_v37 }
 0x4ed   : > { %13767 = vmatprep.mubr.f32.mxu0 %v23759_v37 }
 0x4ef   : > { %18959 = vmatmul.mubr.msk.f32.vlgmr.msra.gmra.mrb[8].mxu1 %vm8764_vm0, %v22490_v12 }
 0x4f0   : > { %18966 = vmatpush1.msk.msra.mxu1 %vm8771_vm1, %v21836_v38  ;;  %18991 = vmatmul.mubr.msk.f32.vlgmr.msra.gmra.mrb[4].mxu0 %vm8764_vm0, %v22590_v42 }
 0x4f1   : > { %18998 = vmatpush1.msk.msra.mxu0 %vm8771_vm1, %v21877_v57  ;;  %18975 = vmatprep.subr.msk.mxu1 %vm8771_vm1, %v21814_v18 }
 0x4f2   : > { %19007 = vmatprep.subr.msk.mxu0 %vm8771_vm1, %v22084_v1  ;;  %v22609_v21 = vpop.f32.mrb[4].mxu1  ;;  %13192 = vmatprep.mubr.f32.mxu1 %v23759_v37 }
 0x4f3   : > { %23778 = vst [vmem:[#allocation29_spill] sm:$0xff] %v22609_v21  ;;  %13773 = vmatprep.mubr.f32.mxu0 %v23759_v37  ;;  %v22613_v45 = vpop.f32.mrb[5].mxu1  ;;  %18960 = vmatmul.mubr.msk.f32.gmra.mrb[10].mxu1 %vm8764_vm0, %v22505_v6  ;;  %v22721_v21 = vld [vmem:[%s23709_s3 + $0x108] sm:$0xff] }
 0x4f4   : > { %23779 = vst [vmem:[#allocation30_spill] sm:$0xff] %v22613_v45  ;;  %18992 = vmatmul.mubr.msk.f32.gmra.mrb[6].mxu0 %vm8764_vm0, %v22605_v2  ;;  %13340 = vmatprep.mubr.f32.mxu1 %v23759_v37  ;;  %v23793_v45 = vld [vmem:[#allocation5_spill] sm:$0xff] }
 0x4f5   : > { %13921 = vmatprep.mubr.f32.mxu0 %v23759_v37 }
 0x4f6   : > { %v22621_v10 = vpop.f32.mrb[6].mxu1 }
 0x4f7   : > { %23780 = vst [vmem:[#allocation31_spill] sm:$0xff] %v22621_v10  ;;  %v22623_v1 = vpop.f32.mrb[7].mxu1  ;;  %18967 = vmatmul.mubr.msk.f32.vlgmr.msra.gmra.mrb[64].mxu1 %vm8764_vm0, %v22490_v12  ;;  %v23790_v10 = vld [vmem:[#allocation22_spill] sm:$0xff] }
 0x4f8   : > { %23781 = vst [vmem:[#allocation32_spill] sm:$0xff] %v22623_v1  ;;  %18976 = vmatpush1.msk.msra.mxu1 %vm8771_vm1, %v21880_v58  ;;  %18999 = vmatmul.mubr.msk.f32.vlgmr.msra.gmra.mrb[8].mxu0 %vm8764_vm0, %v22590_v42  ;;  %v23789_v1 = vld [vmem:[#allocation2_spill] sm:$0xff] }
 0x4f9   : > { %19008 = vmatpush1.msk.msra.mxu0 %vm8771_vm1, %v21918_v41  ;;  %18983 = vmatprep.subr.msk.mxu1 %vm8771_vm1, %v21772_v15  ;;  %v22648_v41 = vld [vmem:[%s23709_s3 + $0xf0] sm:$0xff] }
 0x4fa   : > { %19015 = vmatprep.subr.msk.mxu0 %vm8771_vm1, %v22129_v39  ;;  %13345 = vmatprep.mubr.f32.mxu1 %v23759_v37  ;;  %v22663_v39 = vld [vmem:[%s23709_s3 + $0xf8] sm:$0xff] }
 0x4fb   : > { %13927 = vmatprep.mubr.f32.mxu0 %v23759_v37  ;;  %18968 = vmatmul.mubr.msk.f32.gmra.mrb[66].mxu1 %vm8764_vm0, %v22505_v6 }
 0x4fc   : > { %19000 = vmatmul.mubr.msk.f32.gmra.mrb[10].mxu0 %vm8764_vm0, %v22605_v2  ;;  %13515 = vmatprep.mubr.f32.mxu1 %v23759_v37 }
 0x4fd   : > { %14096 = vmatprep.mubr.f32.mxu0 %v23759_v37 }
 0x4ff   : > { %18977 = vmatmul.mubr.msk.f32.vlgmr.msra.gmra.mrb[8].mxu1 %vm8764_vm0, %v22540_v50 }
 0x500   : > { %18984 = vmatpush1.msk.msra.mxu1 %vm8771_vm1, %v21922_v43  ;;  %19009 = vmatmul.mubr.msk.f32.vlgmr.msra.gmra.mrb[4].mxu0 %vm8764_vm0, %v22648_v41 }
 0x501   : > { %19016 = vmatpush1.msk.msra.mxu0 %vm8771_vm1, %v21963_v9  ;;  %18993 = vmatprep.subr.msk.mxu1 %vm8771_vm1, %v21900_v27 }
 0x502   : > { %19025 = vmatprep.subr.msk.mxu0 %vm8771_vm1, %v23782_v8  ;;  %v22667_v12 = vpop.f32.mrb[12].mxu1  ;;  %13521 = vmatprep.mubr.f32.mxu1 %v23759_v37 }
 0x503   : > { %23783 = vst [vmem:[#allocation18_spill] sm:$0xff] %v22667_v12  ;;  %14102 = vmatprep.mubr.f32.mxu0 %v23759_v37  ;;  %v22671_v6 = vpop.f32.mrb[13].mxu1  ;;  %18978 = vmatmul.mubr.msk.f32.gmra.mrb[10].mxu1 %vm8764_vm0, %v22555_v63  ;;  %v23787_v12 = vld [vmem:[#allocation4_spill] sm:$0xff] }
 0x504   : > { %23784 = vst [vmem:[#allocation33_spill] sm:$0xff] %v22671_v6  ;;  %19010 = vmatmul.mubr.msk.f32.gmra.mrb[6].mxu0 %vm8764_vm0, %v22663_v39  ;;  %13669 = vmatprep.mubr.f32.mxu1 %v23759_v37  ;;  %v23788_v6 = vld [vmem:[#allocation6_spill] sm:$0xff] }
 0x505   : > { %14250 = vmatprep.mubr.f32.mxu0 %v23759_v37 }
 0x506   : > { %v22679_v9 = vpop.f32.mrb[14].mxu1 }
 0x507   : > { %23785 = vst [vmem:[#allocation34_spill] sm:$0xff] %v22679_v9  ;;  %v22681_v8 = vpop.f32.mrb[15].mxu1  ;;  %18985 = vmatmul.mubr.msk.f32.vlgmr.msra.gmra.mrb[68].mxu1 %vm8764_vm0, %v22540_v50 }
 0x508   : > { %23786 = vst [vmem:[#allocation35_spill] sm:$0xff] %v22681_v8  ;;  %18994 = vmatpush1.msk.msra.mxu1 %vm8771_vm1, %v23787_v12  ;;  %19017 = vmatmul.mubr.msk.f32.vlgmr.msra.gmra.mrb[8].mxu0 %vm8764_vm0, %v22648_v41 }
 0x509   : > { %19026 = vmatpush1.msk.msra.mxu0 %vm8771_vm1, %v23788_v6  ;;  %19001 = vmatprep.subr.msk.mxu1 %vm8771_vm1, %v23789_v1 }
 0x50a   : > { %19033 = vmatprep.subr.msk.mxu0 %vm8771_vm1, %v23790_v10  ;;  %v9085_v9 = vpop.f32.mrb[16].mxu1  ;;  %13674 = vmatprep.mubr.f32.mxu1 %v23759_v37  ;;  %v22706_v10 = vld [vmem:[%s23709_s3 + $0x100] sm:$0xff] }
 0x50b   : > { %14256 = vmatprep.mubr.f32.mxu0 %v23759_v37  ;;  %v9087_v50 = vpop.f32.mrb[17].mxu1  ;;  %18986 = vmatmul.mubr.msk.f32.gmra.mrb[70].mxu1 %vm8764_vm0, %v22555_v63  ;;  %v23792_v63 = vld [vmem:[#allocation9_spill] sm:$0xff] }
 0x50c   : > { %19018 = vmatmul.mubr.msk.f32.gmra.mrb[10].mxu0 %vm8764_vm0, %v22663_v39  ;;  %13844 = vmatprep.mubr.f32.mxu1 %v23759_v37  ;;  %v23791_v50 = vld [vmem:[#allocation7_spill] sm:$0xff] }
 0x50d   : > { %14425 = vmatprep.mubr.f32.mxu0 %v23759_v37 }
 0x50e   : > { %v9090_v6 = vpop.f32.mrb[18].mxu1 }
 0x50f   : > { %v9092_v8 = vpop.f32.mrb[19].mxu1  ;;  %18995 = vmatmul.mubr.msk.f32.vlgmr.msra.gmra.mrb[8].mxu1 %vm8764_vm0, %v22590_v42 }
 0x510   : > { %19002 = vmatpush1.msk.msra.mxu1 %vm8771_vm1, %v23791_v50  ;;  %19027 = vmatmul.mubr.msk.f32.vlgmr.msra.gmra.mrb[4].mxu0 %vm8764_vm0, %v22706_v10  ;;  %v23796_v8 = vld [vmem:[#allocation3_spill] sm:$0xff] }
 0x511   : > { %19034 = vmatpush1.msk.msra.mxu0 %vm8771_vm1, %v23792_v63  ;;  %19011 = vmatprep.subr.msk.mxu1 %vm8771_vm1, %v23793_v45  ;;  %v23794_v45 = vld [vmem:[#allocation10_spill] sm:$0xff] }
 0x512   : > { %19043 = vmatprep.subr.msk.mxu0 %vm8771_vm1, %v22256_v48  ;;  %13850 = vmatprep.mubr.f32.mxu1 %v23759_v37  ;;  %v23795_v48 = vld [vmem:[#allocation12_spill] sm:$0xff] }
 0x513   : > { %14431 = vmatprep.mubr.f32.mxu0 %v23759_v37  ;;  %18996 = vmatmul.mubr.msk.f32.gmra.mrb[10].mxu1 %vm8764_vm0, %v22605_v2 }
 0x514   : > { %19028 = vmatmul.mubr.msk.f32.gmra.mrb[6].mxu0 %vm8764_vm0, %v22721_v21  ;;  %13998 = vmatprep.mubr.f32.mxu1 %v23759_v37 }
 0x515   : > { %14579 = vmatprep.mubr.f32.mxu0 %v23759_v37 }
 0x517   : > { %19003 = vmatmul.mubr.msk.f32.vlgmr.msra.gmra.mrb[72].mxu1 %vm8764_vm0, %v22590_v42 }
 0x518   : > { %19012 = vmatpush1.msk.msra.mxu1 %vm8771_vm1, %v23794_v45  ;;  %19035 = vmatmul.mubr.msk.f32.vlgmr.msra.gmra.mrb[8].mxu0 %vm8764_vm0, %v22706_v10 }
 0x519   : > { %19044 = vmatpush1.msk.msra.mxu0 %vm8771_vm1, %v23795_v48  ;;  %19019 = vmatprep.subr.msk.mxu1 %vm8771_vm1, %v23796_v8  ;;  %v23797_v8 = vld [vmem:[#allocation13_spill] sm:$0xff] }
 0x51a   : > { %19051 = vmatprep.subr.msk.mxu0 %vm8771_vm1, %v22301_v14  ;;  %v9413_v63 = vpop.f32.mrb[20].mxu1  ;;  %14003 = vmatprep.mubr.f32.mxu1 %v23759_v37  ;;  %v22756_v14 = vld [vmem:[%s23709_s3 + $0x110] sm:$0xff] }
 0x51b   : > { %v9414_v1 = vadd.f32 %v9413_v63, %v9085_v9  ;;  %14585 = vmatprep.mubr.f32.mxu0 %v23759_v37  ;;  %v9415_v42 = vpop.f32.mrb[21].mxu1  ;;  %19004 = vmatmul.mubr.msk.f32.gmra.mrb[74].mxu1 %vm8764_vm0, %v22605_v2  ;;  %v23798_v2 = vld [vmem:[#allocation15_spill] sm:$0xff] }
 0x51c   : > { %19036 = vmatmul.mubr.msk.f32.gmra.mrb[10].mxu0 %vm8764_vm0, %v22721_v21  ;;  %14173 = vmatprep.mubr.f32.mxu1 %v23759_v37  ;;  %v23799_v63 = vld [vmem:[#allocation11_spill] sm:$0xff]  ;;  %v23800_v42 = vld [vmem:[#allocation16_spill] sm:$0xff] }
 0x51d   : > { %14754 = vmatprep.mubr.f32.mxu0 %v23759_v37 }
 0x51e   : > { %v9418_v45 = vpop.f32.mrb[22].mxu1 }
 0x51f   : > { %v9419_v9 = vadd.f32 %v9418_v45, %v9090_v6  ;;  %v9420_v48 = vpop.f32.mrb[23].mxu1  ;;  %19013 = vmatmul.mubr.msk.f32.vlgmr.msra.gmra.mrb[8].mxu1 %vm8764_vm0, %v22648_v41  ;;  %v22771_v6 = vld [vmem:[%s23709_s3 + $0x118] sm:$0xff] }
 0x520   : > { %19020 = vmatpush1.msk.msra.mxu1 %vm8771_vm1, %v23797_v8  ;;  %19045 = vmatmul.mubr.msk.f32.vlgmr.msra.gmra.mrb[4].mxu0 %vm8764_vm0, %v22756_v14  ;;  %v23802_v45 = vld [vmem:[#allocation8_spill] sm:$0xff] }
 0x521   : > { %19052 = vmatpush1.msk.msra.mxu0 %vm8771_vm1, %v23798_v2  ;;  %19029 = vmatprep.subr.msk.mxu1 %vm8771_vm1, %v23799_v63 }
 0x522   : > { %19061 = vmatprep.subr.msk.mxu0 %vm8771_vm1, %v22342_v17  ;;  %14179 = vmatprep.mubr.f32.mxu1 %v23759_v37  ;;  %v23801_v17 = vld [vmem:[#allocation19_spill] sm:$0xff] }
 0x523   : > { %14760 = vmatprep.mubr.f32.mxu0 %v23759_v37  ;;  %19014 = vmatmul.mubr.msk.f32.gmra.mrb[10].mxu1 %vm8764_vm0, %v22663_v39 }
 0x524   : > { %19046 = vmatmul.mubr.msk.f32.gmra.mrb[6].mxu0 %vm8764_vm0, %v22771_v6  ;;  %14327 = vmatprep.mubr.f32.mxu1 %v23759_v37 }
 0x525   : > { %14908 = vmatprep.mubr.f32.mxu0 %v23759_v37 }
 0x527   : > { %19021 = vmatmul.mubr.msk.f32.vlgmr.msra.gmra.mrb[76].mxu1 %vm8764_vm0, %v22648_v41 }
 0x528   : > { %19030 = vmatpush1.msk.msra.mxu1 %vm8771_vm1, %v23800_v42  ;;  %19053 = vmatmul.mubr.msk.f32.vlgmr.msra.gmra.mrb[8].mxu0 %vm8764_vm0, %v22756_v14  ;;  %v23803_v42 = vld [vmem:[#allocation20_spill] sm:$0xff] }
 0x529   : > { %19062 = vmatpush1.msk.msra.mxu0 %vm8771_vm1, %v23801_v17  ;;  %19037 = vmatprep.subr.msk.mxu1 %vm8771_vm1, %v23802_v45  ;;  %v23805_v17 = vld [vmem:[#allocation17_spill] sm:$0xff]  ;;  %v23806_v45 = vld [vmem:[#allocation24_spill] sm:$0xff] }
 0x52a   : > { %19069 = vmatprep.subr.msk.mxu0 %vm8771_vm1, %v22375_v24  ;;  %v9768_v48 = vpop.f32.mrb[24].mxu1  ;;  %14332 = vmatprep.mubr.f32.mxu1 %v23759_v37  ;;  %v22806_v24 = vld [vmem:[%s23709_s3 + $0x120] sm:$0xff] }
 0x52b   : > { %v9783_v8 = vadd.f32 %v9768_v48, %v9414_v1  ;;  %14914 = vmatprep.mubr.f32.mxu0 %v23759_v37  ;;  %v9770_v41 = vpop.f32.mrb[25].mxu1  ;;  %19022 = vmatmul.mubr.msk.f32.gmra.mrb[78].mxu1 %vm8764_vm0, %v22663_v39  ;;  %v23804_v39 = vld [vmem:[#allocation23_spill] sm:$0xff] }
 0x52c   : > { %19054 = vmatmul.mubr.msk.f32.gmra.mrb[10].mxu0 %vm8764_vm0, %v22771_v6  ;;  %14502 = vmatprep.mubr.f32.mxu1 %v23759_v37 }
 0x52d   : > { %15083 = vmatprep.mubr.f32.mxu0 %v23759_v37 }
 0x52e   : > { %v9773_v2 = vpop.f32.mrb[26].mxu1 }
 0x52f   : > { %v9790_v1 = vadd.f32 %v9773_v2, %v9419_v9  ;;  %v9775_v63 = vpop.f32.mrb[27].mxu1  ;;  %19031 = vmatmul.mubr.msk.f32.vlgmr.msra.gmra.mrb[8].mxu1 %vm8764_vm0, %v22706_v10  ;;  %v22821_v9 = vld [vmem:[%s23709_s3 + $0x128] sm:$0xff] }
 0x530   : > { %19038 = vmatpush1.msk.msra.mxu1 %vm8771_vm1, %v23803_v42  ;;  %19063 = vmatmul.mubr.msk.f32.vlgmr.msra.gmra.mrb[4].mxu0 %vm8764_vm0, %v22806_v24  ;;  %v23808_v63 = vld [vmem:[#allocation26_spill] sm:$0xff] }
 0x531   : > { %19070 = vmatpush1.msk.msra.mxu0 %vm8771_vm1, %v23804_v39  ;;  %19047 = vmatprep.subr.msk.mxu1 %vm8771_vm1, %v23805_v17 }
 0x532   : > { %19079 = vmatprep.subr.msk.mxu0 %vm8771_vm1, %v22407_v0  ;;  %14508 = vmatprep.mubr.f32.mxu1 %v23759_v37  ;;  %v23807_v0 = vld [vmem:[#allocation14_spill] sm:$0xff] }
 0x533   : > { %15089 = vmatprep.mubr.f32.mxu0 %v23759_v37  ;;  %19032 = vmatmul.mubr.msk.f32.gmra.mrb[10].mxu1 %vm8764_vm0, %v22721_v21 }
 0x534   : > { %19064 = vmatmul.mubr.msk.f32.gmra.mrb[6].mxu0 %vm8764_vm0, %v22821_v9  ;;  %14656 = vmatprep.mubr.f32.mxu1 %v23759_v37 }
 0x535   : > { %15237 = vmatprep.mubr.f32.mxu0 %v23759_v37 }
 0x537   : > { %19039 = vmatmul.mubr.msk.f32.vlgmr.msra.gmra.mrb[80].mxu1 %vm8764_vm0, %v22706_v10 }
 0x538   : > { %19048 = vmatpush1.msk.msra.mxu1 %vm8771_vm1, %v23806_v45  ;;  %19071 = vmatmul.mubr.msk.f32.vlgmr.msra.gmra.mrb[8].mxu0 %vm8764_vm0, %v22806_v24 }
 0x539   : > { %19080 = vmatpush1.msk.msra.mxu0 %vm8771_vm1, %v22262_v55  ;;  %19055 = vmatprep.subr.msk.mxu1 %vm8771_vm1, %v23807_v0  ;;  %v22856_v55 = vld [vmem:[%s23709_s3 + $0x130] sm:$0xff]  ;;  %v23024_v0 = vld [vmem:[%s23709_s3 + $0x168] sm:$0xff] }
 0x53a   : > { %19087 = vmatprep.subr.msk.mxu0 %vm8771_vm1, %v22440_v13  ;;  %v10138_v48 = vpop.f32.mrb[28].mxu1  ;;  %14661 = vmatprep.mubr.f32.mxu1 %v23759_v37 }
 0x53b   : > { %v10153_v41 = vadd.f32 %v10138_v48, %v9783_v8  ;;  %15243 = vmatprep.mubr.f32.mxu0 %v23759_v37  ;;  %v10140_v10 = vpop.f32.mrb[29].mxu1  ;;  %19040 = vmatmul.mubr.msk.f32.gmra.mrb[82].mxu1 %vm8764_vm0, %v22721_v21  ;;  %v23809_v21 = vld [vmem:[#allocation25_spill] sm:$0xff] }
 0x53c   : > { %19072 = vmatmul.mubr.msk.f32.gmra.mrb[10].mxu0 %vm8764_vm0, %v22821_v9  ;;  %14831 = vmatprep.mubr.f32.mxu1 %v23759_v37 }
 0x53d   : > { %15412 = vmatprep.mubr.f32.mxu0 %v23759_v37 }
 0x53e   : > { %v10143_v13 = vpop.f32.mrb[30].mxu1 }
 0x53f   : > { %v10160_v8 = vadd.f32 %v10143_v13, %v9790_v1  ;;  %v10145_v2 = vpop.f32.mrb[31].mxu1  ;;  %19049 = vmatmul.mubr.msk.f32.vlgmr.msra.gmra.mrb[8].mxu1 %vm8764_vm0, %v22756_v14  ;;  %v22871_v1 = vld [vmem:[%s23709_s3 + $0x138] sm:$0xff] }
 0x540   : > { %19056 = vmatpush1.msk.msra.mxu1 %vm8771_vm1, %v23808_v63  ;;  %19081 = vmatmul.mubr.msk.f32.vlgmr.msra.gmra.mrb[4].mxu0 %vm8764_vm0, %v22856_v55 }
 0x541   : > { %19088 = vmatpush1.msk.msra.mxu0 %vm8771_vm1, %v22314_v28  ;;  %19065 = vmatprep.subr.msk.mxu1 %vm8771_vm1, %v23809_v21  ;;  %v23810_v28 = vld [vmem:[#allocation28_spill] sm:$0xff] }
 0x542   : > { %19097 = vmatprep.subr.msk.mxu0 %vm8771_vm1, %v21474_v19  ;;  %14837 = vmatprep.mubr.f32.mxu1 %v23759_v37  ;;  %v23811_v19 = vld [vmem:[#allocation21_spill] sm:$0xff] }
 0x543   : > { %15418 = vmatprep.mubr.f32.mxu0 %v23759_v37  ;;  %19050 = vmatmul.mubr.msk.f32.gmra.mrb[10].mxu1 %vm8764_vm0, %v22771_v6 }
 0x544   : > { %19082 = vmatmul.mubr.msk.f32.gmra.mrb[6].mxu0 %vm8764_vm0, %v22871_v1  ;;  %14985 = vmatprep.mubr.f32.mxu1 %v23759_v37 }
 0x545   : > { %15566 = vmatprep.mubr.f32.mxu0 %v23759_v37 }
 0x547   : > { %19057 = vmatmul.mubr.msk.f32.vlgmr.msra.gmra.mrb[84].mxu1 %vm8764_vm0, %v22756_v14 }
 0x548   : > { %19066 = vmatpush1.msk.msra.mxu1 %vm8771_vm1, %v23810_v28  ;;  %19089 = vmatmul.mubr.msk.f32.vlgmr.msra.gmra.mrb[8].mxu0 %vm8764_vm0, %v22856_v55 }
 0x549   : > { %19098 = vmatpush1.msk.msra.mxu0 %vm8771_vm1, %v21458_v5  ;;  %19073 = vmatprep.subr.msk.mxu1 %vm8771_vm1, %v23811_v19  ;;  %v22906_v5 = vld [vmem:[%s23709_s3 + $0x140] sm:$0xff] }
 0x54a   : > { %19105 = vmatprep.subr.msk.mxu0 %vm8771_vm1, %v21498_v40  ;;  %v10508_v42 = vpop.f32.mrb[32].mxu1  ;;  %14990 = vmatprep.mubr.f32.mxu1 %v23759_v37 }
 0x54b   : > { %v10523_v39 = vadd.f32 %v10508_v42, %v10153_v41  ;;  %15572 = vmatprep.mubr.f32.mxu0 %v23759_v37  ;;  %v10510_v14 = vpop.f32.mrb[33].mxu1  ;;  %19058 = vmatmul.mubr.msk.f32.gmra.mrb[86].mxu1 %vm8764_vm0, %v22771_v6  ;;  %v22921_v6 = vld [vmem:[%s23709_s3 + $0x148] sm:$0xff] }
 0x54c   : > { %19090 = vmatmul.mubr.msk.f32.gmra.mrb[10].mxu0 %vm8764_vm0, %v22871_v1  ;;  %15160 = vmatprep.mubr.f32.mxu1 %v23759_v37 }
 0x54d   : > { %15741 = vmatprep.mubr.f32.mxu0 %v23759_v37 }
 0x54e   : > { %v10513_v40 = vpop.f32.mrb[34].mxu1 }
 0x54f   : > { %v10530_v17 = vadd.f32 %v10513_v40, %v10160_v8  ;;  %v10515_v45 = vpop.f32.mrb[35].mxu1  ;;  %19067 = vmatmul.mubr.msk.f32.vlgmr.msra.gmra.mrb[8].mxu1 %vm8764_vm0, %v22806_v24  ;;  %v23813_v8 = vld [vmem:[#allocation2_spill] sm:$0xff] }
 0x550   : > { %19074 = vmatpush1.msk.msra.mxu1 %vm8771_vm1, %v22348_v23  ;;  %19099 = vmatmul.mubr.msk.f32.vlgmr.msra.gmra.mrb[4].mxu0 %vm8764_vm0, %v22906_v5 }
 0x551   : > { %19106 = vmatpush1.msk.msra.mxu0 %vm8771_vm1, %v21489_v35  ;;  %19083 = vmatprep.subr.msk.mxu1 %vm8771_vm1, %v22332_v16  ;;  %v23812_v35 = vld [vmem:[#allocation27_spill] sm:$0xff] }
 0x552   : > { %19115 = vmatprep.subr.msk.mxu0 %vm8771_vm1, %v21629_v60  ;;  %15166 = vmatprep.mubr.f32.mxu1 %v23759_v37 }
 0x553   : > { %15747 = vmatprep.mubr.f32.mxu0 %v23759_v37  ;;  %19068 = vmatmul.mubr.msk.f32.gmra.mrb[10].mxu1 %vm8764_vm0, %v22821_v9 }
 0x554   : > { %19100 = vmatmul.mubr.msk.f32.gmra.mrb[6].mxu0 %vm8764_vm0, %v22921_v6  ;;  %15314 = vmatprep.mubr.f32.mxu1 %v23759_v37 }
 0x555   : > { %15895 = vmatprep.mubr.f32.mxu0 %v23759_v37 }
 0x557   : > { %19075 = vmatmul.mubr.msk.f32.vlgmr.msra.gmra.mrb[88].mxu1 %vm8764_vm0, %v22806_v24 }
 0x558   : > { %19084 = vmatpush1.msk.msra.mxu1 %vm8771_vm1, %v22380_v47  ;;  %19107 = vmatmul.mubr.msk.f32.vlgmr.msra.gmra.mrb[8].mxu0 %vm8764_vm0, %v22906_v5 }
 0x559   : > { %19116 = vmatpush1.msk.msra.mxu0 %vm8771_vm1, %v21626_v59  ;;  %19091 = vmatprep.subr.msk.mxu1 %vm8771_vm1, %v23812_v35  ;;  %v22956_v59 = vld [vmem:[%s23709_s3 + $0x150] sm:$0xff] }
 0x55a   : > { %19123 = vmatprep.subr.msk.mxu0 %vm8771_vm1, %v21663_v30  ;;  %v10877_v60 = vpop.f32.mrb[36].mxu1  ;;  %15319 = vmatprep.mubr.f32.mxu1 %v23759_v37 }
 0x55b   : > { %v10892_v16 = vadd.f32 %v10877_v60, %v10523_v39  ;;  %15901 = vmatprep.mubr.f32.mxu0 %v23759_v37  ;;  %v10879_v23 = vpop.f32.mrb[37].mxu1  ;;  %19076 = vmatmul.mubr.msk.f32.gmra.mrb[90].mxu1 %vm8764_vm0, %v22821_v9  ;;  %v22971_v9 = vld [vmem:[%s23709_s3 + $0x158] sm:$0xff] }
 0x55c   : > { %19108 = vmatmul.mubr.msk.f32.gmra.mrb[10].mxu0 %vm8764_vm0, %v22921_v6  ;;  %15489 = vmatprep.mubr.f32.mxu1 %v23759_v37 }
 0x55d   : > { %16070 = vmatprep.mubr.f32.mxu0 %v23759_v37 }
 0x55e   : > { %v10882_v30 = vpop.f32.mrb[38].mxu1 }
 0x55f   : > { %v10899_v47 = vadd.f32 %v10882_v30, %v10530_v17  ;;  %v10884_v24 = vpop.f32.mrb[39].mxu1  ;;  %19085 = vmatmul.mubr.msk.f32.vlgmr.msra.gmra.mrb[8].mxu1 %vm8764_vm0, %v22856_v55 }
 0x560   : > { %19092 = vmatpush1.msk.msra.mxu1 %vm8771_vm1, %v22413_v52  ;;  %19117 = vmatmul.mubr.msk.f32.vlgmr.msra.gmra.mrb[4].mxu0 %vm8764_vm0, %v22956_v59  ;;  %v17313_v52 = vld [vmem:[%s23710_s4] sm:$0xff] }
 0x561   : > { %19124 = vmatpush1.msk.msra.mxu0 %vm8771_vm1, %v21705_v44  ;;  %19101 = vmatprep.subr.msk.mxu1 %vm8771_vm1, %v21487_v34 }
 0x562   : > { %19133 = vmatprep.subr.msk.mxu0 %vm8771_vm1, %v21798_v3  ;;  %15495 = vmatprep.mubr.f32.mxu1 %v23759_v37 }
 0x563   : > { %16076 = vmatprep.mubr.f32.mxu0 %v23759_v37  ;;  %19086 = vmatmul.mubr.msk.f32.gmra.mrb[10].mxu1 %vm8764_vm0, %v22871_v1 }
 0x564   : > { %19118 = vmatmul.mubr.msk.f32.gmra.mrb[6].mxu0 %vm8764_vm0, %v22971_v9  ;;  %15643 = vmatprep.mubr.f32.mxu1 %v23759_v37 }
 0x565   : > { %16224 = vmatprep.mubr.f32.mxu0 %v23759_v37  ;;  %17317 = vperm.xlu1 %20041, %v17313_v52  }
 0x567   : > { %19093 = vmatmul.mubr.msk.f32.vlgmr.msra.gmra.mrb[92].mxu1 %vm8764_vm0, %v22856_v55 }
 0x568   : > { %19102 = vmatpush1.msk.msra.mxu1 %vm8771_vm1, %v21476_v22  ;;  %19125 = vmatmul.mubr.msk.f32.vlgmr.msra.gmra.mrb[8].mxu0 %vm8764_vm0, %v22956_v59 }
 0x569   : > { %19134 = vmatpush1.msk.msra.mxu0 %vm8771_vm1, %v21826_v25  ;;  %19109 = vmatprep.subr.msk.mxu1 %vm8771_vm1, %v21441_v26  ;;  %v23009_v26 = vld [vmem:[%s23709_s3 + $0x160] sm:$0xff] }
 0x56a   : > { %19141 = vmatprep.subr.msk.mxu0 %vm8771_vm1, %v21836_v38  ;;  %v11246_v34 = vpop.f32.mrb[40].mxu1  ;;  %15648 = vmatprep.mubr.f32.mxu1 %v23759_v37 }
 0x56b   : > { %v11261_v44 = vadd.f32 %v11246_v34, %v10892_v16  ;;  %16230 = vmatprep.mubr.f32.mxu0 %v23759_v37  ;;  %v11248_v3 = vpop.f32.mrb[41].mxu1  ;;  %19094 = vmatmul.mubr.msk.f32.gmra.mrb[94].mxu1 %vm8764_vm0, %v22871_v1 }
 0x56c   : > { %19126 = vmatmul.mubr.msk.f32.gmra.mrb[10].mxu0 %vm8764_vm0, %v22971_v9  ;;  %15818 = vmatprep.mubr.f32.mxu1 %v23759_v37 }
 0x56d   : > { %16399 = vmatprep.mubr.f32.mxu0 %v23759_v37 }
 0x56e   : > { %v11251_v22 = vpop.f32.mrb[42].mxu1 }
 0x56f   : > { %v11268_v25 = vadd.f32 %v11251_v22, %v10899_v47  ;;  %v11253_v38 = vpop.f32.mrb[43].mxu1  ;;  %19103 = vmatmul.mubr.msk.f32.vlgmr.msra.gmra.mrb[8].mxu1 %vm8764_vm0, %v22906_v5 }
 0x570   : > { %19110 = vmatpush1.msk.msra.mxu1 %vm8771_vm1, %v21444_v32  ;;  %19135 = vmatmul.mubr.msk.f32.vlgmr.msra.gmra.mrb[4].mxu0 %vm8764_vm0, %v23009_v26 }
 0x571   : > { %19142 = vmatpush1.msk.msra.mxu0 %vm8771_vm1, %v21871_v54  ;;  %19119 = vmatprep.subr.msk.mxu1 %vm8771_vm1, %v21648_v20 }
 0x572   : > { %19151 = vmatprep.subr.msk.mxu0 %vm8771_vm1, %v21880_v58  ;;  %15824 = vmatprep.mubr.f32.mxu1 %v23759_v37 }
 0x573   : > { %16405 = vmatprep.mubr.f32.mxu0 %v23759_v37  ;;  %19104 = vmatmul.mubr.msk.f32.gmra.mrb[10].mxu1 %vm8764_vm0, %v22921_v6 }
 0x574   : > { %19136 = vmatmul.mubr.msk.f32.gmra.mrb[6].mxu0 %vm8764_vm0, %v23024_v0  ;;  %15972 = vmatprep.mubr.f32.mxu1 %v23759_v37 }
 0x575   : > { %16553 = vmatprep.mubr.f32.mxu0 %v23759_v37 }
 0x577   : > { %19111 = vmatmul.mubr.msk.f32.vlgmr.msra.gmra.mrb[96].mxu1 %vm8764_vm0, %v22906_v5 }
 0x578   : > { %19120 = vmatpush1.msk.msra.mxu1 %vm8771_vm1, %v21658_v29  ;;  %19143 = vmatmul.mubr.msk.f32.vlgmr.msra.gmra.mrb[8].mxu0 %vm8764_vm0, %v23009_v26 }
 0x579   : > { %19152 = vmatpush1.msk.msra.mxu0 %vm8771_vm1, %v21912_v61  ;;  %19127 = vmatprep.subr.msk.mxu1 %vm8771_vm1, %v21608_v53  ;;  %v23059_v53 = vld [vmem:[%s23709_s3 + $0x170] sm:$0xff] }
 0x57a   : > { %19159 = vmatprep.subr.msk.mxu0 %vm8771_vm1, %v21922_v43  ;;  %v11615_v32 = vpop.f32.mrb[44].mxu1  ;;  %15977 = vmatprep.mubr.f32.mxu1 %v23759_v37  ;;  %v23074_v43 = vld [vmem:[%s23709_s3 + $0x178] sm:$0xff] }
 0x57b   : > { %v11630_v20 = vadd.f32 %v11615_v32, %v11261_v44  ;;  %16559 = vmatprep.mubr.f32.mxu0 %v23759_v37  ;;  %v11617_v54 = vpop.f32.mrb[45].mxu1  ;;  %19112 = vmatmul.mubr.msk.f32.gmra.mrb[98].mxu1 %vm8764_vm0, %v22921_v6 }
 0x57c   : > { %19144 = vmatmul.mubr.msk.f32.gmra.mrb[10].mxu0 %vm8764_vm0, %v23024_v0  ;;  %16147 = vmatprep.mubr.f32.mxu1 %v23759_v37 }
 0x57d   : > { %16728 = vmatprep.mubr.f32.mxu0 %v23759_v37 }
 0x57e   : > { %v11620_v29 = vpop.f32.mrb[46].mxu1 }
 0x57f   : > { %v11637_v58 = vadd.f32 %v11620_v29, %v11268_v25  ;;  %v11622_v61 = vpop.f32.mrb[47].mxu1  ;;  %19121 = vmatmul.mubr.msk.f32.vlgmr.msra.gmra.mrb[8].mxu1 %vm8764_vm0, %v22956_v59 }
 0x580   : > { %19128 = vmatpush1.msk.msra.mxu1 %vm8771_vm1, %v21605_v49  ;;  %19153 = vmatmul.mubr.msk.f32.vlgmr.msra.gmra.mrb[4].mxu0 %vm8764_vm0, %v23059_v53 }
 0x581   : > { %19160 = vmatpush1.msk.msra.mxu0 %vm8771_vm1, %v21957_v56  ;;  %19137 = vmatprep.subr.msk.mxu1 %vm8771_vm1, %v21713_v7 }
 0x582   : > { %19169 = vmatprep.subr.msk.mxu0 %vm8771_vm1, %v23787_v12  ;;  %16153 = vmatprep.mubr.f32.mxu1 %v23759_v37 }
 0x583   : > { %16734 = vmatprep.mubr.f32.mxu0 %v23759_v37  ;;  %19122 = vmatmul.mubr.msk.f32.gmra.mrb[10].mxu1 %vm8764_vm0, %v22971_v9 }
 0x584   : > { %19154 = vmatmul.mubr.msk.f32.gmra.mrb[6].mxu0 %vm8764_vm0, %v23074_v43  ;;  %16301 = vmatprep.mubr.f32.mxu1 %v23759_v37 }
 0x585   : > { %16882 = vmatprep.mubr.f32.mxu0 %v23759_v37 }
 0x587   : > { %19129 = vmatmul.mubr.msk.f32.vlgmr.msra.gmra.mrb[100].mxu1 %vm8764_vm0, %v22956_v59 }
 0x588   : > { %19138 = vmatpush1.msk.msra.mxu1 %vm8771_vm1, %v21735_v51  ;;  %19161 = vmatmul.mubr.msk.f32.vlgmr.msra.gmra.mrb[8].mxu0 %vm8764_vm0, %v23059_v53 }
 0x589   : > { %19170 = vmatpush1.msk.msra.mxu0 %vm8771_vm1, %v21998_v46  ;;  %19145 = vmatprep.subr.msk.mxu1 %vm8771_vm1, %v21686_v33  ;;  %v19167_v33 = vld [vmem:[%s23709_s3 + $0x180] sm:$0xff] }
 0x58a   : > { %19177 = vmatprep.subr.msk.mxu0 %vm8771_vm1, %v23791_v50  ;;  %v11985_v49 = vpop.f32.mrb[48].mxu1  ;;  %16306 = vmatprep.mubr.f32.mxu1 %v23759_v37  ;;  %v19168_v50 = vld [vmem:[%s23709_s3 + $0x188] sm:$0xff] }
 0x58b   : > { %v12000_v7 = vadd.f32 %v11985_v49, %v11630_v20  ;;  %16888 = vmatprep.mubr.f32.mxu0 %v23759_v37  ;;  %v11987_v56 = vpop.f32.mrb[49].mxu1  ;;  %19130 = vmatmul.mubr.msk.f32.gmra.mrb[102].mxu1 %vm8764_vm0, %v22971_v9 }
 0x58c   : > { %19162 = vmatmul.mubr.msk.f32.gmra.mrb[10].mxu0 %vm8764_vm0, %v23074_v43  ;;  %16476 = vmatprep.mubr.f32.mxu1 %v23759_v37 }
 0x58d   : > { %17057 = vmatprep.mubr.f32.mxu0 %v23759_v37 }
 0x58e   : > { %v11990_v51 = vpop.f32.mrb[50].mxu1 }
 0x58f   : > { %v12007_v46 = vadd.f32 %v11990_v51, %v11637_v58  ;;  %v11992_v12 = vpop.f32.mrb[51].mxu1  ;;  %19139 = vmatmul.mubr.msk.f32.vlgmr.msra.gmra.mrb[8].mxu1 %vm8764_vm0, %v23009_v26 }
 0x590   : > { %19146 = vmatpush1.msk.msra.mxu1 %vm8771_vm1, %v21680_v11  ;;  %19171 = vmatmul.mubr.msk.f32.vlgmr.msra.gmra.mrb[4].mxu0 %vm8764_vm0, %v19167_v33 }
 0x591   : > { %19178 = vmatpush1.msk.msra.mxu0 %vm8771_vm1, %v22043_v36  ;;  %19155 = vmatprep.subr.msk.mxu1 %vm8771_vm1, %v21791_v4 }
 0x592   : > { %16482 = vmatprep.mubr.f32.mxu1 %v23759_v37  ;;  %17063 = vmatprep.mubr.f32.mxu0 %v23759_v37 }
 0x593   : > { %19140 = vmatmul.mubr.msk.f32.gmra.mrb[10].mxu1 %vm8764_vm0, %v23024_v0 }
 0x594   : > { %19172 = vmatmul.mubr.msk.f32.gmra.mrb[6].mxu0 %vm8764_vm0, %v19168_v50  ;;  %16630 = vmatprep.mubr.f32.mxu1 %v23759_v37 }
 0x595   : > { %17211 = vmatprep.mubr.f32.mxu0 %v23759_v37 }
 0x597   : > { %19147 = vmatmul.mubr.msk.f32.vlgmr.msra.gmra.mrb[104].mxu1 %vm8764_vm0, %v23009_v26 }
 0x598   : > { %19156 = vmatpush1.msk.msra.mxu1 %vm8771_vm1, %v21814_v18  ;;  %19179 = vmatmul.mubr.msk.f32.vlgmr.msra.gmra.mrb[8].mxu0 %vm8764_vm0, %v19167_v33 }
 0x599   : > { %19163 = vmatprep.subr.msk.mxu1 %vm8771_vm1, %v21754_v62  ;;  %16635 = vmatprep.mubr.f32.mxu1 %v23759_v37 }
 0x59a   : > { %v12355_v11 = vpop.f32.mrb[52].mxu1  ;;  %17217 = vmatprep.mubr.f32.mxu0 %v23759_v37 }
 0x59b   : > { %v12370_v4 = vadd.f32 %v12355_v11, %v12000_v7  ;;  %v12357_v36 = vpop.f32.mrb[53].mxu1  ;;  %19148 = vmatmul.mubr.msk.f32.gmra.mrb[106].mxu1 %vm8764_vm0, %v23024_v0 }
 0x59c   : > { %19180 = vmatmul.mubr.msk.f32.gmra.mrb[10].mxu0 %vm8764_vm0, %v19168_v50  ;;  %16805 = vmatprep.mubr.f32.mxu1 %v23759_v37 }
 0x59e   : > { %v12360_v18 = vpop.f32.mrb[54].mxu1 }
 0x59f   : > { %v12377_v48 = vadd.f32 %v12360_v18, %v12007_v46  ;;  %v12362_v41 = vpop.f32.mrb[55].mxu1  ;;  %19157 = vmatmul.mubr.msk.f32.vlgmr.msra.gmra.mrb[8].mxu1 %vm8764_vm0, %v23059_v53 }
 0x5a0   : > { %19164 = vmatpush1.msk.msra.mxu1 %vm8771_vm1, %v21772_v15  ;;  %16811 = vmatprep.mubr.f32.mxu1 %v23759_v37 }
 0x5a1   : > { %19173 = vmatprep.subr.msk.mxu1 %vm8771_vm1, %v21877_v57 }
 0x5a3   : > { %19158 = vmatmul.mubr.msk.f32.gmra.mrb[10].mxu1 %vm8764_vm0, %v23074_v43 }
 0x5a4   : > { %16959 = vmatprep.mubr.f32.mxu1 %v23759_v37 }
 0x5a7   : > { %19165 = vmatmul.mubr.msk.f32.vlgmr.msra.gmra.mrb[108].mxu1 %vm8764_vm0, %v23059_v53 }
 0x5a8   : > { %19174 = vmatpush1.msk.msra.mxu1 %vm8771_vm1, %v21900_v27  ;;  %16964 = vmatprep.mubr.f32.mxu1 %v23759_v37 }
 0x5a9   : > { %19181 = vmatprep.subr.msk.mxu1 %vm8771_vm1, %v21832_v31 }
 0x5aa   : > { %v12684_v62 = vpop.f32.mrb[56].mxu1 }
 0x5ab   : > { %v12699_v15 = vadd.f32 %v12684_v62, %v12370_v4  ;;  %v12686_v10 = vpop.f32.mrb[57].mxu1  ;;  %19166 = vmatmul.mubr.msk.f32.gmra.mrb[110].mxu1 %vm8764_vm0, %v23074_v43 }
 0x5ac   : > { %17134 = vmatprep.mubr.f32.mxu1 %v23759_v37 }
 0x5ae   : > { %v12689_v57 = vpop.f32.mrb[58].mxu1 }
 0x5af   : > { %v12706_v55 = vadd.f32 %v12689_v57, %v12377_v48  ;;  %v12691_v13 = vpop.f32.mrb[59].mxu1  ;;  %19175 = vmatmul.mubr.msk.f32.vlgmr.msra.gmra.mrb[8].mxu1 %vm8764_vm0, %v19167_v33 }
 0x5b0   : > { %19182 = vmatpush1.msk.msra.mxu1 %vm8771_vm1, %v23813_v8  ;;  %17140 = vmatprep.mubr.f32.mxu1 %v23759_v37 }
 0x5b3   : > { %19176 = vmatmul.mubr.msk.f32.gmra.mrb[10].mxu1 %vm8764_vm0, %v19168_v50 }
 0x5b4   : > { %17288 = vmatprep.mubr.f32.mxu1 %v23759_v37 }
 0x5b7   : > { %19183 = vmatmul.mubr.msk.f32.vlgmr.msra.gmra.mrb[112].mxu1 %vm8764_vm0, %v19167_v33 }
 0x5b8   : > { %17293 = vmatprep.mubr.f32.mxu1 %v23759_v37 }
 0x5ba   : > { %v13013_v31 = vpop.f32.mrb[60].mxu1 }
 0x5bb   : > { %v13028_v27 = vadd.f32 %v13013_v31, %v12699_v15  ;;  %v13015_v2 = vpop.f32.mrb[61].mxu1  ;;  %19184 = vmatmul.mubr.msk.f32.gmra.mrb[114].mxu1 %vm8764_vm0, %v19168_v50 }
 0x5be   : > { %v13018_v63 = vpop.f32.mrb[62].mxu1 }
 0x5bf   : > { %v13035_v21 = vadd.f32 %v13018_v63, %v12706_v55  ;;  %v13020_v1 = vpop.f32.mrb[63].mxu1 }
 0x5ca   : > { %v13342_v28 = vpop.f32.mrb[64].mxu1 }
 0x5cb   : > { %v13357_v19 = vadd.f32 %v13342_v28, %v13028_v27  ;;  %v13344_v42 = vpop.f32.mrb[65].mxu1 }
 0x5ce   : > { %v13347_v39 = vpop.f32.mrb[66].mxu1 }
 0x5cf   : > { %v13364_v14 = vadd.f32 %v13347_v39, %v13035_v21  ;;  %v13349_v5 = vpop.f32.mrb[67].mxu1  ;;  %v23814_v21 = vld [vmem:[#allocation29_spill] sm:$0xff] }
 0x5da   : > { %v13671_v40 = vpop.f32.mrb[68].mxu1 }
 0x5db   : > { %v13686_v17 = vadd.f32 %v13671_v40, %v13357_v19  ;;  %v13673_v45 = vpop.f32.mrb[69].mxu1  ;;  %v23815_v19 = vld [vmem:[#allocation30_spill] sm:$0xff] }
 0x5de   : > { %v13676_v6 = vpop.f32.mrb[70].mxu1 }
 0x5df   : > { %v13693_v35 = vadd.f32 %v13676_v6, %v13364_v14  ;;  %v13678_v60 = vpop.f32.mrb[71].mxu1  ;;  %v23816_v14 = vld [vmem:[#allocation31_spill] sm:$0xff] }
 0x5ea   : > { %v14000_v16 = vpop.f32.mrb[72].mxu1 }
 0x5eb   : > { %v14015_v23 = vadd.f32 %v14000_v16, %v13686_v17  ;;  %v14002_v59 = vpop.f32.mrb[73].mxu1  ;;  %v23817_v17 = vld [vmem:[#allocation32_spill] sm:$0xff] }
 0x5ee   : > { %v14005_v30 = vpop.f32.mrb[74].mxu1 }
 0x5ef   : > { %v14022_v47 = vadd.f32 %v14005_v30, %v13693_v35  ;;  %v14007_v24 = vpop.f32.mrb[75].mxu1 }
 0x5fa   : > { %v14329_v9 = vpop.f32.mrb[76].mxu1 }
 0x5fb   : > { %v14344_v52 = vadd.f32 %v14329_v9, %v14015_v23  ;;  %v14331_v34 = vpop.f32.mrb[77].mxu1  ;;  %v23818_v23 = vld [vmem:[#allocation18_spill] sm:$0xff] }
 0x5fe   : > { %v14334_v44 = vpop.f32.mrb[78].mxu1 }
 0x5ff   : > { %v14351_v3 = vadd.f32 %v14334_v44, %v14022_v47  ;;  %v14336_v26 = vpop.f32.mrb[79].mxu1  ;;  %v23819_v47 = vld [vmem:[#allocation33_spill] sm:$0xff] }
 0x60a   : > { %v14658_v22 = vpop.f32.mrb[80].mxu1 }
 0x60b   : > { %v14673_v25 = vadd.f32 %v14658_v22, %v14344_v52  ;;  %v14660_v38 = vpop.f32.mrb[81].mxu1 }
 0x60e   : > { %v14663_v0 = vpop.f32.mrb[82].mxu1 }
 0x60f   : > { %v14680_v32 = vadd.f32 %v14663_v0, %v14351_v3  ;;  %v14665_v20 = vpop.f32.mrb[83].mxu1  ;;  %v23820_v3 = vld [vmem:[#allocation34_spill] sm:$0xff] }
 0x61a   : > { %v14987_v54 = vpop.f32.mrb[84].mxu1 }
 0x61b   : > { %v15002_v53 = vadd.f32 %v14987_v54, %v14673_v25  ;;  %v14989_v29 = vpop.f32.mrb[85].mxu1  ;;  %v23821_v25 = vld [vmem:[#allocation35_spill] sm:$0xff] }
 0x61e   : > { %v14992_v58 = vpop.f32.mrb[86].mxu1 }
 0x61f   : > { %v15009_v61 = vadd.f32 %v14992_v58, %v14680_v32  ;;  %v14994_v43 = vpop.f32.mrb[87].mxu1  ;;  %v17318_v58 = vpop.permute.xlu1 %17317 }
 0x62a   : > { %v15316_v49 = vpop.f32.mrb[88].mxu1 }
 0x62b   : > { %v15331_v7 = vadd.f32 %v15316_v49, %v15002_v53  ;;  %v15318_v56 = vpop.f32.mrb[89].mxu1 }
 0x62e   : > { %v15321_v33 = vpop.f32.mrb[90].mxu1 }
 0x62f   : > { %v15338_v51 = vadd.f32 %v15321_v33, %v15009_v61  ;;  %v15323_v46 = vpop.f32.mrb[91].mxu1  ;;  %v17323_v61 = vpop.permute.xlu0 %17322 }
 0x63a   : > { %v15645_v12 = vpop.f32.mrb[92].mxu1 }
 0x63b   : > { %v15660_v50 = vadd.f32 %v15645_v12, %v15331_v7  ;;  %v15647_v11 = vpop.f32.mrb[93].mxu1 }
 0x63e   : > { %v15650_v4 = vpop.f32.mrb[94].mxu1 }
 0x63f   : > { %v15667_v36 = vadd.f32 %v15650_v4, %v15338_v51  ;;  %v15652_v18 = vpop.f32.mrb[95].mxu1 }
 0x64a   : > { %v15974_v48 = vpop.f32.mrb[96].mxu1 }
 0x64b   : > { %v15989_v41 = vadd.f32 %v15974_v48, %v15660_v50  ;;  %v15976_v62 = vpop.f32.mrb[97].mxu1 }
 0x64e   : > { %v15979_v15 = vpop.f32.mrb[98].mxu1 }
 0x64f   : > { %v15996_v10 = vadd.f32 %v15979_v15, %v15667_v36  ;;  %v15981_v57 = vpop.f32.mrb[99].mxu1 }
 0x65a   : > { %v16303_v55 = vpop.f32.mrb[100].mxu1 }
 0x65b   : > { %v16318_v13 = vadd.f32 %v16303_v55, %v15989_v41  ;;  %v16305_v8 = vpop.f32.mrb[101].mxu1 }
 0x65e   : > { %v16308_v31 = vpop.f32.mrb[102].mxu1 }
 0x65f   : > { %v16325_v27 = vadd.f32 %v16308_v31, %v15996_v10  ;;  %v16310_v2 = vpop.f32.mrb[103].mxu1 }
 0x663   : > { %v17059_v63 = vpop.f32.mrb[4].mxu0 }
 0x664   : > { %v19522_v1 = vadd.f32 %v17059_v63, %v23814_v21  ;;  %v17061_v28 = vpop.f32.mrb[5].mxu0 }
 0x665   : > { %v19523_v42 = vadd.f32 %v17061_v28, %v23815_v19 }
 0x666   : > { %v23202_v21 = vadd.f32 %v19522_v1, %v17318_v58 }
 0x667   : > { %v17065_v39 = vpop.f32.mrb[6].mxu0  ;;  %v17326_v10 = vadd.f32 %v19523_v42, %v17318_v58 }
 0x668   : > { %v19524_v5 = vadd.f32 %v17065_v39, %v23816_v14  ;;  %v17067_v40 = vpop.f32.mrb[7].mxu0 }
 0x669   : > { %v23174_v45 = vadd.f32 %v17067_v40, %v23817_v17  ;;  %v17340_v28 = vmax.f32 %v17326_v10, 0.0 }
 0x66a   : > { %v16632_v6 = vpop.f32.mrb[104].mxu1  ;;  %v23195_v31 = vadd.f32 %v19524_v5, %v17323_v61 }
 0x66b   : > { %v16647_v35 = vadd.f32 %v16632_v6, %v16318_v13  ;;  %v17213_v60 = vpop.f32.mrb[8].mxu0  ;;  %v16634_v16 = vpop.f32.mrb[105].mxu1  ;;  %v23212_v1 = vadd.f32 %v23174_v45, %v17323_v61 }
 0x66c   : > { %v19526_v59 = vadd.f32 %v17213_v60, %v23818_v23  ;;  %v17215_v30 = vpop.f32.mrb[9].mxu0  ;;  %v17346_v5 = vmax.f32 %v23195_v31, 0.0 }
 0x66d   : > { %v19527_v24 = vadd.f32 %v17215_v30, %v23819_v47  ;;  %v17347_v47 = vmax.f32 %v23212_v1, 0.0 }
 0x66e   : > { %v16637_v9 = vpop.f32.mrb[106].mxu1  ;;  %v23180_v43 = vadd.f32 %v19526_v59, %v17318_v58 }
 0x66f   : > { %v16654_v52 = vadd.f32 %v16637_v9, %v16325_v27  ;;  %v17219_v34 = vpop.f32.mrb[10].mxu0  ;;  %v16639_v44 = vpop.f32.mrb[107].mxu1  ;;  %v23187_v12 = vadd.f32 %v19527_v24, %v17318_v58 }
 0x670   : > { %v19528_v26 = vadd.f32 %v17219_v34, %v23820_v3  ;;  %v17221_v22 = vpop.f32.mrb[11].mxu0  ;;  %v17343_v46 = vmax.f32 %v23180_v43, 0.0 }
 0x671   : > { %v19529_v38 = vadd.f32 %v17221_v22, %v23821_v25  ;;  %v17344_v15 = vmax.f32 %v23187_v12, 0.0 }
 0x672   : > { %v23182_v7 = vadd.f32 %v19528_v26, %v17323_v61 }
 0x673   : > { %v23184_v33 = vadd.f32 %v19529_v38, %v17323_v61 }
 0x674   : > { %v17350_v4 = vmax.f32 %v23182_v7, 0.0 }
 0x675   : > { %v17351_v18 = vmax.f32 %v23184_v33, 0.0 }
 0x677   : > { %v20052_v27 = vpack.i.bf16 %v17351_v18, %v17350_v4 }
 0x67a   : > { %v16961_v0 = vpop.f32.mrb[108].mxu1 }
 0x67b   : > { %v16976_v32 = vadd.f32 %v16961_v0, %v16647_v35  ;;  %v16963_v20 = vpop.f32.mrb[109].mxu1  ;;  %v17339_v35 = vmax.f32 %v23202_v21, 0.0 }
 0x67d   : > { %v20072_v23 = vpack.i.bf16 %v17346_v5, %v17339_v35 }
 0x67e   : > { %v16966_v54 = vpop.f32.mrb[110].mxu1 }
 0x67f   : > { %v16983_v53 = vadd.f32 %v16966_v54, %v16654_v52  ;;  %v16968_v29 = vpop.f32.mrb[111].mxu1 }
 0x682   : > { %v17136_v49 = vpop.f32.mrb[8].mxu1 }
 0x683   : > { %v17138_v56 = vpop.f32.mrb[9].mxu1  ;;  %v23191_v48 = vadd.f32 %v17318_v58, %v17136_v49 }
 0x684   : > { %v17328_v51 = vadd.f32 %v17318_v58, %v17138_v56 }
 0x685   : > { %v17341_v2 = vmax.f32 %v23191_v48, 0.0 }
 0x686   : > { %v17342_v50 = vmax.f32 %v17328_v51, 0.0  ;;  %v17142_v11 = vpop.f32.mrb[10].mxu1 }
 0x687   : > { %v17144_v36 = vpop.f32.mrb[11].mxu1  ;;  %v20062_v40 = vpack.i.bf16 %v17341_v2, %v17340_v28  ;;  %v23207_v17 = vadd.f32 %v17323_v61, %v17142_v11 }
 0x688   : > { %v20042_v41 = vpack.i.bf16 %v17343_v46, %v17342_v50  ;;  %v17335_v62 = vadd.f32 %v17323_v61, %v17144_v36 }
 0x689   : > { %v17348_v59 = vmax.f32 %v23207_v17, 0.0 }
 0x68a   : > { %v17349_v57 = vmax.f32 %v17335_v62, 0.0  ;;  %20043 = vrot.lane.b32.xlu1 %v20042_v41, %s20255_s24  ;;  %v17290_v55 = vpop.f32.mrb[112].mxu1 }
 0x68b   : > { %v17305_v13 = vadd.f32 %v17290_v55, %v16976_v32  ;;  %v17292_v8 = vpop.f32.mrb[113].mxu1  ;;  %v20067_v24 = vpack.i.bf16 %v17348_v59, %v17347_v47 }
 0x68c   : > { %v20047_v63 = vpack.i.bf16 %v17349_v57, %v17344_v15 }
 0x68d   : > { %v17331_v42 = vadd.f32 %v17318_v58, %v17305_v13 }
 0x68e   : > { %v17295_v19 = vpop.f32.mrb[114].mxu1  ;;  %20053 = vrot.lane.b32.xlu1 %v20052_v27, %s20255_s24  ;;  %20048 = vrot.lane.b32.xlu0 %v20047_v63, %s20255_s24 }
 0x68f   : > { %v17312_v39 = vadd.f32 %v17295_v19, %v16983_v53  ;;  %v17297_v14 = vpop.f32.mrb[115].mxu1  ;;  %v17345_v60 = vmax.f32 %v17331_v42, 0.0 }
 0x691   : > { %v17338_v6 = vadd.f32 %v17323_v61, %v17312_v39 }
 0x692   : > { %20063 = vrot.lane.b32.xlu1 %v20062_v40, %s20255_s24 }
 0x693   : > { %v17352_v16 = vmax.f32 %v17338_v6, 0.0  ;;  %v20278_v6 = vmov 0.0|0.0  }
 0x694   : > { %19454 = vmatprep.subr.bf16.mxu1 %v20278_v6 }
 0x695   : > { %v20057_v30 = vpack.i.bf16 %v17352_v16, %v17345_v60 }
 0x696   : > { %20073 = vrot.lane.b32.xlu1 %v20072_v23, %s20255_s24 }
 0x697   : > { %20058 = vrot.lane.b32.xlu0 %v20057_v30, %s20255_s24 }
 0x69b   : > { %20068 = vrot.lane.b32.xlu0 %v20067_v24, %s20255_s24  ;;  %s20279_s24 = smov 116  }
 0x6fc   : > { %v20044_v9 = vpop.permute.xlu1 %20043 }
 0x6fd   : > { %v20046_v45 = vunpack.i.h.bf16 %v20044_v9  ;;  %v20045_v52 = vunpack.i.l.bf16 %v20044_v9 }
 0x6ff   : > { %v17392_v34 = vsel %vm1053_vm3, %v20045_v52, %v20046_v45 }
 0x700   : > { %v20054_v44 = vpop.permute.xlu1 %20053  ;;  %v20049_v3 = vpop.permute.xlu0 %20048  ;;  %v17412_v54 = vmax.f32 %v17342_v50, %v17392_v34 }
 0x701   : > { %v20056_v26 = vunpack.i.h.bf16 %v20054_v44  ;;  %v20055_v22 = vunpack.i.l.bf16 %v20054_v44  ;;  %v20051_v25 = vunpack.i.h.bf16 %v20049_v3  ;;  %v20050_v38 = vunpack.i.l.bf16 %v20049_v3 }
 0x703   : > { %v17398_v0 = vsel %vm1053_vm3, %v20055_v22, %v20056_v26  ;;  %v17397_v32 = vsel %vm1053_vm3, %v20051_v25, %v20055_v22  ;;  %v17393_v20 = vsel %vm1053_vm3, %v20046_v45, %v20050_v38 }
 0x704   : > { %v23225_v53 = vmax.f32 %v17350_v4, %v17398_v0  ;;  %v17417_v29 = vmax.f32 %v17349_v57, %v17397_v32  ;;  %v23227_v58 = vmax.f32 %v17343_v46, %v17393_v20  ;;  %v20064_v61 = vpop.permute.xlu1 %20063 }
 0x705   : > { %v20066_v43 = vunpack.i.h.bf16 %v20064_v61  ;;  %v20065_v49 = vunpack.i.l.bf16 %v20064_v61 }
 0x706   : > { %v20082_v7 = vpack.i.bf16 %v23225_v53, %v17417_v29  ;;  %v20077_v56 = vpack.i.bf16 %v23227_v58, %v17412_v54 }
 0x707   : > { %v17391_v51 = vsel %vm1053_vm3, %v20066_v43, %v20045_v52  ;;  %v17390_v11 = vsel %vm1053_vm3, %v20065_v49, %v20066_v43 }
 0x708   : > { %v23233_v36 = vmax.f32 %v17341_v2, %v17391_v51  ;;  %v23235_v48 = vmax.f32 %v17340_v28, %v17390_v11  ;;  %v20074_v50 = vpop.permute.xlu1 %20073  ;;  %20083 = vrot.lane.b32.xlu1 %v20082_v7, %s20263_s21  ;;  %20078 = vrot.lane.b32.xlu0 %v20077_v56, %s20263_s21 }
 0x709   : > { %v20059_v46 = vpop.permute.xlu0 %20058  ;;  %v20075_v4 = vunpack.i.l.bf16 %v20074_v50  ;;  %v20076_v2 = vunpack.i.h.bf16 %v20074_v50 }
 0x70a   : > { %v20061_v41 = vunpack.i.h.bf16 %v20059_v46  ;;  %v20060_v62 = vunpack.i.l.bf16 %v20059_v46  ;;  %v20092_v10 = vpack.i.bf16 %v23233_v36, %v23235_v48 }
 0x70b   : > { %v17389_v63 = vsel %vm1053_vm3, %v20075_v4, %v20065_v49 }
 0x70c   : > { %v17426_v57 = vsel %vm1053_vm3, %v20056_v26, %v20061_v41  ;;  %v17425_v55 = vsel %vm1053_vm3, %v20050_v38, %v20060_v62  ;;  %20093 = vrot.lane.b32.xlu1 %v20092_v10, %s20263_s21  ;;  %v17409_v40 = vmax.f32 %v17339_v35, %v17389_v63 }
 0x70d   : > { %v17430_v13 = vmax.f32 %v17351_v18, %v17426_v57  ;;  %v17429_v8 = vmax.f32 %v17344_v15, %v17425_v55  ;;  %v20069_v27 = vpop.permute.xlu0 %20068 }
 0x70e   : > { %v20071_v21 = vunpack.i.h.bf16 %v20069_v27  ;;  %v20070_v28 = vunpack.i.l.bf16 %v20069_v27 }
 0x70f   : > { %v20087_v19 = vpack.i.bf16 %v17430_v13, %v17429_v8 }
 0x710   : > { %v17396_v42 = vsel %vm1053_vm3, %v20071_v21, %v20051_v25  ;;  %v17394_v39 = vsel %vm1053_vm3, %v20076_v2, %v20070_v28  ;;  %v17395_v14 = vsel %vm1053_vm3, %v20070_v28, %v20071_v21  ;;  %vm17728_vm3 = vcmask 130048  }
 0x711   : > { %v17416_v17 = vmax.f32 %v17348_v59, %v17396_v42  ;;  %v17414_v33 = vmax.f32 %v17346_v5, %v17394_v39  ;;  %v17415_v12 = vmax.f32 %v17347_v47, %v17395_v14  ;;  %20088 = vrot.lane.b32.xlu0 %v20087_v19, %s20263_s21 }
 0x713   : > { %v20097_v18 = vpack.i.bf16 %v17416_v17, %v17415_v12  ;;  %v20102_v15 = vpack.i.bf16 %v17414_v33, %v17409_v40 }
 0x715   : > { %20098 = vrot.lane.b32.xlu0 %v20097_v18, %s20263_s21  ;;  %20103 = vrot.lane.b32.xlu1 %v20102_v15, %s20263_s21  ;;  %s20280_s21 = smov 4  }
 0x77a   : > { %v20084_v1 = vpop.permute.xlu1 %20083  ;;  %v20079_v60 = vpop.permute.xlu0 %20078 }
 0x77b   : > { %v20086_v16 = vunpack.i.h.bf16 %v20084_v1  ;;  %v20085_v35 = vunpack.i.l.bf16 %v20084_v1  ;;  %v20081_v23 = vunpack.i.h.bf16 %v20079_v60  ;;  %v20080_v59 = vunpack.i.l.bf16 %v20079_v60 }
 0x77d   : > { %v17475_v31 = vsel %vm3757_vm11, %v20085_v35, %v20086_v16  ;;  %v17470_v5 = vsel %vm3757_vm11, %v20080_v59, %v20081_v23 }
 0x77e   : > { %v23260_v30 = vmax.f32 %v17417_v29, %v17475_v31  ;;  %v23262_v47 = vmax.f32 %v17412_v54, %v17470_v5  ;;  %v20094_v45 = vpop.permute.xlu1 %20093 }
 0x77f   : > { %v20096_v3 = vunpack.i.h.bf16 %v20094_v45  ;;  %v20095_v26 = vunpack.i.l.bf16 %v20094_v45 }
 0x780   : > { %v20107_v24 = vpack.i.bf16 %v23260_v30, %v23262_v47  ;;  %v19450_v9 = vpack.c.bf16 %v23260_v30, %v23262_v47  ;;  %v17658_v30 = vld [vmem:[%s23711_s5 + $0x28] sm:$0xff]  ;;  %v17657_v47 = vld [vmem:[%s23711_s5 + $0x20] sm:$0xff] }
 0x781   : > { %v17468_v49 = vsel %vm3757_vm11, %v20095_v26, %v20096_v3  ;;  %v17469_v7 = vsel %vm3757_vm11, %v20096_v3, %v20080_v59 }
 0x782   : > { %20108 = vrot.lane.b32.xlu0 %v20107_v24, %s20257_s26  ;;  %20113 = vrot.lane.b32.xlu1 %v20107_v24, %s20275_s16  ;;  %v23287_v62 = vmax.f32 %v23233_v36, %v17469_v7  ;;  %v23290_v10 = vmax.f32 %v23235_v48, %v17468_v49 }
 0x783   : > { %v20089_v52 = vpop.permute.xlu0 %20088 }
 0x784   : > { %v20091_v34 = vunpack.i.h.bf16 %v20089_v52  ;;  %v20090_v44 = vunpack.i.l.bf16 %v20089_v52  ;;  %v17656_v52 = vld [vmem:[%s23711_s5 + $0x18] sm:$0xff] }
 0x785   : > { %19185 = vmatprep.mubr.msk.f32.mxu1 %vm17728_vm3, %v17656_v52 }
 0x786   : > { %v17476_v22 = vsel %vm3757_vm11, %v20086_v16, %v20091_v34  ;;  %v17471_v25 = vsel %vm3757_vm11, %v20081_v23, %v20090_v44  ;;  %20118 = vrot.lane.b32.xlu0 %v20107_v24, %s20279_s24  ;;  %v17654_v23 = vld [vmem:[%s23711_s5 + $0x8] sm:$0xff] }
 0x787   : > { %v17496_v38 = vmax.f32 %v23225_v53, %v17476_v22  ;;  %v17491_v0 = vmax.f32 %v23227_v58, %v17471_v25  ;;  %v20099_v32 = vpop.permute.xlu0 %20098  ;;  %v20104_v20 = vpop.permute.xlu1 %20103  ;;  %17838 = vmatprep.mubr.f32.mxu0 %v17654_v23 }
 0x788   : > { %v20101_v54 = vunpack.i.h.bf16 %v20099_v32  ;;  %v20100_v29 = vunpack.i.l.bf16 %v20099_v32  ;;  %v20106_v61 = vunpack.i.h.bf16 %v20104_v20  ;;  %v20105_v43 = vunpack.i.l.bf16 %v20104_v20 }
 0x789   : > { %v20127_v56 = vpack.i.bf16 %v17496_v38, %v17491_v0 }
 0x78a   : > { %v17474_v51 = vsel %vm3757_vm11, %v20101_v54, %v20085_v35  ;;  %v17473_v11 = vsel %vm3757_vm11, %v20100_v29, %v20101_v54  ;;  %v17472_v50 = vsel %vm3757_vm11, %v20106_v61, %v20100_v29  ;;  %v17467_v53 = vsel %vm3757_vm11, %v20105_v43, %v20095_v26 }
 0x78b   : > { %v23281_v58 = vmax.f32 %v17416_v17, %v17474_v51  ;;  %v23283_v46 = vmax.f32 %v17415_v12, %v17473_v11  ;;  %v17492_v4 = vmax.f32 %v17414_v33, %v17472_v50  ;;  %v17487_v41 = vmax.f32 %v17409_v40, %v17467_v53  ;;  %20128 = vrot.lane.b32.xlu0 %v20127_v56, %s20257_s26 }
 0x78c   : > { %20123 = vrot.lane.b32.xlu1 %v20127_v56, %s20280_s21  ;;  %vm20282_vm11 = vmmov 0  }
 0x78d   : > { %v20182_v57 = vpack.i.bf16 %v23281_v58, %v23287_v62  ;;  %v20192_v55 = vpack.i.bf16 %v17492_v4, %v17487_v41  ;;  %v20212_v13 = vpack.i.bf16 %v23283_v46, %v23290_v10  ;;  %v19424_v8 = vpack.c.bf16 %v17492_v4, %v17487_v41 }
 0x78e   : > { %v19430_v36 = vpack.c.bf16 %v23281_v58, %v23287_v62  ;;  %v19444_v27 = vpack.c.bf16 %v23283_v46, %v23290_v10 }
 0x78f   : > { %20138 = vrot.lane.b32.xlu0 %v20127_v56, %s20279_s24 }
 0x790   : > { %20133 = vrot.lane.b32.xlu1 %v20127_v56, %s20275_s16 }
 0x793   : > { %20148 = vrot.lane.b32.xlu0 %v20212_v13, %s20281_s15 }
 0x794   : > { %20143 = vrot.lane.b32.xlu1 %v20212_v13, %s20279_s24 }
 0x797   : > { %20168 = vrot.lane.b32.xlu0 %v20192_v55, %s20279_s24 }
 0x798   : > { %20153 = vrot.lane.b32.xlu1 %v20192_v55, %s20257_s26 }
 0x79c   : > { %20158 = vrot.lane.b32.xlu1 %v20192_v55, %s20275_s16 }
 0x7a0   : > { %20163 = vrot.lane.b32.xlu1 %v20182_v57, %s20257_s26 }
 0x7f4   : > { %v20109_v48 = vpop.permute.xlu0 %20108  ;;  %v20114_v2 = vpop.permute.xlu1 %20113 }
 0x7f5   : > { %v20111_v63 = vunpack.i.h.bf16 %v20109_v48  ;;  %v20110_v21 = vunpack.i.l.bf16 %v20109_v48  ;;  %20173 = vrot.lane.b32.xlu0 %v20109_v48, %s20257_s26 }
 0x7f7   : > { %v19455_v28 = vpack.c.bf16 %v20111_v63, %v20110_v21 }
 0x7f8   : > { %v20119_v19 = vpop.permute.xlu0 %20118 }
 0x7f9   : > { %19456 = vmatpush1.bf16.msra.mxu1 %v19455_v28  ;;  %20178 = vrot.lane.b32.xlu0 %v20114_v2, %s20257_s26 }
 0x7fa   : > { %19457 = vmatprep.subr.bf16.mxu1 %v20278_v6  ;;  %20188 = vrot.lane.b32.xlu1 %v20119_v19, %s20257_s26 }
 0x7fd   : > { %v20129_v42 = vpop.permute.xlu0 %20128  ;;  %20183 = vrot.lane.b32.xlu0 %v20182_v57, %s20275_s16 }
 0x7fe   : > { %v20131_v39 = vunpack.i.h.bf16 %v20129_v42  ;;  %v20130_v14 = vunpack.i.l.bf16 %v20129_v42  ;;  %v20124_v40 = vpop.permute.xlu1 %20123  ;;  %20193 = vrot.lane.b32.xlu1 %v20192_v55, %s20281_s15 }
 0x800   : > { %v23312_v17 = vpack.c.bf16 %v20131_v39, %v20130_v14 }
 0x801   : > { %v20139_v33 = vpop.permute.xlu0 %20138  ;;  %20203 = vrot.lane.b32.xlu0 %v20124_v40, %s20257_s26 }
 0x802   : > { %v20134_v12 = vpop.permute.xlu1 %20133  ;;  %20198 = vrot.lane.b32.xlu1 %v20182_v57, %s20279_s24 }
 0x805   : > { %v20149_v18 = vpop.permute.xlu0 %20148  ;;  %20208 = vrot.lane.b32.xlu0 %v20182_v57, %s20281_s15 }
 0x806   : > { %v20144_v15 = vpop.permute.xlu1 %20143  ;;  %v20151_v1 = vunpack.i.h.bf16 %v20149_v18  ;;  %v20150_v60 = vunpack.i.l.bf16 %v20149_v18  ;;  %20213 = vrot.lane.b32.xlu1 %v20212_v13, %s20257_s26 }
 0x807   : > { %v20146_v16 = vunpack.i.h.bf16 %v20144_v15  ;;  %v20145_v35 = vunpack.i.l.bf16 %v20144_v15 }
 0x808   : > { %v19426_v5 = vpack.c.bf16 %v20151_v1, %v20150_v60 }
 0x809   : > { %v19422_v59 = vpack.c.bf16 %v20146_v16, %v20145_v35  ;;  %20223 = vrot.lane.b32.xlu0 %v20129_v42, %s20257_s26  ;;  %v20169_v3 = vpop.permute.xlu0 %20168 }
 0x80a   : > { %v20154_v31 = vpop.permute.xlu1 %20153  ;;  %20218 = vrot.lane.b32.xlu1 %v20212_v13, %s20275_s16  ;;  %v20171_v38 = vunpack.i.h.bf16 %v20169_v3  ;;  %v20170_v0 = vunpack.i.l.bf16 %v20169_v3 }
 0x80b   : > { %v20156_v24 = vunpack.i.h.bf16 %v20154_v31  ;;  %v20155_v45 = vunpack.i.l.bf16 %v20154_v31  ;;  %19423 = vmatprep.subr.bf16.mxu0 %v19422_v59 }
 0x80c   : > { %19425 = vmatpush3.bf16.msra.mxu0 %v19424_v8  ;;  %v19436_v61 = vpack.c.bf16 %v20171_v38, %v20170_v0  ;;  %v17662_v38 = vld [vmem:[%s23711_s5 + $0x48] sm:$0xff]  ;;  %v17655_v0 = vld [vmem:[%s23711_s5 + $0x10] sm:$0xff] }
 0x80d   : > { %v19428_v34 = vpack.c.bf16 %v20156_v24, %v20155_v45  ;;  %19427 = vmatprep.subr.bf16.mxu0 %v19426_v5  ;;  %20228 = vrot.lane.b32.xlu0 %v20134_v12, %s20257_s26 }
 0x80e   : > { %v20159_v44 = vpop.permute.xlu1 %20158  ;;  %20233 = vrot.lane.b32.xlu1 %v20139_v33, %s20257_s26 }
 0x80f   : > { %v20161_v26 = vunpack.i.h.bf16 %v20159_v44  ;;  %v20160_v22 = vunpack.i.l.bf16 %v20159_v44 }
 0x810   : > { %19429 = vmatpush3.bf16.msra.mxu0 %v19428_v34 }
 0x811   : > { %v19432_v25 = vpack.c.bf16 %v20161_v26, %v20160_v22  ;;  %19431 = vmatprep.subr.bf16.mxu0 %v19430_v36 }
 0x812   : > { %v20164_v32 = vpop.permute.xlu1 %20163 }
 0x813   : > { %v20166_v20 = vunpack.i.h.bf16 %v20164_v32  ;;  %v20165_v54 = vunpack.i.l.bf16 %v20164_v32  ;;  %v17661_v32 = vld [vmem:[%s23711_s5 + $0x40] sm:$0xff] }
 0x814   : > { %19433 = vmatpush3.bf16.msra.mxu0 %v19432_v25 }
 0x815   : > { %v19434_v29 = vpack.c.bf16 %v20166_v20, %v20165_v54  ;;  %v17660_v20 = vld [vmem:[%s23711_s5 + $0x38] sm:$0xff]  ;;  %v17666_v54 = vld [vmem:[%s23711_s5 + $0x68] sm:$0xff] }
 0x817   : > { %19435 = vmatprep.subr.bf16.mxu0 %v19434_v29  ;;  %v17659_v29 = vld [vmem:[%s23711_s5 + $0x30] sm:$0xff] }
 0x818   : > { %19437 = vmatpush3.bf16.msra.mxu0 %v19436_v61  ;;  %v17665_v61 = vld [vmem:[%s23711_s5 + $0x60] sm:$0xff] }
 0x867   : > { %v20174_v43 = vpop.permute.xlu0 %20173 }
 0x868   : > { %v20176_v49 = vunpack.i.h.bf16 %v20174_v43  ;;  %v20175_v7 = vunpack.i.l.bf16 %v20174_v43  ;;  %v17664_v43 = vld [vmem:[%s23711_s5 + $0x58] sm:$0xff] }
 0x86a   : > { %v19458_v56 = vpack.c.bf16 %v20176_v49, %v20175_v7  ;;  %v17670_v49 = vld [vmem:[%s23711_s5 + $0x88] sm:$0xff]  ;;  %v17663_v7 = vld [vmem:[%s23711_s5 + $0x50] sm:$0xff] }
 0x86b   : > { %v20179_v51 = vpop.permute.xlu0 %20178 }
 0x86c   : > { %v20189_v11 = vpop.permute.xlu1 %20188  ;;  %v20181_v50 = vunpack.i.h.bf16 %v20179_v51  ;;  %v20180_v53 = vunpack.i.l.bf16 %v20179_v51  ;;  %19459 = vmatpush1.bf16.msra.mxu1 %v19458_v56  ;;  %v17669_v56 = vld [vmem:[%s23711_s5 + $0x80] sm:$0xff]  ;;  %v17668_v51 = vld [vmem:[%s23711_s5 + $0x78] sm:$0xff] }
 0x86d   : > { %19460 = vmatprep.subr.bf16.mxu1 %v20278_v6  ;;  %v20191_v4 = vunpack.i.h.bf16 %v20189_v11  ;;  %v20190_v41 = vunpack.i.l.bf16 %v20189_v11  ;;  %v17674_v11 = vld [vmem:[%s23711_s5 + $0xa8] sm:$0xff] }
 0x86e   : > { %v19461_v58 = vpack.c.bf16 %v20181_v50, %v20180_v53  ;;  %v17667_v50 = vld [vmem:[%s23711_s5 + $0x70] sm:$0xff]  ;;  %v17673_v53 = vld [vmem:[%s23711_s5 + $0xa0] sm:$0xff] }
 0x86f   : > { %v20184_v62 = vpop.permute.xlu0 %20183  ;;  %v19464_v48 = vpack.c.bf16 %v20191_v4, %v20190_v41  ;;  %v17678_v4 = vld [vmem:[%s23711_s5 + $0xc8] sm:$0xff]  ;;  %v17671_v41 = vld [vmem:[%s23711_s5 + $0x90] sm:$0xff] }
 0x870   : > { %v20194_v57 = vpop.permute.xlu1 %20193  ;;  %v20186_v55 = vunpack.i.h.bf16 %v20184_v62  ;;  %v20185_v13 = vunpack.i.l.bf16 %v20184_v62  ;;  %19462 = vmatpush1.bf16.msra.mxu1 %v19461_v58  ;;  %v17672_v58 = vld [vmem:[%s23711_s5 + $0x98] sm:$0xff]  ;;  %v17677_v62 = vld [vmem:[%s23711_s5 + $0xc0] sm:$0xff] }
 0x871   : > { %v20196_v8 = vunpack.i.h.bf16 %v20194_v57  ;;  %v20195_v36 = vunpack.i.l.bf16 %v20194_v57  ;;  %19463 = vmatprep.subr.bf16.mxu1 %v20278_v6  ;;  %v17676_v57 = vld [vmem:[%s23711_s5 + $0xb8] sm:$0xff] }
 0x872   : > { %v19438_v2 = vpack.c.bf16 %v20186_v55, %v20185_v13  ;;  %v17682_v55 = vld [vmem:[%s23711_s5 + $0xe8] sm:$0xff]  ;;  %v17675_v13 = vld [vmem:[%s23711_s5 + $0xb0] sm:$0xff] }
 0x873   : > { %v19440_v63 = vpack.c.bf16 %v20196_v8, %v20195_v36  ;;  %v20204_v21 = vpop.permute.xlu0 %20203  ;;  %v17681_v8 = vld [vmem:[%s23711_s5 + $0xe0] sm:$0xff]  ;;  %v17680_v36 = vld [vmem:[%s23711_s5 + $0xd8] sm:$0xff] }
 0x874   : > { %v20199_v28 = vpop.permute.xlu1 %20198  ;;  %v20206_v19 = vunpack.i.h.bf16 %v20204_v21  ;;  %v20205_v42 = vunpack.i.l.bf16 %v20204_v21  ;;  %19439 = vmatprep.subr.bf16.mxu0 %v19438_v2  ;;  %19465 = vmatpush1.bf16.msra.mxu1 %v19464_v48  ;;  %v17686_v48 = vld [vmem:[%s23711_s5 + $0x108] sm:$0xff]  ;;  %v17679_v2 = vld [vmem:[%s23711_s5 + $0xd0] sm:$0xff]  ;;  %v17684_v21 = vld [vmem:[%s23711_s5 + $0xf8] sm:$0xff] }
 0x875   : > { %v20201_v39 = vunpack.i.h.bf16 %v20199_v28  ;;  %v20200_v14 = vunpack.i.l.bf16 %v20199_v28  ;;  %19441 = vmatpush3.bf16.msra.mxu0 %v19440_v63  ;;  %19466 = vmatprep.subr.bf16.mxu1 %v20278_v6  ;;  %v17685_v63 = vld [vmem:[%s23711_s5 + $0x100] sm:$0xff]  ;;  %v17690_v28 = vld [vmem:[%s23711_s5 + $0x128] sm:$0xff] }
 0x876   : > { %v19467_v40 = vpack.c.bf16 %v20206_v19, %v20205_v42  ;;  %v17683_v19 = vld [vmem:[%s23711_s5 + $0xf0] sm:$0xff]  ;;  %v17689_v42 = vld [vmem:[%s23711_s5 + $0x120] sm:$0xff] }
 0x877   : > { %v19442_v33 = vpack.c.bf16 %v20201_v39, %v20200_v14  ;;  %v20209_v12 = vpop.permute.xlu0 %20208  ;;  %v17688_v39 = vld [vmem:[%s23711_s5 + $0x118] sm:$0xff]  ;;  %v17694_v14 = vld [vmem:[%s23711_s5 + $0x148] sm:$0xff] }
 0x878   : > { %v20214_v18 = vpop.permute.xlu1 %20213  ;;  %v20211_v15 = vunpack.i.h.bf16 %v20209_v12  ;;  %v20210_v1 = vunpack.i.l.bf16 %v20209_v12  ;;  %19468 = vmatpush1.bf16.msra.mxu1 %v19467_v40  ;;  %v17687_v40 = vld [vmem:[%s23711_s5 + $0x110] sm:$0xff]  ;;  %v17692_v12 = vld [vmem:[%s23711_s5 + $0x138] sm:$0xff] }
 0x879   : > { %v20216_v60 = vunpack.i.h.bf16 %v20214_v18  ;;  %v20215_v16 = vunpack.i.l.bf16 %v20214_v18  ;;  %19443 = vmatprep.subr.bf16.mxu0 %v19442_v33  ;;  %19469 = vmatprep.subr.bf16.mxu1 %v20278_v6  ;;  %v17693_v33 = vld [vmem:[%s23711_s5 + $0x140] sm:$0xff]  ;;  %v17698_v18 = vld [vmem:[%s23711_s5 + $0x168] sm:$0xff] }
 0x87a   : > { %19445 = vmatpush3.bf16.msra.mxu0 %v19444_v27  ;;  %v19446_v35 = vpack.c.bf16 %v20211_v15, %v20210_v1  ;;  %v17691_v15 = vld [vmem:[%s23711_s5 + $0x130] sm:$0xff]  ;;  %v17697_v1 = vld [vmem:[%s23711_s5 + $0x160] sm:$0xff] }
 0x87b   : > { %v19448_v23 = vpack.c.bf16 %v20216_v60, %v20215_v16  ;;  %v20224_v59 = vpop.permute.xlu0 %20223  ;;  %v17696_v60 = vld [vmem:[%s23711_s5 + $0x158] sm:$0xff]  ;;  %v17702_v16 = vld [vmem:[%s23711_s5 + $0x188] sm:$0xff] }
 0x87c   : > { %v20226_v31 = vunpack.i.h.bf16 %v20224_v59  ;;  %v20225_v5 = vunpack.i.l.bf16 %v20224_v59  ;;  %v20219_v24 = vpop.permute.xlu1 %20218  ;;  %19447 = vmatprep.subr.bf16.mxu0 %v19446_v35  ;;  %19471 = vmatpush1.bf16.msra.mxu1 %v23312_v17  ;;  %v17653_v17 = vld [vmem:[%s23711_s5] sm:$0xff]  ;;  %v17695_v35 = vld [vmem:[%s23711_s5 + $0x150] sm:$0xff]  ;;  %v17700_v59 = vld [vmem:[%s23711_s5 + $0x178] sm:$0xff] }
 0x87d   : > { %v20221_v45 = vunpack.i.h.bf16 %v20219_v24  ;;  %v20220_v52 = vunpack.i.l.bf16 %v20219_v24  ;;  %19472 = vmatprep.subr.bf16.mxu1 %v20278_v6  ;;  %v17705_v24 = vld [vmem:[%s23711_s5 + $0x1a0] sm:$0xff] }
 0x87e   : > { %19449 = vmatpush3.bf16.msra.mxu0 %v19448_v23  ;;  %v19473_v34 = vpack.c.bf16 %v20226_v31, %v20225_v5  ;;  %v17701_v23 = vld [vmem:[%s23711_s5 + $0x180] sm:$0xff]  ;;  %v17706_v31 = vld [vmem:[%s23711_s5 + $0x1a8] sm:$0xff]  ;;  %v17699_v5 = vld [vmem:[%s23711_s5 + $0x170] sm:$0xff] }
 0x87f   : > { %19451 = vmatprep.subr.bf16.mxu0 %v19450_v9  ;;  %v19452_v46 = vpack.c.bf16 %v20221_v45, %v20220_v52  ;;  %v20229_v10 = vpop.permute.xlu0 %20228  ;;  %v17704_v45 = vld [vmem:[%s23711_s5 + $0x198] sm:$0xff]  ;;  %v17710_v52 = vld [vmem:[%s23711_s5 + $0x1c8] sm:$0xff] }
 0x880   : > { %v20231_v27 = vunpack.i.h.bf16 %v20229_v10  ;;  %v20230_v44 = vunpack.i.l.bf16 %v20229_v10  ;;  %v20234_v3 = vpop.permute.xlu1 %20233  ;;  %19474 = vmatpush1.bf16.msra.mxu1 %v19473_v34  ;;  %v17703_v34 = vld [vmem:[%s23711_s5 + $0x190] sm:$0xff]  ;;  %v17709_v10 = vld [vmem:[%s23711_s5 + $0x1c0] sm:$0xff] }
 0x881   : > { %19475 = vmatprep.subr.bf16.mxu1 %v20278_v6  ;;  %v20236_v22 = vunpack.i.h.bf16 %v20234_v3  ;;  %v20235_v25 = vunpack.i.l.bf16 %v20234_v3  ;;  %v17711_v3 = vld [vmem:[%s23711_s5 + $0x1d0] sm:$0xff] }
 0x882   : > { %19453 = vmatpush3.bf16.msra.mxu0 %v19452_v46  ;;  %v19476_v26 = vpack.c.bf16 %v20231_v27, %v20230_v44  ;;  %v17708_v46 = vld [vmem:[%s23711_s5 + $0x1b8] sm:$0xff]  ;;  %v17707_v27 = vld [vmem:[%s23711_s5 + $0x1b0] sm:$0xff] }
 0x883   : > { %19481 = vmatprep.subr.bf16.mxu0 %v20278_v6  ;;  %v19479_v9 = vpack.c.bf16 %v20236_v22, %v20235_v25  ;;  %v17712_v44 = vld [vmem:[%s23711_s5 + $0x1d8] sm:$0xff]  ;;  %v17713_v22 = vld [vmem:[%s23712_s6] sm:$0xff] }
 0x884   : > { %19477 = vmatpush1.bf16.msra.mxu1 %v19476_v26 }
 0x885   : > { %17839 = vmatmul.mubr.f32.vlgmr.msra.gmra.mrb[12].mxu0 %v17653_v17  ;;  %19478 = vmatprep.subr.bf16.mxu1 %v20278_v6 }
 0x886   : > { %17843 = vmatprep.mubr.f32.mxu0 %v17658_v30 }
 0x888   : > { %19480 = vmatpush1.bf16.msra.mxu1 %v19479_v9 }
 0x889   : > { %17844 = vmatmul.mubr.f32.gmra.mrb[14].mxu0 %v17657_v47 }
 0x88a   : > { %17848 = vmatprep.mubr.f32.mxu0 %v17662_v38  ;;  %v17714_v38 = vld [vmem:[%s23712_s6 + $0x8] sm:$0xff] }
 0x88b   : > { %17979 = vmatmul.mubr.f32.vlgmr.msra.gmra.mrb[116].mxu1 %v17655_v0 }
 0x88c   : > { %19186 = vmatprep.mubr.msk.f32.mxu1 %vm17728_vm3, %v17660_v20 }
 0x88d   : > { %17849 = vmatmul.mubr.f32.gmra.mrb[16].mxu0 %v17661_v32 }
 0x88e   : > { %17853 = vmatprep.mubr.f32.mxu0 %v17666_v54 }
 0x88f   : > { %17984 = vmatmul.mubr.f32.gmra.mrb[118].mxu1 %v17659_v29 }
 0x890   : > { %19187 = vmatprep.mubr.msk.f32.mxu1 %vm17728_vm3, %v17664_v43 }
 0x891   : > { %17854 = vmatmul.mubr.f32.gmra.mrb[18].mxu0 %v17665_v61 }
 0x892   : > { %17858 = vmatprep.mubr.f32.mxu0 %v17670_v49  ;;  %v17715_v49 = vld [vmem:[%s23712_s6 + $0x10] sm:$0xff] }
 0x893   : > { %17989 = vmatmul.mubr.f32.gmra.mrb[120].mxu1 %v17663_v7 }
 0x894   : > { %19188 = vmatprep.mubr.msk.f32.mxu1 %vm17728_vm3, %v17668_v51 }
 0x895   : > { %17859 = vmatmul.mubr.f32.gmra.mrb[20].mxu0 %v17669_v56 }
 0x896   : > { %17863 = vmatprep.mubr.f32.mxu0 %v17674_v11 }
 0x897   : > { %17994 = vmatmul.mubr.f32.gmra.mrb[122].mxu1 %v17667_v50 }
 0x898   : > { %19189 = vmatprep.mubr.msk.f32.mxu1 %vm17728_vm3, %v17672_v58 }
 0x899   : > { %17864 = vmatmul.mubr.f32.gmra.mrb[22].mxu0 %v17673_v53 }
 0x89a   : > { %17868 = vmatprep.mubr.f32.mxu0 %v17678_v4  ;;  %v17716_v4 = vld [vmem:[%s23712_s6 + $0x18] sm:$0xff] }
 0x89b   : > { %17999 = vmatmul.mubr.f32.gmra.mrb[124].mxu1 %v17671_v41 }
 0x89c   : > { %19190 = vmatprep.mubr.msk.f32.mxu1 %vm17728_vm3, %v17676_v57 }
 0x89d   : > { %17869 = vmatmul.mubr.f32.gmra.mrb[24].mxu0 %v17677_v62 }
 0x89e   : > { %17873 = vmatprep.mubr.f32.mxu0 %v17682_v55 }
 0x89f   : > { %18004 = vmatmul.mubr.f32.gmra.mrb[126].mxu1 %v17675_v13 }
 0x8a0   : > { %19191 = vmatprep.mubr.msk.f32.mxu1 %vm17728_vm3, %v17680_v36 }
 0x8a1   : > { %17874 = vmatmul.mubr.f32.gmra.mrb[26].mxu0 %v17681_v8 }
 0x8a2   : > { %17878 = vmatprep.mubr.f32.mxu0 %v17686_v48 }
 0x8a3   : > { %18009 = vmatmul.mubr.f32.gmra.mrb[128].mxu1 %v17679_v2 }
 0x8a4   : > { %19192 = vmatprep.mubr.msk.f32.mxu1 %vm17728_vm3, %v17684_v21  ;;  %v17717_v21 = vld [vmem:[%s23712_s6 + $0x20] sm:$0xff] }
 0x8a5   : > { %17879 = vmatmul.mubr.f32.gmra.mrb[28].mxu0 %v17685_v63 }
 0x8a6   : > { %17883 = vmatprep.mubr.f32.mxu0 %v17690_v28 }
 0x8a7   : > { %18014 = vmatmul.mubr.f32.gmra.mrb[130].mxu1 %v17683_v19 }
 0x8a8   : > { %19193 = vmatprep.mubr.msk.f32.mxu1 %vm17728_vm3, %v17688_v39 }
 0x8a9   : > { %17884 = vmatmul.mubr.f32.gmra.mrb[30].mxu0 %v17689_v42 }
 0x8aa   : > { %17888 = vmatprep.mubr.f32.mxu0 %v17694_v14 }
 0x8ab   : > { %18019 = vmatmul.mubr.f32.gmra.mrb[132].mxu1 %v17687_v40 }
 0x8ac   : > { %19194 = vmatprep.mubr.msk.f32.mxu1 %vm17728_vm3, %v17692_v12  ;;  %v17718_v12 = vld [vmem:[%s23712_s6 + $0x28] sm:$0xff] }
 0x8ad   : > { %17889 = vmatmul.mubr.f32.gmra.mrb[32].mxu0 %v17693_v33 }
 0x8ae   : > { %17893 = vmatprep.mubr.f32.mxu0 %v17698_v18 }
 0x8af   : > { %18024 = vmatmul.mubr.f32.gmra.mrb[134].mxu1 %v17691_v15 }
 0x8b0   : > { %19195 = vmatprep.mubr.msk.f32.mxu1 %vm17728_vm3, %v17696_v60 }
 0x8b1   : > { %17894 = vmatmul.mubr.f32.gmra.mrb[34].mxu0 %v17697_v1 }
 0x8b2   : > { %17898 = vmatprep.mubr.f32.mxu0 %v17702_v16 }
 0x8b3   : > { %18029 = vmatmul.mubr.f32.gmra.mrb[136].mxu1 %v17695_v35 }
 0x8b4   : > { %19196 = vmatprep.mubr.msk.f32.mxu1 %vm17728_vm3, %v17700_v59 }
 0x8b5   : > { %17899 = vmatmul.mubr.f32.gmra.mrb[36].mxu0 %v17701_v23 }
 0x8b6   : > { %17903 = vmatprep.mubr.f32.mxu0 %v17706_v31 }
 0x8b7   : > { %18034 = vmatmul.mubr.f32.gmra.mrb[138].mxu1 %v17699_v5 }
 0x8b8   : > { %19197 = vmatprep.mubr.msk.f32.mxu1 %vm17728_vm3, %v17704_v45 }
 0x8b9   : > { %17904 = vmatmul.mubr.f32.gmra.mrb[38].mxu0 %v17705_v24  ;;  %v17719_v24 = vld [vmem:[%s23712_s6 + $0x30] sm:$0xff] }
 0x8ba   : > { %17908 = vmatprep.mubr.f32.mxu0 %v17710_v52 }
 0x8bb   : > { %18039 = vmatmul.mubr.f32.gmra.mrb[140].mxu1 %v17703_v34 }
 0x8bc   : > { %19198 = vmatprep.mubr.msk.f32.mxu1 %vm17728_vm3, %v17708_v46 }
 0x8bd   : > { %17909 = vmatmul.mubr.f32.gmra.mrb[40].mxu0 %v17709_v10 }
 0x8be   : > { %19364 = vmatprep.mubr.msk.f32.mxu0 %vm20282_vm11, %v23759_v37 }
 0x8bf   : > { %18044 = vmatmul.mubr.f32.gmra.mrb[142].mxu1 %v17707_v27 }
 0x8c0   : > { %19199 = vmatprep.mubr.msk.f32.mxu1 %vm17728_vm3, %v17712_v44 }
 0x8c3   : > { %18049 = vmatmul.mubr.f32.gmra.mrb[144].mxu1 %v17711_v3  ;;  %v17720_v3 = vld [vmem:[%s23712_s6 + $0x38] sm:$0xff] }
 0x958   : > { %v19250_v17 = vpop.f32.mrb[12].mxu0 }
 0x959   : > { %v19251_v26 = vpop.f32.mrb[13].mxu0 }
 0x95a   : > { %v19252_v25 = vadd.f32 %v19251_v26, %v19250_v17 }
 0x95c   : > { %v19253_v30 = vpop.f32.mrb[14].mxu0  ;;  %v17841_v47 = vadd.f32 %v19252_v25, %v17713_v22 }
 0x95d   : > { %v19254_v9 = vpop.f32.mrb[15].mxu0 }
 0x95e   : > { %v19255_v0 = vadd.f32 %v19254_v9, %v19253_v30  ;;  %v17980_v32 = vpop.f32.mrb[116].mxu1 }
 0x95f   : > { %v17981_v20 = vadd.f32 %v17980_v32, %v17841_v47  ;;  %v17982_v54 = vpop.f32.mrb[117].mxu1 }
 0x960   : > { %v19256_v29 = vpop.f32.mrb[16].mxu0  ;;  %v17846_v61 = vadd.f32 %v19255_v0, %v17714_v38 }
 0x961   : > { %v19257_v43 = vpop.f32.mrb[17].mxu0  ;;  %v18054_v41 = vmax.f32 %v17981_v20, 0.0  ;;  %v17721_v20 = vld [vmem:[%s23712_s6 + $0x40] sm:$0xff] }
 0x962   : > { %v19258_v7 = vadd.f32 %v19257_v43, %v19256_v29  ;;  %v17985_v56 = vpop.f32.mrb[118].mxu1 }
 0x963   : > { %v17986_v51 = vadd.f32 %v17985_v56, %v17846_v61  ;;  %v17987_v11 = vpop.f32.mrb[119].mxu1 }
 0x964   : > { %v19259_v50 = vpop.f32.mrb[18].mxu0  ;;  %v17851_v53 = vadd.f32 %v19258_v7, %v17715_v49 }
 0x965   : > { %v19260_v58 = vpop.f32.mrb[19].mxu0  ;;  %v18055_v62 = vmax.f32 %v17986_v51, 0.0  ;;  %v17722_v51 = vld [vmem:[%s23712_s6 + $0x48] sm:$0xff] }
 0x966   : > { %v19261_v57 = vadd.f32 %v19260_v58, %v19259_v50  ;;  %v17990_v55 = vpop.f32.mrb[120].mxu1 }
 0x967   : > { %v19482_v13 = vpack.c.bf16 %v18055_v62, %v18054_v41  ;;  %v17991_v8 = vadd.f32 %v17990_v55, %v17851_v53  ;;  %v17992_v36 = vpop.f32.mrb[121].mxu1 }
 0x968   : > { %v19262_v48 = vpop.f32.mrb[20].mxu0  ;;  %v17856_v2 = vadd.f32 %v19261_v57, %v17716_v4 }
 0x969   : > { %v19263_v63 = vpop.f32.mrb[21].mxu0  ;;  %19483 = vmatpush3.bf16.msra.mxu0 %v19482_v13  ;;  %v18056_v18 = vmax.f32 %v17991_v8, 0.0  ;;  %v17723_v8 = vld [vmem:[%s23712_s6 + $0x50] sm:$0xff] }
 0x96a   : > { %v19264_v28 = vadd.f32 %v19263_v63, %v19262_v48  ;;  %v17995_v19 = vpop.f32.mrb[122].mxu1  ;;  %19484 = vmatprep.subr.bf16.mxu0 %v20278_v6 }
 0x96b   : > { %v17996_v42 = vadd.f32 %v17995_v19, %v17856_v2  ;;  %v17997_v39 = vpop.f32.mrb[123].mxu1 }
 0x96c   : > { %v19265_v14 = vpop.f32.mrb[22].mxu0  ;;  %v17861_v40 = vadd.f32 %v19264_v28, %v17717_v21 }
 0x96d   : > { %v19266_v33 = vpop.f32.mrb[23].mxu0  ;;  %v18057_v15 = vmax.f32 %v17996_v42, 0.0  ;;  %v17724_v42 = vld [vmem:[%s23712_s6 + $0x58] sm:$0xff] }
 0x96e   : > { %v19267_v1 = vadd.f32 %v19266_v33, %v19265_v14  ;;  %v18000_v60 = vpop.f32.mrb[124].mxu1 }
 0x96f   : > { %v19485_v16 = vpack.c.bf16 %v18057_v15, %v18056_v18  ;;  %v18001_v35 = vadd.f32 %v18000_v60, %v17861_v40  ;;  %v18002_v23 = vpop.f32.mrb[125].mxu1 }
 0x970   : > { %v19268_v59 = vpop.f32.mrb[24].mxu0  ;;  %v17866_v31 = vadd.f32 %v19267_v1, %v17718_v12 }
 0x971   : > { %v19269_v5 = vpop.f32.mrb[25].mxu0  ;;  %19486 = vmatpush3.bf16.msra.mxu0 %v19485_v16  ;;  %v18058_v17 = vmax.f32 %v18001_v35, 0.0  ;;  %v17725_v35 = vld [vmem:[%s23712_s6 + $0x60] sm:$0xff] }
 0x972   : > { %v19270_v45 = vadd.f32 %v19269_v5, %v19268_v59  ;;  %v18005_v52 = vpop.f32.mrb[126].mxu1  ;;  %19487 = vmatprep.subr.bf16.mxu0 %v20278_v6 }
 0x973   : > { %v18006_v34 = vadd.f32 %v18005_v52, %v17866_v31  ;;  %v18007_v46 = vpop.f32.mrb[127].mxu1 }
 0x974   : > { %v19271_v10 = vpop.f32.mrb[26].mxu0  ;;  %v17871_v27 = vadd.f32 %v19270_v45, %v17719_v24 }
 0x975   : > { %v19272_v44 = vpop.f32.mrb[27].mxu0  ;;  %v18059_v26 = vmax.f32 %v18006_v34, 0.0  ;;  %v17726_v34 = vld [vmem:[%s23712_s6 + $0x68] sm:$0xff] }
 0x976   : > { %v19273_v22 = vadd.f32 %v19272_v44, %v19271_v10  ;;  %v18010_v25 = vpop.f32.mrb[128].mxu1 }
 0x977   : > { %v19488_v30 = vpack.c.bf16 %v18059_v26, %v18058_v17  ;;  %v18011_v47 = vadd.f32 %v18010_v25, %v17871_v27  ;;  %v18012_v9 = vpop.f32.mrb[129].mxu1 }
 0x978   : > { %v19274_v38 = vpop.f32.mrb[28].mxu0  ;;  %v17876_v0 = vadd.f32 %v19273_v22, %v17720_v3 }
 0x979   : > { %v19275_v32 = vpop.f32.mrb[29].mxu0  ;;  %19489 = vmatpush3.bf16.msra.mxu0 %v19488_v30  ;;  %v18060_v11 = vmax.f32 %v18011_v47, 0.0  ;;  %v17727_v47 = vld [vmem:[%s23712_s6 + $0x70] sm:$0xff] }
 0x97a   : > { %v19276_v54 = vadd.f32 %v19275_v32, %v19274_v38  ;;  %v18015_v29 = vpop.f32.mrb[130].mxu1  ;;  %19490 = vmatprep.subr.bf16.mxu0 %v20278_v6 }
 0x97b   : > { %v18016_v61 = vadd.f32 %v18015_v29, %v17876_v0  ;;  %v18017_v43 = vpop.f32.mrb[131].mxu1 }
 0x97c   : > { %v19277_v49 = vpop.f32.mrb[30].mxu0  ;;  %v17881_v7 = vadd.f32 %v19276_v54, %v17721_v20 }
 0x97d   : > { %v19278_v56 = vpop.f32.mrb[31].mxu0  ;;  %v18061_v50 = vmax.f32 %v18016_v61, 0.0 }
 0x97e   : > { %v19279_v53 = vadd.f32 %v19278_v56, %v19277_v49  ;;  %v18020_v58 = vpop.f32.mrb[132].mxu1 }
 0x97f   : > { %v19491_v4 = vpack.c.bf16 %v18061_v50, %v18060_v11  ;;  %v18021_v41 = vadd.f32 %v18020_v58, %v17881_v7  ;;  %v18022_v62 = vpop.f32.mrb[133].mxu1  ;;  %v18071_v11 = vld [vmem:[%s23713_s7 + $0x10] sm:$0xff]  ;;  %v18072_v50 = vld [vmem:[%s23713_s7 + $0x18] sm:$0xff]  ;;  %v18074_v58 = vld [vmem:[%s23713_s7 + $0x28] sm:$0xff] }
 0x980   : > { %v19280_v57 = vpop.f32.mrb[32].mxu0  ;;  %v17886_v55 = vadd.f32 %v19279_v53, %v17722_v51  ;;  %v18069_v51 = vld [vmem:[%s23713_s7] sm:$0xff] }
 0x981   : > { %v19281_v13 = vpop.f32.mrb[33].mxu0  ;;  %19492 = vmatpush3.bf16.msra.mxu0 %v19491_v4  ;;  %v18062_v39 = vmax.f32 %v18021_v41, 0.0  ;;  %v18073_v53 = vld [vmem:[%s23713_s7 + $0x20] sm:$0xff]  ;;  %v18075_v4 = vld [vmem:[%s23713_s7 + $0x30] sm:$0xff]  ;;  %v18076_v41 = vld [vmem:[%s23713_s7 + $0x38] sm:$0xff] }
 0x982   : > { %v19282_v36 = vadd.f32 %v19281_v13, %v19280_v57  ;;  %v18025_v48 = vpop.f32.mrb[134].mxu1  ;;  %19493 = vmatprep.subr.bf16.mxu0 %v20278_v6  ;;  %v18077_v62 = vld [vmem:[%s23713_s7 + $0x40] sm:$0xff]  ;;  %v18078_v57 = vld [vmem:[%s23713_s7 + $0x48] sm:$0xff] }
 0x983   : > { %v18026_v2 = vadd.f32 %v18025_v48, %v17886_v55  ;;  %v18027_v63 = vpop.f32.mrb[135].mxu1  ;;  %v18079_v55 = vld [vmem:[%s23713_s7 + $0x50] sm:$0xf]  ;;  %v18255_v13 = vld [vmem:[%s23715_s9] sm:$0xff] }
 0x984   : > { %v19283_v21 = vpop.f32.mrb[34].mxu0  ;;  %v17891_v28 = vadd.f32 %v19282_v36, %v17723_v8  ;;  %19419 = vmatprep.mubr.msk.f32.mxu1 %vm18259_vm13, %v18255_v13  ;;  %v18080_v8 = vld [vmem:[%s23714_s8] sm:$0xff] }
 0x985   : > { %v19284_v19 = vpop.f32.mrb[35].mxu0  ;;  %v18063_v14 = vmax.f32 %v18026_v2, 0.0 }
 0x986   : > { %v19285_v40 = vadd.f32 %v19284_v19, %v19283_v21  ;;  %v18030_v33 = vpop.f32.mrb[136].mxu1 }
 0x987   : > { %v19494_v12 = vpack.c.bf16 %v18063_v14, %v18062_v39  ;;  %v18031_v18 = vadd.f32 %v18030_v33, %v17891_v28  ;;  %v18032_v15 = vpop.f32.mrb[137].mxu1  ;;  %v18082_v39 = vld [vmem:[%s23714_s8 + $0x10] sm:$0xff] }
 0x988   : > { %v19286_v1 = vpop.f32.mrb[36].mxu0  ;;  %v17896_v60 = vadd.f32 %v19285_v40, %v17724_v42 }
 0x989   : > { %v19287_v16 = vpop.f32.mrb[37].mxu0  ;;  %19495 = vmatpush3.bf16.msra.mxu0 %v19494_v12  ;;  %v18064_v46 = vmax.f32 %v18031_v18, 0.0  ;;  %v18083_v12 = vld [vmem:[%s23714_s8 + $0x18] sm:$0xff] }
 0x98a   : > { %v19288_v23 = vadd.f32 %v19287_v16, %v19286_v1  ;;  %v18035_v59 = vpop.f32.mrb[138].mxu1  ;;  %19496 = vmatprep.subr.bf16.mxu0 %v20278_v6 }
 0x98b   : > { %v18036_v31 = vadd.f32 %v18035_v59, %v17896_v60  ;;  %v18037_v5 = vpop.f32.mrb[139].mxu1 }
 0x98c   : > { %v19289_v24 = vpop.f32.mrb[38].mxu0  ;;  %v17901_v45 = vadd.f32 %v19288_v23, %v17725_v35  ;;  %v18084_v23 = vld [vmem:[%s23714_s8 + $0x20] sm:$0xff] }
 0x98d   : > { %v19290_v52 = vpop.f32.mrb[39].mxu0  ;;  %v18065_v10 = vmax.f32 %v18036_v31, 0.0 }
 0x98e   : > { %v19291_v27 = vadd.f32 %v19290_v52, %v19289_v24  ;;  %v18040_v44 = vpop.f32.mrb[140].mxu1  ;;  %v18085_v24 = vld [vmem:[%s23714_s8 + $0x28] sm:$0xff] }
 0x98f   : > { %v19497_v3 = vpack.c.bf16 %v18065_v10, %v18064_v46  ;;  %v18041_v17 = vadd.f32 %v18040_v44, %v17901_v45  ;;  %v18042_v26 = vpop.f32.mrb[141].mxu1  ;;  %v18086_v44 = vld [vmem:[%s23714_s8 + $0x30] sm:$0xff] }
 0x990   : > { %v19292_v22 = vpop.f32.mrb[40].mxu0  ;;  %v17906_v25 = vadd.f32 %v19291_v27, %v17726_v34 }
 0x991   : > { %v19293_v30 = vpop.f32.mrb[41].mxu0  ;;  %19498 = vmatpush3.bf16.msra.mxu0 %v19497_v3  ;;  %v18066_v54 = vmax.f32 %v18041_v17, 0.0 }
 0x992   : > { %v19294_v9 = vadd.f32 %v19293_v30, %v19292_v22  ;;  %v18045_v38 = vpop.f32.mrb[142].mxu1  ;;  %19499 = vmatprep.subr.bf16.mxu0 %v20278_v6  ;;  %v18070_v6 = vld [vmem:[%s23713_s7 + $0x8] sm:$0xff]  ;;  %v18087_v22 = vld [vmem:[%s23714_s8 + $0x38] sm:$0xff] }
 0x993   : > { %v18046_v0 = vadd.f32 %v18045_v38, %v17906_v25  ;;  %v18047_v32 = vpop.f32.mrb[143].mxu1 }
 0x994   : > { %v17911_v20 = vadd.f32 %v19294_v9, %v17727_v47  ;;  %v18088_v32 = vld [vmem:[%s23714_s8 + $0x40] sm:$0xff] }
 0x995   : > { %v18067_v29 = vmax.f32 %v18046_v0, 0.0 }
 0x996   : > { %v18050_v61 = vpop.f32.mrb[144].mxu1 }
 0x997   : > { %v19500_v43 = vpack.c.bf16 %v18067_v29, %v18066_v54  ;;  %v18051_v49 = vadd.f32 %v18050_v61, %v17911_v20  ;;  %v18052_v7 = vpop.f32.mrb[145].mxu1  ;;  %v18089_v61 = vld [vmem:[%s23714_s8 + $0x48] sm:$0xff] }
 0x999   : > { %v18068_v56 = vmax.f32 %v18051_v49, 0.0  ;;  %19501 = vmatpush3.bf16.msra.mxu0 %v19500_v43 }
 0x99a   : > { %19362 = vmatprep.subr.mxu0 %v23759_v37 }
 0x99d   : > { %19363 = vmatpush3.msra.mxu0 %v18068_v56 }
 0x99e   : > { %19365 = vmatmul.mubr.msk.f32.vlgmr.msra.gmra.mrb[42].mxu0 %vm10180_vm6, %v18069_v51  ;;  %v18090_v51 = vld [vmem:[%s23714_s8 + $0x50] sm:$0xf] }
 0x99f   : > { %19367 = vmatprep.mubr.msk.f32.mxu0 %vm20282_vm11, %v23759_v37 }
 0x9a2   : > { %19368 = vmatmul.mubr.msk.f32.gmra.mrb[44].mxu0 %vm10180_vm6, %v18070_v6 }
 0x9a3   : > { %19370 = vmatprep.mubr.msk.f32.mxu0 %vm20282_vm11, %v23759_v37 }
 0x9a6   : > { %19371 = vmatmul.mubr.msk.f32.gmra.mrb[46].mxu0 %vm10180_vm6, %v18071_v11 }
 0x9a7   : > { %19373 = vmatprep.mubr.msk.f32.mxu0 %vm20282_vm11, %v23759_v37 }
 0x9aa   : > { %19374 = vmatmul.mubr.msk.f32.gmra.mrb[48].mxu0 %vm10180_vm6, %v18072_v50 }
 0x9ab   : > { %19376 = vmatprep.mubr.msk.f32.mxu0 %vm20282_vm11, %v23759_v37 }
 0x9ae   : > { %19377 = vmatmul.mubr.msk.f32.gmra.mrb[50].mxu0 %vm10180_vm6, %v18073_v53 }
 0x9af   : > { %19379 = vmatprep.mubr.msk.f32.mxu0 %vm20282_vm11, %v23759_v37 }
 0x9b2   : > { %19380 = vmatmul.mubr.msk.f32.gmra.mrb[52].mxu0 %vm10180_vm6, %v18074_v58 }
 0x9b3   : > { %19382 = vmatprep.mubr.msk.f32.mxu0 %vm20282_vm11, %v23759_v37 }
 0x9b6   : > { %19383 = vmatmul.mubr.msk.f32.gmra.mrb[54].mxu0 %vm10180_vm6, %v18075_v4 }
 0x9b7   : > { %19385 = vmatprep.mubr.msk.f32.mxu0 %vm20282_vm11, %v23759_v37 }
 0x9ba   : > { %19386 = vmatmul.mubr.msk.f32.gmra.mrb[56].mxu0 %vm10180_vm6, %v18076_v41 }
 0x9bb   : > { %19388 = vmatprep.mubr.msk.f32.mxu0 %vm20282_vm11, %v23759_v37 }
 0x9be   : > { %19389 = vmatmul.mubr.msk.f32.gmra.mrb[58].mxu0 %vm10180_vm6, %v18077_v62  ;;  %v18256_v62 = vld [vmem:[%s23715_s9 + $0x8] sm:$0x1f] }
 0x9bf   : > { %19391 = vmatprep.mubr.msk.f32.mxu0 %vm20282_vm11, %v23759_v37 }
 0x9c2   : > { %19392 = vmatmul.mubr.msk.f32.gmra.mrb[60].mxu0 %vm10180_vm6, %v18078_v57  ;;  %v18258_v57 = vld [vmem:[%s23716_s10 + $0x8] sm:$0x1f] }
 0x9c3   : > { %19394 = vmatprep.mubr.msk.f32.mxu0 %vm20282_vm11, %v23759_v37  ;;  %v18081_v37 = vld [vmem:[%s23714_s8 + $0x8] sm:$0xff] }
 0x9c6   : > { %19395 = vmatmul.mubr.msk.f32.gmra.mrb[62].mxu0 %vm10180_vm6, %v18079_v55  ;;  %v18257_v55 = vld [vmem:[%s23716_s10] sm:$0xff] }
 0xa71   : > { %v18190_v36 = vpop.f32.mrb[42].mxu0 }
 0xa72   : > { %v19366_v48 = vpop.f32.mrb[43].mxu0  ;;  %v18191_v2 = vadd.f32 %v18190_v36, %v18080_v8 }
 0xa74   : > { %v18244_v19 = vmax.f32 %v18191_v2, 0.0 }
 0xa75   : > { %v18195_v63 = vpop.f32.mrb[44].mxu0 }
 0xa76   : > { %v18196_v21 = vadd.f32 %v18195_v63, %v18081_v37  ;;  %v19369_v28 = vpop.f32.mrb[45].mxu0 }
 0xa78   : > { %v18245_v42 = vmax.f32 %v18196_v21, 0.0 }
 0xa79   : > { %v18200_v14 = vpop.f32.mrb[46].mxu0 }
 0xa7a   : > { %v19502_v40 = vpack.c.bf16 %v18245_v42, %v18244_v19  ;;  %v19372_v33 = vpop.f32.mrb[47].mxu0  ;;  %v18201_v18 = vadd.f32 %v18200_v14, %v18082_v39 }
 0xa7c   : > { %19503 = vmatprep.subr.bf16.mxu1 %v19502_v40  ;;  %v18246_v16 = vmax.f32 %v18201_v18, 0.0 }
 0xa7d   : > { %v18205_v15 = vpop.f32.mrb[48].mxu0  ;;  %19505 = vmatpush3.bf16.msra.mxu1 %v19502_v40 }
 0xa7e   : > { %v18206_v1 = vadd.f32 %v18205_v15, %v18083_v12  ;;  %v19375_v60 = vpop.f32.mrb[49].mxu0 }
 0xa80   : > { %v18247_v35 = vmax.f32 %v18206_v1, 0.0 }
 0xa81   : > { %v18210_v59 = vpop.f32.mrb[50].mxu0 }
 0xa82   : > { %v19506_v31 = vpack.c.bf16 %v18247_v35, %v18246_v16  ;;  %v19378_v5 = vpop.f32.mrb[51].mxu0  ;;  %v18211_v45 = vadd.f32 %v18210_v59, %v18084_v23 }
 0xa84   : > { %19507 = vmatprep.subr.bf16.mxu1 %v19506_v31  ;;  %v18248_v10 = vmax.f32 %v18211_v45, 0.0 }
 0xa85   : > { %v18215_v52 = vpop.f32.mrb[52].mxu0  ;;  %19509 = vmatpush3.bf16.msra.mxu1 %v19506_v31 }
 0xa86   : > { %v18216_v34 = vadd.f32 %v18215_v52, %v18085_v24  ;;  %v19381_v46 = vpop.f32.mrb[53].mxu0 }
 0xa88   : > { %v18249_v27 = vmax.f32 %v18216_v34, 0.0 }
 0xa89   : > { %v18220_v3 = vpop.f32.mrb[54].mxu0 }
 0xa8a   : > { %v19510_v17 = vpack.c.bf16 %v18249_v27, %v18248_v10  ;;  %v19384_v26 = vpop.f32.mrb[55].mxu0  ;;  %v18221_v25 = vadd.f32 %v18220_v3, %v18086_v44 }
 0xa8c   : > { %19511 = vmatprep.subr.bf16.mxu1 %v19510_v17  ;;  %v18250_v38 = vmax.f32 %v18221_v25, 0.0 }
 0xa8d   : > { %19513 = vmatpush3.bf16.msra.mxu1 %v19510_v17  ;;  %v18225_v30 = vpop.f32.mrb[56].mxu0 }
 0xa8e   : > { %v18226_v47 = vadd.f32 %v18225_v30, %v18087_v22  ;;  %v19387_v9 = vpop.f32.mrb[57].mxu0 }
 0xa90   : > { %v18251_v0 = vmax.f32 %v18226_v47, 0.0 }
 0xa91   : > { %v18230_v20 = vpop.f32.mrb[58].mxu0 }
 0xa92   : > { %v19514_v54 = vpack.c.bf16 %v18251_v0, %v18250_v38  ;;  %v19390_v29 = vpop.f32.mrb[59].mxu0  ;;  %v18231_v43 = vadd.f32 %v18230_v20, %v18088_v32 }
 0xa94   : > { %19515 = vmatprep.subr.bf16.mxu1 %v19514_v54  ;;  %v18252_v6 = vmax.f32 %v18231_v43, 0.0 }
 0xa95   : > { %19517 = vmatpush3.bf16.msra.mxu1 %v19514_v54  ;;  %v18235_v49 = vpop.f32.mrb[60].mxu0 }
 0xa96   : > { %v18236_v7 = vadd.f32 %v18235_v49, %v18089_v61  ;;  %v19393_v56 = vpop.f32.mrb[61].mxu0 }
 0xa98   : > { %v18253_v11 = vmax.f32 %v18236_v7, 0.0 }
 0xa99   : > { %v18240_v50 = vpop.f32.mrb[62].mxu0 }
 0xa9a   : > { %v19518_v53 = vpack.c.bf16 %v18253_v11, %v18252_v6  ;;  %v18241_v58 = vadd.f32 %v18240_v50, %v18090_v51  ;;  %v19396_v4 = vpop.f32.mrb[63].mxu0 }
 0xa9c   : > { %19519 = vmatprep.subr.bf16.mxu1 %v19518_v53  ;;  %v18254_v41 = vmax.f32 %v18241_v58, 0.0 }
 0xa9d   : > { %19521 = vmatpush3.bf16.msra.mxu1 %v19518_v53 }
 0xa9e   : > { %19417 = vmatprep.subr.msk.mxu1 %vm18266_vm14, %v18254_v41 }
 0xaa1   : > { %19418 = vmatpush3.msk.msra.mxu1 %vm18266_vm14, %v18254_v41 }
 0xaa2   : > { %19420 = vmatmul.mubr.msk.f32.vlgmr.msra.gmra.mrb[146].mxu1 %vm18259_vm13, %v18256_v62 }
 0xb75   : > { %v19421_v13 = vpop.f32.mrb[146].mxu1 }
 0xb76   : > { %v18342_v8 = vadd.f32 %v19421_v13, %v18258_v57  ;;  %v18336_v36 = vpop.f32.mrb[147].mxu1 }
 0xb77   : > { %v18337_v48 = vadd.f32 %v18336_v36, %v18257_v55 }
 0xb78   : > { %18348 = vst.msk [vmem:[%s386_s19 + $0x8] sm:$0x1f] %vm18347_vm15, %v18342_v8 }
 0xb79   : > { %18346 = vst.msk [vmem:[%s386_s19] sm:$0xff] %vm18345_vm4, %v18337_v48 }
 0xb7a PF: > { %s21_s17 = sadd.s32 1, %s20251_s17  }
 0xb7b   : > { %p18_p4 = scmp.ge.s32.totalorder %s21_s17, 4  }
 0xb7d   :  { %20 = sbr.rel (!%p18_p4) target bundleno = 1 (0x1), region = 142 }

</bundles_post_ra>
